<compile_context>
chip_gen: v7x
topology: tpu7x:2x2x1
jax: 0.10.0
libtpu: 0.0.40
codegen_flags: <defaults>
</compile_context>

<pallas_src>
import jax
import jax.numpy as jnp
from jax import lax
from jax.experimental import pallas as pl
from jax.experimental.pallas import tpu as pltpu

_SQRT2_INV = 0.7071067811865476


def _gelu(v):
    # exact (erf) GELU == torch.nn.GELU() / F.gelu default
    return 0.5 * v * (1.0 + lax.erf(v * _SQRT2_INV))


def _round_up(x, m):
    return (x + m - 1) // m * m


# ----------------------------------------------------------------------------
# kernel builder (closes over static geometry)
# ----------------------------------------------------------------------------
def _build_kernel(H, W, Cin, mid, Cout, E):
    Wp = W + 2
    L = (H + 2) * Wp                              # real flat padded-plane length
    Lpad = _round_up(L, 128)                      # lane-dense plane length
    PADM = max(128, _round_up(Wp + 1, 128))       # lane-aligned margin >= |tap offset|
    Lp = PADM + Lpad + PADM                       # scratch width
    offs = [(dy - 1) * Wp + (dx - 1) for dy in range(3) for dx in range(3)]

    def kernel(x_ref, t_ref, mask_ref, w1_ref, w2_ref, w3_ref, w4_ref,
               gn_ref, lwlb_ref, out_ref, pad_ref):
        mask = mask_ref[...]                                    # (1, Lpad) f32
        # Zero ONLY the two lane-aligned margin strips; the interior is fully
        # overwritten before every conv (safe under the megacore split).
        pad_ref[:, :PADM] = jnp.zeros((Cin, PADM), jnp.bfloat16)
        pad_ref[:, PADM + Lpad:] = jnp.zeros((Cin, PADM), jnp.bfloat16)

        x = x_ref[0]                                            # (Cin, Lpad) f32
        gp = gn_ref[...]                                        # (Cin, 8) f32

        def conv3x3(w_ref, cin, cout):
            # 9 accumulating MXU matmuls; taps are shifted lane slices of the
            # persistent bf16 padded-plane scratch (no im2col materialisation).
            acc = jnp.zeros((cout, Lpad), jnp.float32)
            for k, o in enumerate(offs):
                tap = pad_ref[:cin, PADM + o:PADM + o + Lpad]   # bf16 (cin, Lpad)
                acc = acc + jnp.dot(w_ref[k], tap,
                                    preferred_element_type=jnp.float32)
            return acc

        def groupnorm1(h, c, gcol, eps=1e-5):
            # GroupNorm(1, C): stats over ALL valid (C, H, W) positions of the
            # sample -> divisor is C*H*W (this was the previous bug).
            gamma = gp[:c, gcol:gcol + 1]
            beta = gp[:c, gcol + 1:gcol + 2]
            inv = 1.0 / float(c * H * W)
            hm = h * mask                                       # ring/tail -> 0
            s = jnp.sum(hm)
            ss = jnp.sum(hm * hm)
            mean = s * inv
            var = jnp.maximum(ss * inv - mean * mean, 0.0)
            yn = (hm - mean) * lax.rsqrt(var + eps)
            return (yn * gamma + beta) * mask                   # ring/tail back to 0

        # ---- DoubleConv(in, in, residual=True) ----
        pad_ref[:Cin, PADM:PADM + Lpad] = x.astype(jnp.bfloat16)
        h = conv3x3(w1_ref, Cin, Cin)
        h = _gelu(groupnorm1(h, Cin, 0))
        pad_ref[:Cin, PADM:PADM + Lpad] = h.astype(jnp.bfloat16)
        h = conv3x3(w2_ref, Cin, Cin)
        h = groupnorm1(h, Cin, 2)
        x1 = _gelu(x + h)                                       # ring/tail stay 0

        # ---- DoubleConv(in, out, mid=in//2), no residual, no trailing GELU ----
        pad_ref[:Cin, PADM:PADM + Lpad] = x1.astype(jnp.bfloat16)
        h = conv3x3(w3_ref, Cin, mid)
        h = _gelu(groupnorm1(h, mid, 4))
        pad_ref[:mid, PADM:PADM + Lpad] = h.astype(jnp.bfloat16)
        h = conv3x3(w4_ref, mid, Cout)
        h = groupnorm1(h, Cout, 6)

        # ---- emb_layer: SiLU -> Linear, broadcast over the spatial lanes ----
        t = t_ref[0]                                            # (1, E)
        t = t * jax.nn.sigmoid(t)
        lw = lwlb_ref[:, :E]                                    # (Cout, E)
        lb = lwlb_ref[:, E:E + 1]                               # (Cout, 1)
        emb = jnp.sum(lw * t, axis=1, keepdims=True) + lb       # (Cout, 1)
        out_ref[0] = (h + emb).astype(out_ref.dtype)            # lane-dense store

    return kernel, L, Lpad, Lp


# ----------------------------------------------------------------------------
# plain-JAX glue
# ----------------------------------------------------------------------------
def _bilinear_up2_nchw(x):
    # x: (N, C, H, W) -> (N, C, 2H, 2W); bilinear, align_corners=True
    N, C, H, W = x.shape
    Ho, Wo = 2 * H, 2 * W
    ys = jnp.arange(Ho, dtype=jnp.float32) * (H - 1) / (Ho - 1)
    xs = jnp.arange(Wo, dtype=jnp.float32) * (W - 1) / (Wo - 1)
    y0 = jnp.floor(ys).astype(jnp.int32)
    x0 = jnp.floor(xs).astype(jnp.int32)
    y1 = jnp.minimum(y0 + 1, H - 1)
    x1 = jnp.minimum(x0 + 1, W - 1)
    wy = (ys - y0.astype(jnp.float32))[None, None, :, None]
    wx = (xs - x0.astype(jnp.float32))[None, None, None, :]
    r0 = jnp.take(x, y0, axis=2)
    r1 = jnp.take(x, y1, axis=2)
    rows = r0 * (1.0 - wy) + r1 * wy
    c0 = jnp.take(rows, x0, axis=3)
    c1 = jnp.take(rows, x1, axis=3)
    return c0 * (1.0 - wx) + c1 * wx


def _conv_w9(w):
    # HWIO (3,3,Cin,Cout) -> (9, Cout, Cin); tap index k = dy*3 + dx
    cin, cout = w.shape[2], w.shape[3]
    return jnp.transpose(w, (0, 1, 3, 2)).reshape(9, cout, cin)


def up_forward(x_nchw, skip_nchw, t, p):
    """Up.forward(x, skip_x, t) — NCHW in, NCHW out."""
    x = x_nchw.astype(jnp.float32)
    skip = skip_nchw.astype(jnp.float32)
    # TODO(synk): fuse the bilinear x2 upsample + zero-pad into the kernel (two
    # interpolation matmuls) to remove one HBM round-trip of xcat (v5e item).
    xcat = jnp.concatenate([skip, _bilinear_up2_nchw(x)], axis=1)   # (N, Cin, H, W)
    N, Cin, H, W = xcat.shape
    E = t.shape[-1]
    mid = p['w3'].shape[-1]
    Cout = p['w4'].shape[-1]

    kernel, L, Lpad, Lp = _build_kernel(H, W, Cin, mid, Cout, E)

    # pad the plane ONCE in the wrapper, flatten spatial to the lane axis,
    # extend to the 128-aligned Lpad with zeros
    xflat = jnp.pad(xcat, ((0, 0), (0, 0), (1, 1), (1, 1))).reshape(N, Cin, L)
    xflat = jnp.pad(xflat, ((0, 0), (0, 0), (0, Lpad - L)))
    t3 = t.reshape(N, 1, E).astype(jnp.float32)
    mask = jnp.pad(jnp.ones((H, W), jnp.float32), ((1, 1), (1, 1))).reshape(1, L)
    mask = jnp.pad(mask, ((0, 0), (0, Lpad - L)))

    # MXU operands in bf16 (f32 accumulation in-kernel)
    w1 = _conv_w9(p['w1']).astype(jnp.bfloat16)
    w2 = _conv_w9(p['w2']).astype(jnp.bfloat16)
    w3 = _conv_w9(p['w3']).astype(jnp.bfloat16)
    w4 = _conv_w9(p['w4']).astype(jnp.bfloat16)

    # pack the 8 GroupNorm affines into one (Cin, 8) slab: cols g1 b1 g2 b2 g3 b3 g4 b4
    def col(a):
        a = a.reshape(-1, 1)
        return jnp.pad(a, ((0, Cin - a.shape[0]), (0, 0)))
    gnslab = jnp.concatenate(
        [col(p['g1']), col(p['b1']), col(p['g2']), col(p['b2']),
         col(p['g3']), col(p['b3']), col(p['g4']), col(p['b4'])], axis=1)
    # pack the emb Linear into one (Cout, E+1) slab [W^T | b]
    lwlb = jnp.concatenate([p['lw'].T, p['lb'].reshape(-1, 1)], axis=1)

    def const_spec(a):
        nd = a.ndim
        return pl.BlockSpec(a.shape, lambda n, _z=(0,) * nd: _z)

    # TODO(synk): for large N on a single TensorCore, process Nb samples per
    # grid step side-by-side on the lane axis to amortise per-step/MXU fixed
    # cost; with N=2 the per-sample grid keeps both v7x TCs busy instead.
    grid_spec = pltpu.PrefetchScalarGridSpec(
        num_scalar_prefetch=0,
        grid=(N,),
        in_specs=[pl.BlockSpec((1, Cin, Lpad), lambda n: (n, 0, 0)),
                  pl.BlockSpec((1, 1, E), lambda n: (n, 0, 0)),
                  const_spec(mask),
                  const_spec(w1), const_spec(w2), const_spec(w3), const_spec(w4),
                  const_spec(gnslab), const_spec(lwlb)],
        out_specs=pl.BlockSpec((1, Cout, Lpad), lambda n: (n, 0, 0)),
        scratch_shapes=[pltpu.VMEM((Cin, Lp), jnp.bfloat16)],
    )

    flops = 2 * N * Lpad * 9 * (Cin * Cin + Cin * Cin + Cin * mid + mid * Cout)
    transcendentals = N * (Lpad * (2 * Cin + mid) + E + 8)
    bytes_accessed = (4 * (xflat.size + t3.size + mask.size + gnslab.size
                           + lwlb.size + N * Cout * Lpad)
                      + 2 * (w1.size + w2.size + w3.size + w4.size))

    out = pl.pallas_call(
        kernel,
        out_shape=jax.ShapeDtypeStruct((N, Cout, Lpad), jnp.float32),
        grid_spec=grid_spec,
        compiler_params=pltpu.CompilerParams(
            dimension_semantics=("parallel",),          # batch across 2 TCs on v7x
            vmem_limit_bytes=32 * 1024 * 1024),
        cost_estimate=pl.CostEstimate(
            flops=int(flops),
            transcendentals=int(transcendentals),
            bytes_accessed=int(bytes_accessed)),
    )(xflat, t3, mask, w1, w2, w3, w4, gnslab, lwlb)

    # lane-dense (Cout, Lpad) output -> NCHW by slice + reshape (no transpose)
    out = out[:, :, :L].reshape(N, Cout, H + 2, W + 2)
    return out[:, :, 1:H + 1, 1:W + 1]


# ----------------------------------------------------------------------------
# deterministic parameter construction (synthetic; matches __init__ shapes)
# ----------------------------------------------------------------------------
def init_params(key, in_ch, out_ch, emb_dim):
    mid = in_ch // 2
    ks = jax.random.split(key, 16)

    def conv_w(k, cin, cout):
        # stored as HWIO (kh, kw, Cin, Cout)
        return jax.random.normal(k, (3, 3, cin, cout), jnp.float32) / jnp.sqrt(9.0 * cin)

    def gn(kg, kb, c):
        g = 1.0 + 0.1 * jax.random.normal(kg, (1, c), jnp.float32)
        b = 0.1 * jax.random.normal(kb, (1, c), jnp.float32)
        return g, b

    g1, b1 = gn(ks[1], ks[2], in_ch)
    g2, b2 = gn(ks[4], ks[5], in_ch)
    g3, b3 = gn(ks[7], ks[8], mid)
    g4, b4 = gn(ks[10], ks[11], out_ch)
    return {
        'w1': conv_w(ks[0], in_ch, in_ch),  'g1': g1, 'b1': b1,
        'w2': conv_w(ks[3], in_ch, in_ch),  'g2': g2, 'b2': b2,
        'w3': conv_w(ks[6], in_ch, mid),    'g3': g3, 'b3': b3,
        'w4': conv_w(ks[9], mid, out_ch),   'g4': g4, 'b4': b4,
        'lw': 0.1 * jax.random.normal(ks[12], (emb_dim, out_ch), jnp.float32),
        'lb': 0.1 * jax.random.normal(ks[13], (1, out_ch), jnp.float32),
    }


# ----------------------------------------------------------------------------
# pure-JAX f32 reference (for validation only)
# ----------------------------------------------------------------------------
def ref_forward(x_nchw, skip_nchw, t, p):
    x = jnp.transpose(x_nchw, (0, 2, 3, 1)).astype(jnp.float32)
    skip = jnp.transpose(skip_nchw, (0, 2, 3, 1)).astype(jnp.float32)
    xu = jnp.transpose(_bilinear_up2_nchw(jnp.transpose(x, (0, 3, 1, 2))), (0, 2, 3, 1))
    xc = jnp.concatenate([skip, xu], axis=-1)

    def conv(a, w):
        return lax.conv_general_dilated(
            a, w, (1, 1), 'SAME',
            dimension_numbers=('NHWC', 'HWIO', 'NHWC'),
            precision=lax.Precision.HIGHEST)

    def gn(y, g, b):
        m = jnp.mean(y, axis=(1, 2, 3), keepdims=True)
        v = jnp.mean((y - m) ** 2, axis=(1, 2, 3), keepdims=True)
        return ((y - m) * lax.rsqrt(v + 1e-5) * g.reshape(1, 1, 1, -1)
                + b.reshape(1, 1, 1, -1))

    gelu = lambda v: 0.5 * v * (1.0 + lax.erf(v * _SQRT2_INV))

    h = gelu(gn(conv(xc, p['w1']), p['g1'], p['b1']))
    h = gn(conv(h, p['w2']), p['g2'], p['b2'])
    x1 = gelu(xc + h)
    h = gelu(gn(conv(x1, p['w3']), p['g3'], p['b3']))
    h = gn(conv(h, p['w4']), p['g4'], p['b4'])
    emb = jnp.dot(t * jax.nn.sigmoid(t), p['lw']) + p['lb']
    out = h + emb[:, None, None, :]
    return jnp.transpose(out, (0, 3, 1, 2))


# ----------------------------------------------------------------------------
if __name__ == "__main__":
    key = jax.random.PRNGKey(0)
    k1, k2, k3, k4 = jax.random.split(key, 4)

    # Up(in_channels=8, out_channels=4, emb_dim=32)
    N, Cx, Hs, Ws = 2, 4, 8, 8            # x before 2x upsample
    Cskip = 4                             # skip_x channels
    in_ch = Cx + Cskip                    # 8 (after concat)
    out_ch = 4
    emb_dim = 32

    x = jax.random.normal(k1, (N, Cx, Hs, Ws), jnp.float32)           # NCHW
    skip_x = jax.random.normal(k2, (N, Cskip, 2 * Hs, 2 * Ws), jnp.float32)
    t = jax.random.normal(k3, (N, emb_dim), jnp.float32)
    params = init_params(k4, in_ch, out_ch, emb_dim)

    out = up_forward(x, skip_x, t, params)
    out = jax.block_until_ready(out)

    ref = ref_forward(x, skip_x, t, params)
    err = float(jnp.max(jnp.abs(out - ref)))
    assert out.shape == (N, out_ch, 2 * Hs, 2 * Ws), out.shape
    # bf16 MXU operands (f32 accumulation / f32 GroupNorm & elementwise) give
    # ~1e-2-scale absolute error vs the all-f32 reference at these magnitudes.
    assert err < 5e-2, f"max abs err {err}"
    print("KERNEL_OK")
</pallas_src>

<mosaic_0001>
module attributes {stable_mosaic.version = 11 : i64} {
  func.func @kernel(%arg0: i32, %arg1: memref<1x8x384xf32, #tpu.memory_space<vmem>>, %arg2: memref<1x1x32xf32, #tpu.memory_space<vmem>>, %arg3: memref<1x384xf32, #tpu.memory_space<vmem>>, %arg4: memref<9x8x8xbf16, #tpu.memory_space<vmem>>, %arg5: memref<9x8x8xbf16, #tpu.memory_space<vmem>>, %arg6: memref<9x4x8xbf16, #tpu.memory_space<vmem>>, %arg7: memref<9x4x4xbf16, #tpu.memory_space<vmem>>, %arg8: memref<8x8xf32, #tpu.memory_space<vmem>>, %arg9: memref<4x33xf32, #tpu.memory_space<vmem>>, %arg10: memref<1x4x384xf32, #tpu.memory_space<vmem>>, %arg11: memref<8x640xbf16, #tpu.memory_space<vmem>>) attributes {dimension_semantics = [#tpu.dimension_semantics<parallel>], iteration_bounds = array<i64: 2>, scalar_prefetch = 0 : i64, scratch_operands = 1 : i64, tpu.core_type = #tpu.core_type<tc>, window_params = [{transform_indices = @transform_0, window_bounds = array<i64: 1, 8, 384>}, {transform_indices = @transform_1, window_bounds = array<i64: 1, 1, 32>}, {pipeline_mode = #tpu.pipeline_mode<synchronous>, transform_indices = @transform_2, window_bounds = array<i64: 1, 384>}, {pipeline_mode = #tpu.pipeline_mode<synchronous>, transform_indices = @transform_3, window_bounds = array<i64: 9, 8, 8>}, {pipeline_mode = #tpu.pipeline_mode<synchronous>, transform_indices = @transform_4, window_bounds = array<i64: 9, 8, 8>}, {pipeline_mode = #tpu.pipeline_mode<synchronous>, transform_indices = @transform_5, window_bounds = array<i64: 9, 4, 8>}, {pipeline_mode = #tpu.pipeline_mode<synchronous>, transform_indices = @transform_6, window_bounds = array<i64: 9, 4, 4>}, {pipeline_mode = #tpu.pipeline_mode<synchronous>, transform_indices = @transform_7, window_bounds = array<i64: 8, 8>}, {pipeline_mode = #tpu.pipeline_mode<synchronous>, transform_indices = @transform_8, window_bounds = array<i64: 4, 33>}, {transform_indices = @transform_9, window_bounds = array<i64: 1, 4, 384>}]} {
    %c0 = arith.constant 0 : index
    %c0_0 = arith.constant 0 : index
    %0 = vector.load %arg3[%c0, %c0_0] : memref<1x384xf32, #tpu.memory_space<vmem>>, vector<1x384xf32>
    %cst = arith.constant 0.000000e+00 : bf16
    %1 = vector.broadcast %cst : bf16 to vector<8x128xbf16>
    %c0_1 = arith.constant 0 : index
    %c0_2 = arith.constant 0 : index
    %2 = vector.load %arg11[%c0_1, %c0_2] : memref<8x640xbf16, #tpu.memory_space<vmem>>, vector<8x128xbf16>
    tpu.vector_store %arg11[%c0_1, %c0_2], %1 {strides = array<i32>} : memref<8x640xbf16, #tpu.memory_space<vmem>>, vector<8x128xbf16>,
    %cst_3 = arith.constant 0.000000e+00 : bf16
    %3 = vector.broadcast %cst_3 : bf16 to vector<8x128xbf16>
    %c0_4 = arith.constant 0 : index
    %c512 = arith.constant 512 : index
    %4 = vector.load %arg11[%c0_4, %c512] : memref<8x640xbf16, #tpu.memory_space<vmem>>, vector<8x128xbf16>
    tpu.vector_store %arg11[%c0_4, %c512], %3 {strides = array<i32>} : memref<8x640xbf16, #tpu.memory_space<vmem>>, vector<8x128xbf16>,
    %c0_5 = arith.constant 0 : index
    %c0_6 = arith.constant 0 : index
    %c0_7 = arith.constant 0 : index
    %5 = vector.load %arg1[%c0_5, %c0_6, %c0_7] : memref<1x8x384xf32, #tpu.memory_space<vmem>>, vector<1x8x384xf32>
    %6 = vector.shape_cast %5 : vector<1x8x384xf32> to vector<8x384xf32>
    %c0_8 = arith.constant 0 : index
    %c0_9 = arith.constant 0 : index
    %7 = vector.load %arg8[%c0_8, %c0_9] : memref<8x8xf32, #tpu.memory_space<vmem>>, vector<8x8xf32>
    %8 = arith.truncf %6 : vector<8x384xf32> to vector<8x384xbf16>
    %c0_10 = arith.constant 0 : index
    %c128 = arith.constant 128 : index
    %9 = vector.load %arg11[%c0_10, %c128] : memref<8x640xbf16, #tpu.memory_space<vmem>>, vector<8x384xbf16>
    tpu.vector_store %arg11[%c0_10, %c128], %8 {strides = array<i32>} : memref<8x640xbf16, #tpu.memory_space<vmem>>, vector<8x384xbf16>,
    %cst_11 = arith.constant 0.000000e+00 : f32
    %10 = vector.broadcast %cst_11 : f32 to vector<8x384xf32>
    %c0_12 = arith.constant 0 : index
    %c109 = arith.constant 109 : index
    %11 = vector.load %arg11[%c0_12, %c109] : memref<8x640xbf16, #tpu.memory_space<vmem>>, vector<8x384xbf16>
    %c0_13 = arith.constant 0 : index
    %c0_14 = arith.constant 0 : index
    %c0_15 = arith.constant 0 : index
    %12 = vector.load %arg4[%c0_13, %c0_14, %c0_15] : memref<9x8x8xbf16, #tpu.memory_space<vmem>>, vector<1x8x8xbf16>
    %13 = vector.shape_cast %12 : vector<1x8x8xbf16> to vector<8x8xbf16>
    %cst_16 = arith.constant dense<0.000000e+00> : vector<8x384xf32>
    %14 = tpu.matmul %13, %11, %cst_16 {dimension_numbers = #tpu.dot_dimension_numbers<[1], [0], [0], [1], [0, 0, 1, 1], [], []>} : vector<8x8xbf16>, vector<8x384xbf16>, vector<8x384xf32> -> vector<8x384xf32>
    %15 = arith.addf %10, %14 : vector<8x384xf32>
    %c0_17 = arith.constant 0 : index
    %c110 = arith.constant 110 : index
    %16 = vector.load %arg11[%c0_17, %c110] : memref<8x640xbf16, #tpu.memory_space<vmem>>, vector<8x384xbf16>
    %c1 = arith.constant 1 : index
    %c0_18 = arith.constant 0 : index
    %c0_19 = arith.constant 0 : index
    %17 = vector.load %arg4[%c1, %c0_18, %c0_19] : memref<9x8x8xbf16, #tpu.memory_space<vmem>>, vector<1x8x8xbf16>
    %18 = vector.shape_cast %17 : vector<1x8x8xbf16> to vector<8x8xbf16>
    %cst_20 = arith.constant dense<0.000000e+00> : vector<8x384xf32>
    %19 = tpu.matmul %18, %16, %cst_20 {dimension_numbers = #tpu.dot_dimension_numbers<[1], [0], [0], [1], [0, 0, 1, 1], [], []>} : vector<8x8xbf16>, vector<8x384xbf16>, vector<8x384xf32> -> vector<8x384xf32>
    %20 = arith.addf %15, %19 : vector<8x384xf32>
    %c0_21 = arith.constant 0 : index
    %c111 = arith.constant 111 : index
    %21 = vector.load %arg11[%c0_21, %c111] : memref<8x640xbf16, #tpu.memory_space<vmem>>, vector<8x384xbf16>
    %c2 = arith.constant 2 : index
    %c0_22 = arith.constant 0 : index
    %c0_23 = arith.constant 0 : index
    %22 = vector.load %arg4[%c2, %c0_22, %c0_23] : memref<9x8x8xbf16, #tpu.memory_space<vmem>>, vector<1x8x8xbf16>
    %23 = vector.shape_cast %22 : vector<1x8x8xbf16> to vector<8x8xbf16>
    %cst_24 = arith.constant dense<0.000000e+00> : vector<8x384xf32>
    %24 = tpu.matmul %23, %21, %cst_24 {dimension_numbers = #tpu.dot_dimension_numbers<[1], [0], [0], [1], [0, 0, 1, 1], [], []>} : vector<8x8xbf16>, vector<8x384xbf16>, vector<8x384xf32> -> vector<8x384xf32>
    %25 = arith.addf %20, %24 : vector<8x384xf32>
    %c0_25 = arith.constant 0 : index
    %c127 = arith.constant 127 : index
    %26 = vector.load %arg11[%c0_25, %c127] : memref<8x640xbf16, #tpu.memory_space<vmem>>, vector<8x384xbf16>
    %c3 = arith.constant 3 : index
    %c0_26 = arith.constant 0 : index
    %c0_27 = arith.constant 0 : index
    %27 = vector.load %arg4[%c3, %c0_26, %c0_27] : memref<9x8x8xbf16, #tpu.memory_space<vmem>>, vector<1x8x8xbf16>
    %28 = vector.shape_cast %27 : vector<1x8x8xbf16> to vector<8x8xbf16>
    %cst_28 = arith.constant dense<0.000000e+00> : vector<8x384xf32>
    %29 = tpu.matmul %28, %26, %cst_28 {dimension_numbers = #tpu.dot_dimension_numbers<[1], [0], [0], [1], [0, 0, 1, 1], [], []>} : vector<8x8xbf16>, vector<8x384xbf16>, vector<8x384xf32> -> vector<8x384xf32>
    %30 = arith.addf %25, %29 : vector<8x384xf32>
    %c0_29 = arith.constant 0 : index
    %c128_30 = arith.constant 128 : index
    %31 = vector.load %arg11[%c0_29, %c128_30] : memref<8x640xbf16, #tpu.memory_space<vmem>>, vector<8x384xbf16>
    %c4 = arith.constant 4 : index
    %c0_31 = arith.constant 0 : index
    %c0_32 = arith.constant 0 : index
    %32 = vector.load %arg4[%c4, %c0_31, %c0_32] : memref<9x8x8xbf16, #tpu.memory_space<vmem>>, vector<1x8x8xbf16>
    %33 = vector.shape_cast %32 : vector<1x8x8xbf16> to vector<8x8xbf16>
    %cst_33 = arith.constant dense<0.000000e+00> : vector<8x384xf32>
    %34 = tpu.matmul %33, %31, %cst_33 {dimension_numbers = #tpu.dot_dimension_numbers<[1], [0], [0], [1], [0, 0, 1, 1], [], []>} : vector<8x8xbf16>, vector<8x384xbf16>, vector<8x384xf32> -> vector<8x384xf32>
    %35 = arith.addf %30, %34 : vector<8x384xf32>
    %c0_34 = arith.constant 0 : index
    %c129 = arith.constant 129 : index
    %36 = vector.load %arg11[%c0_34, %c129] : memref<8x640xbf16, #tpu.memory_space<vmem>>, vector<8x384xbf16>
    %c5 = arith.constant 5 : index
    %c0_35 = arith.constant 0 : index
    %c0_36 = arith.constant 0 : index
    %37 = vector.load %arg4[%c5, %c0_35, %c0_36] : memref<9x8x8xbf16, #tpu.memory_space<vmem>>, vector<1x8x8xbf16>
    %38 = vector.shape_cast %37 : vector<1x8x8xbf16> to vector<8x8xbf16>
    %cst_37 = arith.constant dense<0.000000e+00> : vector<8x384xf32>
    %39 = tpu.matmul %38, %36, %cst_37 {dimension_numbers = #tpu.dot_dimension_numbers<[1], [0], [0], [1], [0, 0, 1, 1], [], []>} : vector<8x8xbf16>, vector<8x384xbf16>, vector<8x384xf32> -> vector<8x384xf32>
    %40 = arith.addf %35, %39 : vector<8x384xf32>
    %c0_38 = arith.constant 0 : index
    %c145 = arith.constant 145 : index
    %41 = vector.load %arg11[%c0_38, %c145] : memref<8x640xbf16, #tpu.memory_space<vmem>>, vector<8x384xbf16>
    %c6 = arith.constant 6 : index
    %c0_39 = arith.constant 0 : index
    %c0_40 = arith.constant 0 : index
    %42 = vector.load %arg4[%c6, %c0_39, %c0_40] : memref<9x8x8xbf16, #tpu.memory_space<vmem>>, vector<1x8x8xbf16>
    %43 = vector.shape_cast %42 : vector<1x8x8xbf16> to vector<8x8xbf16>
    %cst_41 = arith.constant dense<0.000000e+00> : vector<8x384xf32>
    %44 = tpu.matmul %43, %41, %cst_41 {dimension_numbers = #tpu.dot_dimension_numbers<[1], [0], [0], [1], [0, 0, 1, 1], [], []>} : vector<8x8xbf16>, vector<8x384xbf16>, vector<8x384xf32> -> vector<8x384xf32>
    %45 = arith.addf %40, %44 : vector<8x384xf32>
    %c0_42 = arith.constant 0 : index
    %c146 = arith.constant 146 : index
    %46 = vector.load %arg11[%c0_42, %c146] : memref<8x640xbf16, #tpu.memory_space<vmem>>, vector<8x384xbf16>
    %c7 = arith.constant 7 : index
    %c0_43 = arith.constant 0 : index
    %c0_44 = arith.constant 0 : index
    %47 = vector.load %arg4[%c7, %c0_43, %c0_44] : memref<9x8x8xbf16, #tpu.memory_space<vmem>>, vector<1x8x8xbf16>
    %48 = vector.shape_cast %47 : vector<1x8x8xbf16> to vector<8x8xbf16>
    %cst_45 = arith.constant dense<0.000000e+00> : vector<8x384xf32>
    %49 = tpu.matmul %48, %46, %cst_45 {dimension_numbers = #tpu.dot_dimension_numbers<[1], [0], [0], [1], [0, 0, 1, 1], [], []>} : vector<8x8xbf16>, vector<8x384xbf16>, vector<8x384xf32> -> vector<8x384xf32>
    %50 = arith.addf %45, %49 : vector<8x384xf32>
    %c0_46 = arith.constant 0 : index
    %c147 = arith.constant 147 : index
    %51 = vector.load %arg11[%c0_46, %c147] : memref<8x640xbf16, #tpu.memory_space<vmem>>, vector<8x384xbf16>
    %c8 = arith.constant 8 : index
    %c0_47 = arith.constant 0 : index
    %c0_48 = arith.constant 0 : index
    %52 = vector.load %arg4[%c8, %c0_47, %c0_48] : memref<9x8x8xbf16, #tpu.memory_space<vmem>>, vector<1x8x8xbf16>
    %53 = vector.shape_cast %52 : vector<1x8x8xbf16> to vector<8x8xbf16>
    %cst_49 = arith.constant dense<0.000000e+00> : vector<8x384xf32>
    %54 = tpu.matmul %53, %51, %cst_49 {dimension_numbers = #tpu.dot_dimension_numbers<[1], [0], [0], [1], [0, 0, 1, 1], [], []>} : vector<8x8xbf16>, vector<8x384xbf16>, vector<8x384xf32> -> vector<8x384xf32>
    %55 = arith.addf %50, %54 : vector<8x384xf32>
    %56 = vector.extract_strided_slice %7 {offsets = [0, 0], sizes = [8, 1], strides = [1, 1]} : vector<8x8xf32> to vector<8x1xf32>
    %57 = vector.extract_strided_slice %7 {offsets = [0, 1], sizes = [8, 1], strides = [1, 1]} : vector<8x8xf32> to vector<8x1xf32>
    %58 = vector.broadcast %0 : vector<1x384xf32> to vector<8x384xf32>
    %59 = arith.mulf %55, %58 : vector<8x384xf32>
    %60 = vector.shape_cast %59 : vector<8x384xf32> to vector<1x8x384xf32>
    %cst_50 = arith.constant dense<0.000000e+00> : vector<1xf32>
    %61 = vector.multi_reduction <add>, %60, %cst_50 [1, 2] : vector<1x8x384xf32> to vector<1xf32>
    %62 = vector.shape_cast %61 : vector<1xf32> to vector<1x1x1xf32>
    %63 = vector.extract %62[0, 0, 0] : f32 from vector<1x1x1xf32>
    %64 = arith.mulf %59, %59 : vector<8x384xf32>
    %65 = vector.shape_cast %64 : vector<8x384xf32> to vector<1x8x384xf32>
    %cst_51 = arith.constant dense<0.000000e+00> : vector<1xf32>
    %66 = vector.multi_reduction <add>, %65, %cst_51 [1, 2] : vector<1x8x384xf32> to vector<1xf32>
    %67 = vector.shape_cast %66 : vector<1xf32> to vector<1x1x1xf32>
    %68 = vector.extract %67[0, 0, 0] : f32 from vector<1x1x1xf32>
    %cst_52 = arith.constant 4.8828125E-4 : f32
    %69 = arith.mulf %63, %cst_52 : f32
    %cst_53 = arith.constant 4.8828125E-4 : f32
    %70 = arith.mulf %68, %cst_53 : f32
    %71 = arith.mulf %69, %69 : f32
    %72 = arith.subf %70, %71 : f32
    %cst_54 = arith.constant 0.000000e+00 : f32
    %73 = arith.maximumf %72, %cst_54 : f32
    %74 = vector.broadcast %69 : f32 to vector<8x384xf32>
    %75 = arith.subf %59, %74 : vector<8x384xf32>
    %cst_55 = arith.constant 9.99999974E-6 : f32
    %76 = arith.addf %73, %cst_55 : f32
    %77 = math.rsqrt %76 : f32
    %78 = vector.broadcast %77 : f32 to vector<8x384xf32>
    %79 = arith.mulf %75, %78 : vector<8x384xf32>
    %80 = vector.broadcast %56 : vector<8x1xf32> to vector<8x384xf32>
    %81 = arith.mulf %79, %80 : vector<8x384xf32>
    %82 = vector.broadcast %57 : vector<8x1xf32> to vector<8x384xf32>
    %83 = arith.addf %81, %82 : vector<8x384xf32>
    %84 = vector.broadcast %0 : vector<1x384xf32> to vector<8x384xf32>
    %85 = arith.mulf %83, %84 : vector<8x384xf32>
    %cst_56 = arith.constant 5.000000e-01 : f32
    %86 = vector.broadcast %cst_56 : f32 to vector<8x384xf32>
    %87 = arith.mulf %86, %85 : vector<8x384xf32>
    %cst_57 = arith.constant 0.707106769 : f32
    %88 = vector.broadcast %cst_57 : f32 to vector<8x384xf32>
    %89 = arith.mulf %85, %88 : vector<8x384xf32>
    %90 = math.erf %89 : vector<8x384xf32>
    %cst_58 = arith.constant 1.000000e+00 : f32
    %91 = vector.broadcast %cst_58 : f32 to vector<8x384xf32>
    %92 = arith.addf %91, %90 : vector<8x384xf32>
    %93 = arith.mulf %87, %92 : vector<8x384xf32>
    %94 = arith.truncf %93 : vector<8x384xf32> to vector<8x384xbf16>
    %c0_59 = arith.constant 0 : index
    %c128_60 = arith.constant 128 : index
    %95 = vector.load %arg11[%c0_59, %c128_60] : memref<8x640xbf16, #tpu.memory_space<vmem>>, vector<8x384xbf16>
    tpu.vector_store %arg11[%c0_59, %c128_60], %94 {strides = array<i32>} : memref<8x640xbf16, #tpu.memory_space<vmem>>, vector<8x384xbf16>,
    %cst_61 = arith.constant 0.000000e+00 : f32
    %96 = vector.broadcast %cst_61 : f32 to vector<8x384xf32>
    %c0_62 = arith.constant 0 : index
    %c109_63 = arith.constant 109 : index
    %97 = vector.load %arg11[%c0_62, %c109_63] : memref<8x640xbf16, #tpu.memory_space<vmem>>, vector<8x384xbf16>
    %c0_64 = arith.constant 0 : index
    %c0_65 = arith.constant 0 : index
    %c0_66 = arith.constant 0 : index
    %98 = vector.load %arg5[%c0_64, %c0_65, %c0_66] : memref<9x8x8xbf16, #tpu.memory_space<vmem>>, vector<1x8x8xbf16>
    %99 = vector.shape_cast %98 : vector<1x8x8xbf16> to vector<8x8xbf16>
    %cst_67 = arith.constant dense<0.000000e+00> : vector<8x384xf32>
    %100 = tpu.matmul %99, %97, %cst_67 {dimension_numbers = #tpu.dot_dimension_numbers<[1], [0], [0], [1], [0, 0, 1, 1], [], []>} : vector<8x8xbf16>, vector<8x384xbf16>, vector<8x384xf32> -> vector<8x384xf32>
    %101 = arith.addf %96, %100 : vector<8x384xf32>
    %c0_68 = arith.constant 0 : index
    %c110_69 = arith.constant 110 : index
    %102 = vector.load %arg11[%c0_68, %c110_69] : memref<8x640xbf16, #tpu.memory_space<vmem>>, vector<8x384xbf16>
    %c1_70 = arith.constant 1 : index
    %c0_71 = arith.constant 0 : index
    %c0_72 = arith.constant 0 : index
    %103 = vector.load %arg5[%c1_70, %c0_71, %c0_72] : memref<9x8x8xbf16, #tpu.memory_space<vmem>>, vector<1x8x8xbf16>
    %104 = vector.shape_cast %103 : vector<1x8x8xbf16> to vector<8x8xbf16>
    %cst_73 = arith.constant dense<0.000000e+00> : vector<8x384xf32>
    %105 = tpu.matmul %104, %102, %cst_73 {dimension_numbers = #tpu.dot_dimension_numbers<[1], [0], [0], [1], [0, 0, 1, 1], [], []>} : vector<8x8xbf16>, vector<8x384xbf16>, vector<8x384xf32> -> vector<8x384xf32>
    %106 = arith.addf %101, %105 : vector<8x384xf32>
    %c0_74 = arith.constant 0 : index
    %c111_75 = arith.constant 111 : index
    %107 = vector.load %arg11[%c0_74, %c111_75] : memref<8x640xbf16, #tpu.memory_space<vmem>>, vector<8x384xbf16>
    %c2_76 = arith.constant 2 : index
    %c0_77 = arith.constant 0 : index
    %c0_78 = arith.constant 0 : index
    %108 = vector.load %arg5[%c2_76, %c0_77, %c0_78] : memref<9x8x8xbf16, #tpu.memory_space<vmem>>, vector<1x8x8xbf16>
    %109 = vector.shape_cast %108 : vector<1x8x8xbf16> to vector<8x8xbf16>
    %cst_79 = arith.constant dense<0.000000e+00> : vector<8x384xf32>
    %110 = tpu.matmul %109, %107, %cst_79 {dimension_numbers = #tpu.dot_dimension_numbers<[1], [0], [0], [1], [0, 0, 1, 1], [], []>} : vector<8x8xbf16>, vector<8x384xbf16>, vector<8x384xf32> -> vector<8x384xf32>
    %111 = arith.addf %106, %110 : vector<8x384xf32>
    %c0_80 = arith.constant 0 : index
    %c127_81 = arith.constant 127 : index
    %112 = vector.load %arg11[%c0_80, %c127_81] : memref<8x640xbf16, #tpu.memory_space<vmem>>, vector<8x384xbf16>
    %c3_82 = arith.constant 3 : index
    %c0_83 = arith.constant 0 : index
    %c0_84 = arith.constant 0 : index
    %113 = vector.load %arg5[%c3_82, %c0_83, %c0_84] : memref<9x8x8xbf16, #tpu.memory_space<vmem>>, vector<1x8x8xbf16>
    %114 = vector.shape_cast %113 : vector<1x8x8xbf16> to vector<8x8xbf16>
    %cst_85 = arith.constant dense<0.000000e+00> : vector<8x384xf32>
    %115 = tpu.matmul %114, %112, %cst_85 {dimension_numbers = #tpu.dot_dimension_numbers<[1], [0], [0], [1], [0, 0, 1, 1], [], []>} : vector<8x8xbf16>, vector<8x384xbf16>, vector<8x384xf32> -> vector<8x384xf32>
    %116 = arith.addf %111, %115 : vector<8x384xf32>
    %c0_86 = arith.constant 0 : index
    %c128_87 = arith.constant 128 : index
    %117 = vector.load %arg11[%c0_86, %c128_87] : memref<8x640xbf16, #tpu.memory_space<vmem>>, vector<8x384xbf16>
    %c4_88 = arith.constant 4 : index
    %c0_89 = arith.constant 0 : index
    %c0_90 = arith.constant 0 : index
    %118 = vector.load %arg5[%c4_88, %c0_89, %c0_90] : memref<9x8x8xbf16, #tpu.memory_space<vmem>>, vector<1x8x8xbf16>
    %119 = vector.shape_cast %118 : vector<1x8x8xbf16> to vector<8x8xbf16>
    %cst_91 = arith.constant dense<0.000000e+00> : vector<8x384xf32>
    %120 = tpu.matmul %119, %117, %cst_91 {dimension_numbers = #tpu.dot_dimension_numbers<[1], [0], [0], [1], [0, 0, 1, 1], [], []>} : vector<8x8xbf16>, vector<8x384xbf16>, vector<8x384xf32> -> vector<8x384xf32>
    %121 = arith.addf %116, %120 : vector<8x384xf32>
    %c0_92 = arith.constant 0 : index
    %c129_93 = arith.constant 129 : index
    %122 = vector.load %arg11[%c0_92, %c129_93] : memref<8x640xbf16, #tpu.memory_space<vmem>>, vector<8x384xbf16>
    %c5_94 = arith.constant 5 : index
    %c0_95 = arith.constant 0 : index
    %c0_96 = arith.constant 0 : index
    %123 = vector.load %arg5[%c5_94, %c0_95, %c0_96] : memref<9x8x8xbf16, #tpu.memory_space<vmem>>, vector<1x8x8xbf16>
    %124 = vector.shape_cast %123 : vector<1x8x8xbf16> to vector<8x8xbf16>
    %cst_97 = arith.constant dense<0.000000e+00> : vector<8x384xf32>
    %125 = tpu.matmul %124, %122, %cst_97 {dimension_numbers = #tpu.dot_dimension_numbers<[1], [0], [0], [1], [0, 0, 1, 1], [], []>} : vector<8x8xbf16>, vector<8x384xbf16>, vector<8x384xf32> -> vector<8x384xf32>
    %126 = arith.addf %121, %125 : vector<8x384xf32>
    %c0_98 = arith.constant 0 : index
    %c145_99 = arith.constant 145 : index
    %127 = vector.load %arg11[%c0_98, %c145_99] : memref<8x640xbf16, #tpu.memory_space<vmem>>, vector<8x384xbf16>
    %c6_100 = arith.constant 6 : index
    %c0_101 = arith.constant 0 : index
    %c0_102 = arith.constant 0 : index
    %128 = vector.load %arg5[%c6_100, %c0_101, %c0_102] : memref<9x8x8xbf16, #tpu.memory_space<vmem>>, vector<1x8x8xbf16>
    %129 = vector.shape_cast %128 : vector<1x8x8xbf16> to vector<8x8xbf16>
    %cst_103 = arith.constant dense<0.000000e+00> : vector<8x384xf32>
    %130 = tpu.matmul %129, %127, %cst_103 {dimension_numbers = #tpu.dot_dimension_numbers<[1], [0], [0], [1], [0, 0, 1, 1], [], []>} : vector<8x8xbf16>, vector<8x384xbf16>, vector<8x384xf32> -> vector<8x384xf32>
    %131 = arith.addf %126, %130 : vector<8x384xf32>
    %c0_104 = arith.constant 0 : index
    %c146_105 = arith.constant 146 : index
    %132 = vector.load %arg11[%c0_104, %c146_105] : memref<8x640xbf16, #tpu.memory_space<vmem>>, vector<8x384xbf16>
    %c7_106 = arith.constant 7 : index
    %c0_107 = arith.constant 0 : index
    %c0_108 = arith.constant 0 : index
    %133 = vector.load %arg5[%c7_106, %c0_107, %c0_108] : memref<9x8x8xbf16, #tpu.memory_space<vmem>>, vector<1x8x8xbf16>
    %134 = vector.shape_cast %133 : vector<1x8x8xbf16> to vector<8x8xbf16>
    %cst_109 = arith.constant dense<0.000000e+00> : vector<8x384xf32>
    %135 = tpu.matmul %134, %132, %cst_109 {dimension_numbers = #tpu.dot_dimension_numbers<[1], [0], [0], [1], [0, 0, 1, 1], [], []>} : vector<8x8xbf16>, vector<8x384xbf16>, vector<8x384xf32> -> vector<8x384xf32>
    %136 = arith.addf %131, %135 : vector<8x384xf32>
    %c0_110 = arith.constant 0 : index
    %c147_111 = arith.constant 147 : index
    %137 = vector.load %arg11[%c0_110, %c147_111] : memref<8x640xbf16, #tpu.memory_space<vmem>>, vector<8x384xbf16>
    %c8_112 = arith.constant 8 : index
    %c0_113 = arith.constant 0 : index
    %c0_114 = arith.constant 0 : index
    %138 = vector.load %arg5[%c8_112, %c0_113, %c0_114] : memref<9x8x8xbf16, #tpu.memory_space<vmem>>, vector<1x8x8xbf16>
    %139 = vector.shape_cast %138 : vector<1x8x8xbf16> to vector<8x8xbf16>
    %cst_115 = arith.constant dense<0.000000e+00> : vector<8x384xf32>
    %140 = tpu.matmul %139, %137, %cst_115 {dimension_numbers = #tpu.dot_dimension_numbers<[1], [0], [0], [1], [0, 0, 1, 1], [], []>} : vector<8x8xbf16>, vector<8x384xbf16>, vector<8x384xf32> -> vector<8x384xf32>
    %141 = arith.addf %136, %140 : vector<8x384xf32>
    %142 = vector.extract_strided_slice %7 {offsets = [0, 2], sizes = [8, 1], strides = [1, 1]} : vector<8x8xf32> to vector<8x1xf32>
    %143 = vector.extract_strided_slice %7 {offsets = [0, 3], sizes = [8, 1], strides = [1, 1]} : vector<8x8xf32> to vector<8x1xf32>
    %144 = vector.broadcast %0 : vector<1x384xf32> to vector<8x384xf32>
    %145 = arith.mulf %141, %144 : vector<8x384xf32>
    %146 = vector.shape_cast %145 : vector<8x384xf32> to vector<1x8x384xf32>
    %cst_116 = arith.constant dense<0.000000e+00> : vector<1xf32>
    %147 = vector.multi_reduction <add>, %146, %cst_116 [1, 2] : vector<1x8x384xf32> to vector<1xf32>
    %148 = vector.shape_cast %147 : vector<1xf32> to vector<1x1x1xf32>
    %149 = vector.extract %148[0, 0, 0] : f32 from vector<1x1x1xf32>
    %150 = arith.mulf %145, %145 : vector<8x384xf32>
    %151 = vector.shape_cast %150 : vector<8x384xf32> to vector<1x8x384xf32>
    %cst_117 = arith.constant dense<0.000000e+00> : vector<1xf32>
    %152 = vector.multi_reduction <add>, %151, %cst_117 [1, 2] : vector<1x8x384xf32> to vector<1xf32>
    %153 = vector.shape_cast %152 : vector<1xf32> to vector<1x1x1xf32>
    %154 = vector.extract %153[0, 0, 0] : f32 from vector<1x1x1xf32>
    %cst_118 = arith.constant 4.8828125E-4 : f32
    %155 = arith.mulf %149, %cst_118 : f32
    %cst_119 = arith.constant 4.8828125E-4 : f32
    %156 = arith.mulf %154, %cst_119 : f32
    %157 = arith.mulf %155, %155 : f32
    %158 = arith.subf %156, %157 : f32
    %cst_120 = arith.constant 0.000000e+00 : f32
    %159 = arith.maximumf %158, %cst_120 : f32
    %160 = vector.broadcast %155 : f32 to vector<8x384xf32>
    %161 = arith.subf %145, %160 : vector<8x384xf32>
    %cst_121 = arith.constant 9.99999974E-6 : f32
    %162 = arith.addf %159, %cst_121 : f32
    %163 = math.rsqrt %162 : f32
    %164 = vector.broadcast %163 : f32 to vector<8x384xf32>
    %165 = arith.mulf %161, %164 : vector<8x384xf32>
    %166 = vector.broadcast %142 : vector<8x1xf32> to vector<8x384xf32>
    %167 = arith.mulf %165, %166 : vector<8x384xf32>
    %168 = vector.broadcast %143 : vector<8x1xf32> to vector<8x384xf32>
    %169 = arith.addf %167, %168 : vector<8x384xf32>
    %170 = vector.broadcast %0 : vector<1x384xf32> to vector<8x384xf32>
    %171 = arith.mulf %169, %170 : vector<8x384xf32>
    %172 = arith.addf %6, %171 : vector<8x384xf32>
    %cst_122 = arith.constant 5.000000e-01 : f32
    %173 = vector.broadcast %cst_122 : f32 to vector<8x384xf32>
    %174 = arith.mulf %173, %172 : vector<8x384xf32>
    %cst_123 = arith.constant 0.707106769 : f32
    %175 = vector.broadcast %cst_123 : f32 to vector<8x384xf32>
    %176 = arith.mulf %172, %175 : vector<8x384xf32>
    %177 = math.erf %176 : vector<8x384xf32>
    %cst_124 = arith.constant 1.000000e+00 : f32
    %178 = vector.broadcast %cst_124 : f32 to vector<8x384xf32>
    %179 = arith.addf %178, %177 : vector<8x384xf32>
    %180 = arith.mulf %174, %179 : vector<8x384xf32>
    %181 = arith.truncf %180 : vector<8x384xf32> to vector<8x384xbf16>
    %c0_125 = arith.constant 0 : index
    %c128_126 = arith.constant 128 : index
    %182 = vector.load %arg11[%c0_125, %c128_126] : memref<8x640xbf16, #tpu.memory_space<vmem>>, vector<8x384xbf16>
    tpu.vector_store %arg11[%c0_125, %c128_126], %181 {strides = array<i32>} : memref<8x640xbf16, #tpu.memory_space<vmem>>, vector<8x384xbf16>,
    %cst_127 = arith.constant 0.000000e+00 : f32
    %183 = vector.broadcast %cst_127 : f32 to vector<4x384xf32>
    %c0_128 = arith.constant 0 : index
    %c109_129 = arith.constant 109 : index
    %184 = vector.load %arg11[%c0_128, %c109_129] : memref<8x640xbf16, #tpu.memory_space<vmem>>, vector<8x384xbf16>
    %c0_130 = arith.constant 0 : index
    %c0_131 = arith.constant 0 : index
    %c0_132 = arith.constant 0 : index
    %185 = vector.load %arg6[%c0_130, %c0_131, %c0_132] : memref<9x4x8xbf16, #tpu.memory_space<vmem>>, vector<1x4x8xbf16>
    %186 = vector.shape_cast %185 : vector<1x4x8xbf16> to vector<4x8xbf16>
    %cst_133 = arith.constant dense<0.000000e+00> : vector<4x384xf32>
    %187 = tpu.matmul %186, %184, %cst_133 {dimension_numbers = #tpu.dot_dimension_numbers<[1], [0], [0], [1], [0, 0, 1, 1], [], []>} : vector<4x8xbf16>, vector<8x384xbf16>, vector<4x384xf32> -> vector<4x384xf32>
    %188 = arith.addf %183, %187 : vector<4x384xf32>
    %c0_134 = arith.constant 0 : index
    %c110_135 = arith.constant 110 : index
    %189 = vector.load %arg11[%c0_134, %c110_135] : memref<8x640xbf16, #tpu.memory_space<vmem>>, vector<8x384xbf16>
    %c1_136 = arith.constant 1 : index
    %c0_137 = arith.constant 0 : index
    %c0_138 = arith.constant 0 : index
    %190 = vector.load %arg6[%c1_136, %c0_137, %c0_138] : memref<9x4x8xbf16, #tpu.memory_space<vmem>>, vector<1x4x8xbf16>
    %191 = vector.shape_cast %190 : vector<1x4x8xbf16> to vector<4x8xbf16>
    %cst_139 = arith.constant dense<0.000000e+00> : vector<4x384xf32>
    %192 = tpu.matmul %191, %189, %cst_139 {dimension_numbers = #tpu.dot_dimension_numbers<[1], [0], [0], [1], [0, 0, 1, 1], [], []>} : vector<4x8xbf16>, vector<8x384xbf16>, vector<4x384xf32> -> vector<4x384xf32>
    %193 = arith.addf %188, %192 : vector<4x384xf32>
    %c0_140 = arith.constant 0 : index
    %c111_141 = arith.constant 111 : index
    %194 = vector.load %arg11[%c0_140, %c111_141] : memref<8x640xbf16, #tpu.memory_space<vmem>>, vector<8x384xbf16>
    %c2_142 = arith.constant 2 : index
    %c0_143 = arith.constant 0 : index
    %c0_144 = arith.constant 0 : index
    %195 = vector.load %arg6[%c2_142, %c0_143, %c0_144] : memref<9x4x8xbf16, #tpu.memory_space<vmem>>, vector<1x4x8xbf16>
    %196 = vector.shape_cast %195 : vector<1x4x8xbf16> to vector<4x8xbf16>
    %cst_145 = arith.constant dense<0.000000e+00> : vector<4x384xf32>
    %197 = tpu.matmul %196, %194, %cst_145 {dimension_numbers = #tpu.dot_dimension_numbers<[1], [0], [0], [1], [0, 0, 1, 1], [], []>} : vector<4x8xbf16>, vector<8x384xbf16>, vector<4x384xf32> -> vector<4x384xf32>
    %198 = arith.addf %193, %197 : vector<4x384xf32>
    %c0_146 = arith.constant 0 : index
    %c127_147 = arith.constant 127 : index
    %199 = vector.load %arg11[%c0_146, %c127_147] : memref<8x640xbf16, #tpu.memory_space<vmem>>, vector<8x384xbf16>
    %c3_148 = arith.constant 3 : index
    %c0_149 = arith.constant 0 : index
    %c0_150 = arith.constant 0 : index
    %200 = vector.load %arg6[%c3_148, %c0_149, %c0_150] : memref<9x4x8xbf16, #tpu.memory_space<vmem>>, vector<1x4x8xbf16>
    %201 = vector.shape_cast %200 : vector<1x4x8xbf16> to vector<4x8xbf16>
    %cst_151 = arith.constant dense<0.000000e+00> : vector<4x384xf32>
    %202 = tpu.matmul %201, %199, %cst_151 {dimension_numbers = #tpu.dot_dimension_numbers<[1], [0], [0], [1], [0, 0, 1, 1], [], []>} : vector<4x8xbf16>, vector<8x384xbf16>, vector<4x384xf32> -> vector<4x384xf32>
    %203 = arith.addf %198, %202 : vector<4x384xf32>
    %c0_152 = arith.constant 0 : index
    %c128_153 = arith.constant 128 : index
    %204 = vector.load %arg11[%c0_152, %c128_153] : memref<8x640xbf16, #tpu.memory_space<vmem>>, vector<8x384xbf16>
    %c4_154 = arith.constant 4 : index
    %c0_155 = arith.constant 0 : index
    %c0_156 = arith.constant 0 : index
    %205 = vector.load %arg6[%c4_154, %c0_155, %c0_156] : memref<9x4x8xbf16, #tpu.memory_space<vmem>>, vector<1x4x8xbf16>
    %206 = vector.shape_cast %205 : vector<1x4x8xbf16> to vector<4x8xbf16>
    %cst_157 = arith.constant dense<0.000000e+00> : vector<4x384xf32>
    %207 = tpu.matmul %206, %204, %cst_157 {dimension_numbers = #tpu.dot_dimension_numbers<[1], [0], [0], [1], [0, 0, 1, 1], [], []>} : vector<4x8xbf16>, vector<8x384xbf16>, vector<4x384xf32> -> vector<4x384xf32>
    %208 = arith.addf %203, %207 : vector<4x384xf32>
    %c0_158 = arith.constant 0 : index
    %c129_159 = arith.constant 129 : index
    %209 = vector.load %arg11[%c0_158, %c129_159] : memref<8x640xbf16, #tpu.memory_space<vmem>>, vector<8x384xbf16>
    %c5_160 = arith.constant 5 : index
    %c0_161 = arith.constant 0 : index
    %c0_162 = arith.constant 0 : index
    %210 = vector.load %arg6[%c5_160, %c0_161, %c0_162] : memref<9x4x8xbf16, #tpu.memory_space<vmem>>, vector<1x4x8xbf16>
    %211 = vector.shape_cast %210 : vector<1x4x8xbf16> to vector<4x8xbf16>
    %cst_163 = arith.constant dense<0.000000e+00> : vector<4x384xf32>
    %212 = tpu.matmul %211, %209, %cst_163 {dimension_numbers = #tpu.dot_dimension_numbers<[1], [0], [0], [1], [0, 0, 1, 1], [], []>} : vector<4x8xbf16>, vector<8x384xbf16>, vector<4x384xf32> -> vector<4x384xf32>
    %213 = arith.addf %208, %212 : vector<4x384xf32>
    %c0_164 = arith.constant 0 : index
    %c145_165 = arith.constant 145 : index
    %214 = vector.load %arg11[%c0_164, %c145_165] : memref<8x640xbf16, #tpu.memory_space<vmem>>, vector<8x384xbf16>
    %c6_166 = arith.constant 6 : index
    %c0_167 = arith.constant 0 : index
    %c0_168 = arith.constant 0 : index
    %215 = vector.load %arg6[%c6_166, %c0_167, %c0_168] : memref<9x4x8xbf16, #tpu.memory_space<vmem>>, vector<1x4x8xbf16>
    %216 = vector.shape_cast %215 : vector<1x4x8xbf16> to vector<4x8xbf16>
    %cst_169 = arith.constant dense<0.000000e+00> : vector<4x384xf32>
    %217 = tpu.matmul %216, %214, %cst_169 {dimension_numbers = #tpu.dot_dimension_numbers<[1], [0], [0], [1], [0, 0, 1, 1], [], []>} : vector<4x8xbf16>, vector<8x384xbf16>, vector<4x384xf32> -> vector<4x384xf32>
    %218 = arith.addf %213, %217 : vector<4x384xf32>
    %c0_170 = arith.constant 0 : index
    %c146_171 = arith.constant 146 : index
    %219 = vector.load %arg11[%c0_170, %c146_171] : memref<8x640xbf16, #tpu.memory_space<vmem>>, vector<8x384xbf16>
    %c7_172 = arith.constant 7 : index
    %c0_173 = arith.constant 0 : index
    %c0_174 = arith.constant 0 : index
    %220 = vector.load %arg6[%c7_172, %c0_173, %c0_174] : memref<9x4x8xbf16, #tpu.memory_space<vmem>>, vector<1x4x8xbf16>
    %221 = vector.shape_cast %220 : vector<1x4x8xbf16> to vector<4x8xbf16>
    %cst_175 = arith.constant dense<0.000000e+00> : vector<4x384xf32>
    %222 = tpu.matmul %221, %219, %cst_175 {dimension_numbers = #tpu.dot_dimension_numbers<[1], [0], [0], [1], [0, 0, 1, 1], [], []>} : vector<4x8xbf16>, vector<8x384xbf16>, vector<4x384xf32> -> vector<4x384xf32>
    %223 = arith.addf %218, %222 : vector<4x384xf32>
    %c0_176 = arith.constant 0 : index
    %c147_177 = arith.constant 147 : index
    %224 = vector.load %arg11[%c0_176, %c147_177] : memref<8x640xbf16, #tpu.memory_space<vmem>>, vector<8x384xbf16>
    %c8_178 = arith.constant 8 : index
    %c0_179 = arith.constant 0 : index
    %c0_180 = arith.constant 0 : index
    %225 = vector.load %arg6[%c8_178, %c0_179, %c0_180] : memref<9x4x8xbf16, #tpu.memory_space<vmem>>, vector<1x4x8xbf16>
    %226 = vector.shape_cast %225 : vector<1x4x8xbf16> to vector<4x8xbf16>
    %cst_181 = arith.constant dense<0.000000e+00> : vector<4x384xf32>
    %227 = tpu.matmul %226, %224, %cst_181 {dimension_numbers = #tpu.dot_dimension_numbers<[1], [0], [0], [1], [0, 0, 1, 1], [], []>} : vector<4x8xbf16>, vector<8x384xbf16>, vector<4x384xf32> -> vector<4x384xf32>
    %228 = arith.addf %223, %227 : vector<4x384xf32>
    %229 = vector.extract_strided_slice %7 {offsets = [0, 4], sizes = [4, 1], strides = [1, 1]} : vector<8x8xf32> to vector<4x1xf32>
    %230 = vector.extract_strided_slice %7 {offsets = [0, 5], sizes = [4, 1], strides = [1, 1]} : vector<8x8xf32> to vector<4x1xf32>
    %231 = vector.broadcast %0 : vector<1x384xf32> to vector<4x384xf32>
    %232 = arith.mulf %228, %231 : vector<4x384xf32>
    %233 = vector.shape_cast %232 : vector<4x384xf32> to vector<1x4x384xf32>
    %cst_182 = arith.constant dense<0.000000e+00> : vector<1xf32>
    %234 = vector.multi_reduction <add>, %233, %cst_182 [1, 2] : vector<1x4x384xf32> to vector<1xf32>
    %235 = vector.shape_cast %234 : vector<1xf32> to vector<1x1x1xf32>
    %236 = vector.extract %235[0, 0, 0] : f32 from vector<1x1x1xf32>
    %237 = arith.mulf %232, %232 : vector<4x384xf32>
    %238 = vector.shape_cast %237 : vector<4x384xf32> to vector<1x4x384xf32>
    %cst_183 = arith.constant dense<0.000000e+00> : vector<1xf32>
    %239 = vector.multi_reduction <add>, %238, %cst_183 [1, 2] : vector<1x4x384xf32> to vector<1xf32>
    %240 = vector.shape_cast %239 : vector<1xf32> to vector<1x1x1xf32>
    %241 = vector.extract %240[0, 0, 0] : f32 from vector<1x1x1xf32>
    %cst_184 = arith.constant 9.765625E-4 : f32
    %242 = arith.mulf %236, %cst_184 : f32
    %cst_185 = arith.constant 9.765625E-4 : f32
    %243 = arith.mulf %241, %cst_185 : f32
    %244 = arith.mulf %242, %242 : f32
    %245 = arith.subf %243, %244 : f32
    %cst_186 = arith.constant 0.000000e+00 : f32
    %246 = arith.maximumf %245, %cst_186 : f32
    %247 = vector.broadcast %242 : f32 to vector<4x384xf32>
    %248 = arith.subf %232, %247 : vector<4x384xf32>
    %cst_187 = arith.constant 9.99999974E-6 : f32
    %249 = arith.addf %246, %cst_187 : f32
    %250 = math.rsqrt %249 : f32
    %251 = vector.broadcast %250 : f32 to vector<4x384xf32>
    %252 = arith.mulf %248, %251 : vector<4x384xf32>
    %253 = vector.broadcast %229 : vector<4x1xf32> to vector<4x384xf32>
    %254 = arith.mulf %252, %253 : vector<4x384xf32>
    %255 = vector.broadcast %230 : vector<4x1xf32> to vector<4x384xf32>
    %256 = arith.addf %254, %255 : vector<4x384xf32>
    %257 = vector.broadcast %0 : vector<1x384xf32> to vector<4x384xf32>
    %258 = arith.mulf %256, %257 : vector<4x384xf32>
    %cst_188 = arith.constant 5.000000e-01 : f32
    %259 = vector.broadcast %cst_188 : f32 to vector<4x384xf32>
    %260 = arith.mulf %259, %258 : vector<4x384xf32>
    %cst_189 = arith.constant 0.707106769 : f32
    %261 = vector.broadcast %cst_189 : f32 to vector<4x384xf32>
    %262 = arith.mulf %258, %261 : vector<4x384xf32>
    %263 = math.erf %262 : vector<4x384xf32>
    %cst_190 = arith.constant 1.000000e+00 : f32
    %264 = vector.broadcast %cst_190 : f32 to vector<4x384xf32>
    %265 = arith.addf %264, %263 : vector<4x384xf32>
    %266 = arith.mulf %260, %265 : vector<4x384xf32>
    %267 = arith.truncf %266 : vector<4x384xf32> to vector<4x384xbf16>
    %c0_191 = arith.constant 0 : index
    %c128_192 = arith.constant 128 : index
    %268 = vector.load %arg11[%c0_191, %c128_192] : memref<8x640xbf16, #tpu.memory_space<vmem>>, vector<4x384xbf16>
    tpu.vector_store %arg11[%c0_191, %c128_192], %267 {strides = array<i32>} : memref<8x640xbf16, #tpu.memory_space<vmem>>, vector<4x384xbf16>,
    %cst_193 = arith.constant 0.000000e+00 : f32
    %269 = vector.broadcast %cst_193 : f32 to vector<4x384xf32>
    %c0_194 = arith.constant 0 : index
    %c109_195 = arith.constant 109 : index
    %270 = vector.load %arg11[%c0_194, %c109_195] : memref<8x640xbf16, #tpu.memory_space<vmem>>, vector<4x384xbf16>
    %c0_196 = arith.constant 0 : index
    %c0_197 = arith.constant 0 : index
    %c0_198 = arith.constant 0 : index
    %271 = vector.load %arg7[%c0_196, %c0_197, %c0_198] : memref<9x4x4xbf16, #tpu.memory_space<vmem>>, vector<1x4x4xbf16>
    %272 = vector.shape_cast %271 : vector<1x4x4xbf16> to vector<4x4xbf16>
    %cst_199 = arith.constant dense<0.000000e+00> : vector<4x384xf32>
    %273 = tpu.matmul %272, %270, %cst_199 {dimension_numbers = #tpu.dot_dimension_numbers<[1], [0], [0], [1], [0, 0, 1, 1], [], []>} : vector<4x4xbf16>, vector<4x384xbf16>, vector<4x384xf32> -> vector<4x384xf32>
    %274 = arith.addf %269, %273 : vector<4x384xf32>
    %c0_200 = arith.constant 0 : index
    %c110_201 = arith.constant 110 : index
    %275 = vector.load %arg11[%c0_200, %c110_201] : memref<8x640xbf16, #tpu.memory_space<vmem>>, vector<4x384xbf16>
    %c1_202 = arith.constant 1 : index
    %c0_203 = arith.constant 0 : index
    %c0_204 = arith.constant 0 : index
    %276 = vector.load %arg7[%c1_202, %c0_203, %c0_204] : memref<9x4x4xbf16, #tpu.memory_space<vmem>>, vector<1x4x4xbf16>
    %277 = vector.shape_cast %276 : vector<1x4x4xbf16> to vector<4x4xbf16>
    %cst_205 = arith.constant dense<0.000000e+00> : vector<4x384xf32>
    %278 = tpu.matmul %277, %275, %cst_205 {dimension_numbers = #tpu.dot_dimension_numbers<[1], [0], [0], [1], [0, 0, 1, 1], [], []>} : vector<4x4xbf16>, vector<4x384xbf16>, vector<4x384xf32> -> vector<4x384xf32>
    %279 = arith.addf %274, %278 : vector<4x384xf32>
    %c0_206 = arith.constant 0 : index
    %c111_207 = arith.constant 111 : index
    %280 = vector.load %arg11[%c0_206, %c111_207] : memref<8x640xbf16, #tpu.memory_space<vmem>>, vector<4x384xbf16>
    %c2_208 = arith.constant 2 : index
    %c0_209 = arith.constant 0 : index
    %c0_210 = arith.constant 0 : index
    %281 = vector.load %arg7[%c2_208, %c0_209, %c0_210] : memref<9x4x4xbf16, #tpu.memory_space<vmem>>, vector<1x4x4xbf16>
    %282 = vector.shape_cast %281 : vector<1x4x4xbf16> to vector<4x4xbf16>
    %cst_211 = arith.constant dense<0.000000e+00> : vector<4x384xf32>
    %283 = tpu.matmul %282, %280, %cst_211 {dimension_numbers = #tpu.dot_dimension_numbers<[1], [0], [0], [1], [0, 0, 1, 1], [], []>} : vector<4x4xbf16>, vector<4x384xbf16>, vector<4x384xf32> -> vector<4x384xf32>
    %284 = arith.addf %279, %283 : vector<4x384xf32>
    %c0_212 = arith.constant 0 : index
    %c127_213 = arith.constant 127 : index
    %285 = vector.load %arg11[%c0_212, %c127_213] : memref<8x640xbf16, #tpu.memory_space<vmem>>, vector<4x384xbf16>
    %c3_214 = arith.constant 3 : index
    %c0_215 = arith.constant 0 : index
    %c0_216 = arith.constant 0 : index
    %286 = vector.load %arg7[%c3_214, %c0_215, %c0_216] : memref<9x4x4xbf16, #tpu.memory_space<vmem>>, vector<1x4x4xbf16>
    %287 = vector.shape_cast %286 : vector<1x4x4xbf16> to vector<4x4xbf16>
    %cst_217 = arith.constant dense<0.000000e+00> : vector<4x384xf32>
    %288 = tpu.matmul %287, %285, %cst_217 {dimension_numbers = #tpu.dot_dimension_numbers<[1], [0], [0], [1], [0, 0, 1, 1], [], []>} : vector<4x4xbf16>, vector<4x384xbf16>, vector<4x384xf32> -> vector<4x384xf32>
    %289 = arith.addf %284, %288 : vector<4x384xf32>
    %c0_218 = arith.constant 0 : index
    %c128_219 = arith.constant 128 : index
    %290 = vector.load %arg11[%c0_218, %c128_219] : memref<8x640xbf16, #tpu.memory_space<vmem>>, vector<4x384xbf16>
    %c4_220 = arith.constant 4 : index
    %c0_221 = arith.constant 0 : index
    %c0_222 = arith.constant 0 : index
    %291 = vector.load %arg7[%c4_220, %c0_221, %c0_222] : memref<9x4x4xbf16, #tpu.memory_space<vmem>>, vector<1x4x4xbf16>
    %292 = vector.shape_cast %291 : vector<1x4x4xbf16> to vector<4x4xbf16>
    %cst_223 = arith.constant dense<0.000000e+00> : vector<4x384xf32>
    %293 = tpu.matmul %292, %290, %cst_223 {dimension_numbers = #tpu.dot_dimension_numbers<[1], [0], [0], [1], [0, 0, 1, 1], [], []>} : vector<4x4xbf16>, vector<4x384xbf16>, vector<4x384xf32> -> vector<4x384xf32>
    %294 = arith.addf %289, %293 : vector<4x384xf32>
    %c0_224 = arith.constant 0 : index
    %c129_225 = arith.constant 129 : index
    %295 = vector.load %arg11[%c0_224, %c129_225] : memref<8x640xbf16, #tpu.memory_space<vmem>>, vector<4x384xbf16>
    %c5_226 = arith.constant 5 : index
    %c0_227 = arith.constant 0 : index
    %c0_228 = arith.constant 0 : index
    %296 = vector.load %arg7[%c5_226, %c0_227, %c0_228] : memref<9x4x4xbf16, #tpu.memory_space<vmem>>, vector<1x4x4xbf16>
    %297 = vector.shape_cast %296 : vector<1x4x4xbf16> to vector<4x4xbf16>
    %cst_229 = arith.constant dense<0.000000e+00> : vector<4x384xf32>
    %298 = tpu.matmul %297, %295, %cst_229 {dimension_numbers = #tpu.dot_dimension_numbers<[1], [0], [0], [1], [0, 0, 1, 1], [], []>} : vector<4x4xbf16>, vector<4x384xbf16>, vector<4x384xf32> -> vector<4x384xf32>
    %299 = arith.addf %294, %298 : vector<4x384xf32>
    %c0_230 = arith.constant 0 : index
    %c145_231 = arith.constant 145 : index
    %300 = vector.load %arg11[%c0_230, %c145_231] : memref<8x640xbf16, #tpu.memory_space<vmem>>, vector<4x384xbf16>
    %c6_232 = arith.constant 6 : index
    %c0_233 = arith.constant 0 : index
    %c0_234 = arith.constant 0 : index
    %301 = vector.load %arg7[%c6_232, %c0_233, %c0_234] : memref<9x4x4xbf16, #tpu.memory_space<vmem>>, vector<1x4x4xbf16>
    %302 = vector.shape_cast %301 : vector<1x4x4xbf16> to vector<4x4xbf16>
    %cst_235 = arith.constant dense<0.000000e+00> : vector<4x384xf32>
    %303 = tpu.matmul %302, %300, %cst_235 {dimension_numbers = #tpu.dot_dimension_numbers<[1], [0], [0], [1], [0, 0, 1, 1], [], []>} : vector<4x4xbf16>, vector<4x384xbf16>, vector<4x384xf32> -> vector<4x384xf32>
    %304 = arith.addf %299, %303 : vector<4x384xf32>
    %c0_236 = arith.constant 0 : index
    %c146_237 = arith.constant 146 : index
    %305 = vector.load %arg11[%c0_236, %c146_237] : memref<8x640xbf16, #tpu.memory_space<vmem>>, vector<4x384xbf16>
    %c7_238 = arith.constant 7 : index
    %c0_239 = arith.constant 0 : index
    %c0_240 = arith.constant 0 : index
    %306 = vector.load %arg7[%c7_238, %c0_239, %c0_240] : memref<9x4x4xbf16, #tpu.memory_space<vmem>>, vector<1x4x4xbf16>
    %307 = vector.shape_cast %306 : vector<1x4x4xbf16> to vector<4x4xbf16>
    %cst_241 = arith.constant dense<0.000000e+00> : vector<4x384xf32>
    %308 = tpu.matmul %307, %305, %cst_241 {dimension_numbers = #tpu.dot_dimension_numbers<[1], [0], [0], [1], [0, 0, 1, 1], [], []>} : vector<4x4xbf16>, vector<4x384xbf16>, vector<4x384xf32> -> vector<4x384xf32>
    %309 = arith.addf %304, %308 : vector<4x384xf32>
    %c0_242 = arith.constant 0 : index
    %c147_243 = arith.constant 147 : index
    %310 = vector.load %arg11[%c0_242, %c147_243] : memref<8x640xbf16, #tpu.memory_space<vmem>>, vector<4x384xbf16>
    %c8_244 = arith.constant 8 : index
    %c0_245 = arith.constant 0 : index
    %c0_246 = arith.constant 0 : index
    %311 = vector.load %arg7[%c8_244, %c0_245, %c0_246] : memref<9x4x4xbf16, #tpu.memory_space<vmem>>, vector<1x4x4xbf16>
    %312 = vector.shape_cast %311 : vector<1x4x4xbf16> to vector<4x4xbf16>
    %cst_247 = arith.constant dense<0.000000e+00> : vector<4x384xf32>
    %313 = tpu.matmul %312, %310, %cst_247 {dimension_numbers = #tpu.dot_dimension_numbers<[1], [0], [0], [1], [0, 0, 1, 1], [], []>} : vector<4x4xbf16>, vector<4x384xbf16>, vector<4x384xf32> -> vector<4x384xf32>
    %314 = arith.addf %309, %313 : vector<4x384xf32>
    %315 = vector.extract_strided_slice %7 {offsets = [0, 6], sizes = [4, 1], strides = [1, 1]} : vector<8x8xf32> to vector<4x1xf32>
    %316 = vector.extract_strided_slice %7 {offsets = [0, 7], sizes = [4, 1], strides = [1, 1]} : vector<8x8xf32> to vector<4x1xf32>
    %317 = vector.broadcast %0 : vector<1x384xf32> to vector<4x384xf32>
    %318 = arith.mulf %314, %317 : vector<4x384xf32>
    %319 = vector.shape_cast %318 : vector<4x384xf32> to vector<1x4x384xf32>
    %cst_248 = arith.constant dense<0.000000e+00> : vector<1xf32>
    %320 = vector.multi_reduction <add>, %319, %cst_248 [1, 2] : vector<1x4x384xf32> to vector<1xf32>
    %321 = vector.shape_cast %320 : vector<1xf32> to vector<1x1x1xf32>
    %322 = vector.extract %321[0, 0, 0] : f32 from vector<1x1x1xf32>
    %323 = arith.mulf %318, %318 : vector<4x384xf32>
    %324 = vector.shape_cast %323 : vector<4x384xf32> to vector<1x4x384xf32>
    %cst_249 = arith.constant dense<0.000000e+00> : vector<1xf32>
    %325 = vector.multi_reduction <add>, %324, %cst_249 [1, 2] : vector<1x4x384xf32> to vector<1xf32>
    %326 = vector.shape_cast %325 : vector<1xf32> to vector<1x1x1xf32>
    %327 = vector.extract %326[0, 0, 0] : f32 from vector<1x1x1xf32>
    %cst_250 = arith.constant 9.765625E-4 : f32
    %328 = arith.mulf %322, %cst_250 : f32
    %cst_251 = arith.constant 9.765625E-4 : f32
    %329 = arith.mulf %327, %cst_251 : f32
    %330 = arith.mulf %328, %328 : f32
    %331 = arith.subf %329, %330 : f32
    %cst_252 = arith.constant 0.000000e+00 : f32
    %332 = arith.maximumf %331, %cst_252 : f32
    %333 = vector.broadcast %328 : f32 to vector<4x384xf32>
    %334 = arith.subf %318, %333 : vector<4x384xf32>
    %cst_253 = arith.constant 9.99999974E-6 : f32
    %335 = arith.addf %332, %cst_253 : f32
    %336 = math.rsqrt %335 : f32
    %337 = vector.broadcast %336 : f32 to vector<4x384xf32>
    %338 = arith.mulf %334, %337 : vector<4x384xf32>
    %339 = vector.broadcast %315 : vector<4x1xf32> to vector<4x384xf32>
    %340 = arith.mulf %338, %339 : vector<4x384xf32>
    %341 = vector.broadcast %316 : vector<4x1xf32> to vector<4x384xf32>
    %342 = arith.addf %340, %341 : vector<4x384xf32>
    %343 = vector.broadcast %0 : vector<1x384xf32> to vector<4x384xf32>
    %344 = arith.mulf %342, %343 : vector<4x384xf32>
    %c0_254 = arith.constant 0 : index
    %c0_255 = arith.constant 0 : index
    %c0_256 = arith.constant 0 : index
    %345 = vector.load %arg2[%c0_254, %c0_255, %c0_256] : memref<1x1x32xf32, #tpu.memory_space<vmem>>, vector<1x1x32xf32>
    %346 = vector.shape_cast %345 : vector<1x1x32xf32> to vector<1x32xf32>
    %347 = arith.negf %346 : vector<1x32xf32>
    %348 = math.exp %347 : vector<1x32xf32>
    %cst_257 = arith.constant 1.000000e+00 : f32
    %349 = vector.broadcast %cst_257 : f32 to vector<1x32xf32>
    %350 = arith.addf %349, %348 : vector<1x32xf32>
    %351 = arith.divf %349, %350 : vector<1x32xf32>
    %352 = arith.mulf %346, %351 : vector<1x32xf32>
    %c0_258 = arith.constant 0 : index
    %c0_259 = arith.constant 0 : index
    %353 = vector.load %arg9[%c0_258, %c0_259] : memref<4x33xf32, #tpu.memory_space<vmem>>, vector<4x32xf32>
    %c0_260 = arith.constant 0 : index
    %c32 = arith.constant 32 : index
    %354 = vector.load %arg9[%c0_260, %c32] : memref<4x33xf32, #tpu.memory_space<vmem>>, vector<4x1xf32>
    %355 = vector.broadcast %352 : vector<1x32xf32> to vector<4x32xf32>
    %356 = arith.mulf %353, %355 : vector<4x32xf32>
    %cst_261 = arith.constant dense<0.000000e+00> : vector<4xf32>
    %357 = vector.multi_reduction <add>, %356, %cst_261 [1] : vector<4x32xf32> to vector<4xf32>
    %358 = vector.shape_cast %357 : vector<4xf32> to vector<4x1xf32>
    %359 = arith.addf %358, %354 : vector<4x1xf32>
    %360 = vector.broadcast %359 : vector<4x1xf32> to vector<4x384xf32>
    %361 = arith.addf %344, %360 : vector<4x384xf32>
    %c0_262 = arith.constant 0 : index
    %c0_263 = arith.constant 0 : index
    %c0_264 = arith.constant 0 : index
    %362 = vector.load %arg10[%c0_262, %c0_263, %c0_264] : memref<1x4x384xf32, #tpu.memory_space<vmem>>, vector<1x4x384xf32>
    %363 = vector.shape_cast %362 : vector<1x4x384xf32> to vector<4x384xf32>
    %364 = vector.shape_cast %361 : vector<4x384xf32> to vector<1x4x384xf32>
    tpu.vector_store %arg10[%c0_262, %c0_263, %c0_264], %364 {strides = array<i32>} : memref<1x4x384xf32, #tpu.memory_space<vmem>>, vector<1x4x384xf32>,
    return
  }
  func.func @transform_0(%arg0: i32) -> (i32, i32, i32) {
    %c0_i32 = arith.constant 0 : i32
    %c0_i32_0 = arith.constant 0 : i32
    %c0_i32_1 = arith.constant 0 : i32
    return %arg0, %c0_i32, %c0_i32_0 : i32, i32, i32
  }
  func.func @transform_1(%arg0: i32) -> (i32, i32, i32) {
    %c0_i32 = arith.constant 0 : i32
    %c0_i32_0 = arith.constant 0 : i32
    %c0_i32_1 = arith.constant 0 : i32
    return %arg0, %c0_i32, %c0_i32_0 : i32, i32, i32
  }
  func.func @transform_2(%arg0: i32) -> (i32, i32) {
    %c0_i32 = arith.constant 0 : i32
    %c0_i32_0 = arith.constant 0 : i32
    %c0_i32_1 = arith.constant 0 : i32
    return %c0_i32, %c0_i32_0 : i32, i32
  }
  func.func @transform_3(%arg0: i32) -> (i32, i32, i32) {
    %c0_i32 = arith.constant 0 : i32
    %c0_i32_0 = arith.constant 0 : i32
    %c0_i32_1 = arith.constant 0 : i32
    %c0_i32_2 = arith.constant 0 : i32
    return %c0_i32, %c0_i32_0, %c0_i32_1 : i32, i32, i32
  }
  func.func @transform_4(%arg0: i32) -> (i32, i32, i32) {
    %c0_i32 = arith.constant 0 : i32
    %c0_i32_0 = arith.constant 0 : i32
    %c0_i32_1 = arith.constant 0 : i32
    %c0_i32_2 = arith.constant 0 : i32
    return %c0_i32, %c0_i32_0, %c0_i32_1 : i32, i32, i32
  }
  func.func @transform_5(%arg0: i32) -> (i32, i32, i32) {
    %c0_i32 = arith.constant 0 : i32
    %c0_i32_0 = arith.constant 0 : i32
    %c0_i32_1 = arith.constant 0 : i32
    %c0_i32_2 = arith.constant 0 : i32
    return %c0_i32, %c0_i32_0, %c0_i32_1 : i32, i32, i32
  }
  func.func @transform_6(%arg0: i32) -> (i32, i32, i32) {
    %c0_i32 = arith.constant 0 : i32
    %c0_i32_0 = arith.constant 0 : i32
    %c0_i32_1 = arith.constant 0 : i32
    %c0_i32_2 = arith.constant 0 : i32
    return %c0_i32, %c0_i32_0, %c0_i32_1 : i32, i32, i32
  }
  func.func @transform_7(%arg0: i32) -> (i32, i32) {
    %c0_i32 = arith.constant 0 : i32
    %c0_i32_0 = arith.constant 0 : i32
    %c0_i32_1 = arith.constant 0 : i32
    return %c0_i32, %c0_i32_0 : i32, i32
  }
  func.func @transform_8(%arg0: i32) -> (i32, i32) {
    %c0_i32 = arith.constant 0 : i32
    %c0_i32_0 = arith.constant 0 : i32
    %c0_i32_1 = arith.constant 0 : i32
    return %c0_i32, %c0_i32_0 : i32, i32
  }
  func.func @transform_9(%arg0: i32) -> (i32, i32, i32) {
    %c0_i32 = arith.constant 0 : i32
    %c0_i32_0 = arith.constant 0 : i32
    %c0_i32_1 = arith.constant 0 : i32
    return %arg0, %c0_i32, %c0_i32_0 : i32, i32, i32
  }
}

</mosaic_0001>

<bundles_post_ra>
// kernel: tpu_custom_call.1
= control target key start
LH: loop header
LB: loop body
LE: loop exit
PB: predicated region body
PF: predicated region fallthrough
CT: control target
= control target key end

     0   :  { %s6841_s0 = inlined_call_operand.vmem [shape: f32[2,8,384], index: 0, kind: input, shape index: {}]   ;;  %s6842_s1 = inlined_call_operand.vmem [shape: f32[2,1,32], index: 1, kind: input, shape index: {}]   ;;  %s6843_s2 = inlined_call_operand.vmem [shape: f32[1,384], index: 2, kind: input, shape index: {}]   ;;  %s6844_s3 = inlined_call_operand.vmem [shape: bf16[9,8,8], index: 3, kind: input, shape index: {}]   ;;  %s6845_s4 = inlined_call_operand.vmem [shape: bf16[9,8,8], index: 4, kind: input, shape index: {}]   ;;  %s6846_s5 = inlined_call_operand.vmem [shape: bf16[9,4,8], index: 5, kind: input, shape index: {}]   ;;  %s6847_s6 = inlined_call_operand.vmem [shape: bf16[9,4,4], index: 6, kind: input, shape index: {}]   ;;  %s6848_s7 = inlined_call_operand.vmem [shape: f32[8,8], index: 7, kind: input, shape index: {}]   ;;  %s6849_s8 = inlined_call_operand.vmem [shape: f32[4,33], index: 8, kind: input, shape index: {}]   ;;  %s6850_s9 = inlined_call_operand.hbm [shape: f32[2,4,384], index: 9, kind: output, shape index: {}]  }
   0x1   :  { %6873 = sst [smem:[#allocation10_spill]] %s6841_s0 }
   0x2   :  { %6874 = sst [smem:[#allocation11_spill]] %s6843_s2 }
   0x3   :  { %6875 = sst [smem:[#allocation12_spill]] %s6844_s3 }
   0x4   :  { %6876 = sst [smem:[#allocation13_spill]] %s6845_s4 }
   0x5   :  { %14 = vsyncpa [#allocation4], 0 }
   0x6   :  { %16 = vsyncpa [#allocation4 + $0x1], 0  ;;  %s5912_s30 = smov 0   ;;  %s5914_s10 = smov 0  }
   0x7   :  { %s5916_s11 = smov 0   ;;  %s5918_s12 = smov 0  }
   0x8 LB: > { %6877 = sst [smem:[#allocation6_spill]] %s5835_s11  ;;  %s5933_s13 = sadd.s32 4294967295, %s5839_s12   ;;  %s5839_s12 = sphi %s5918_s12, %s6897_s12   ;;  %s5835_s11 = sphi %s5916_s11, %s6899_s11   ;;  %s5831_s10 = sphi %s5914_s10, %s6901_s10   ;;  %s5827_s30 = sphi %s5912_s30, %s6900_s30  }
   0x9   : > { %s4856_s14 = sadd.s32 4294967294, %s5839_s12   ;;  %s5937_s15 = sadd.s32 1, %s5839_s12  }
   0xa   : > { %6878 = sst [smem:[#allocation7_spill]] %s5937_s15  ;;  %s228_s16 = sadd.s32 1, %s5835_s11 }
   0xb   : > { %s225_s17 = ssub.s32 %s5839_s12, %s5937_s15  ;;  %p238_p0 = scmp.ne.s32.totalorder %s5835_s11, %s5831_s10 }
   0xc   : > { %p226_p1 = scmp.eq.s32.totalorder %s225_s17, 0  ;;  %p239_p2 = scmp.eq.s32.totalorder %s5933_s13, 1 }
   0xd   : > { %p244_p3 = scmp.ne.s32.totalorder %s5831_s10, %s5827_s30  ;;  %p245_p4 = scmp.eq.s32.totalorder %s4856_s14, 1 }
   0xe   : > { %s5948_s18 = scalar_select %p226_p1, %s5835_s11, %s228_s16  }
   0xf   : > { %p5950_p5 = por %p239_p2, %p238_p0  ;;  %p5954_p6 = por %p245_p4, %p244_p3 }
  0x10   : > { %6879 = sst [smem:[#allocation8_spill]] %s5948_s18  ;;  %p4859_p7 = scmp.ge.s32.totalorder %s5839_s12, 1 }
  0x11   : > { %s6881_s20 = scalar_select %p5954_p6, 1, 0 }
  0x12   : > { %p298_p8 = scmp.lt.s32.totalorder %s5839_s12, 3 }
  0x13   : > { %6882 = sst [smem:[#allocation9_spill]] %s6881_s20 }
  0x14   : > { %p299_p9 = pnand %p4859_p7, %p298_p8 }
  0x15   : > { %p337_p10 = scmp.lt.s32.totalorder (!%p299_p9), %s5933_s13, 1  ;;  %v5841_v0 = vmov (!%p299_p9), 0   ;;  %s6883_s0 = sld [smem:[#allocation10_spill]] (!%p299_p9)  ;;  %v5842_v6 = vmov (!%p299_p9), 0.0   ;;  %vm5843_vm0 = vmmov (!%p299_p9), 0   ;;  %vm391_vm1 = vcmask (!%p299_p9), 146432  }
  0x16   : > { %302 = sbr.rel (%p299_p9) target bundleno = 3073 (0xc01), region = 56  ;;  %347 = vst [vmem:[#allocation2] sm:$0xf] (!%p299_p9), %v5841_v0  ;;  %348 = vst [vmem:[#allocation2 + $0x10] sm:$0xf] (!%p299_p9), %v5841_v0  ;;  %441 = vmatprep.mubr.bf16.mxu0 (!%p299_p9), %v5841_v0  ;;  %5695 = vset.pattern.permute.xlu0 (!%p299_p9), %v5841_v0  ;;  %s6865_s26 = smov (!%p299_p9), 18  }
  0x17   : > { %5137 = vmatprep.subr.bf16.mxu1 (!%p299_p9), %v5842_v6  ;;  %5139 = vmatprep.mubr.msk.bf16.mxu1 (!%p299_p9), %vm5843_vm0, %v5842_v6  ;;  %s6863_s27 = smov (!%p299_p9), 19   ;;  %s6861_s28 = smov (!%p299_p9), 17   ;;  %vm399_vm2 = vcmask (!%p299_p9), 1043456   ;;  %vm498_vm3 = vcmask (!%p299_p9), 154624   ;;  %vm395_vm4 = vcmask (!%p299_p9), 64512   ;;  %vm605_vm5 = vcmask (!%p299_p9), 138240  }
  0x18   : > { %s6859_s29 = smov (!%p299_p9), 1   ;;  %s6857_s14 = smov (!%p299_p9), 127   ;;  %vm715_vm6 = vcmask (!%p299_p9), 7168   ;;  %vm945_vm7 = vcmask (!%p299_p9), 1039360   ;;  %vm1055_vm8 = vcmask (!%p299_p9), 908288   ;;  %vm1165_vm9 = vcmask (!%p299_p9), 900096  }
  0x19   : > { %s6855_s16 = smov (!%p299_p9), 111   ;;  %s6853_s17 = smov (!%p299_p9), 110   ;;  %vm1275_vm10 = vcmask (!%p299_p9), 891904   ;;  %vm3701_vm11 = vcmask (!%p299_p9), 1041408   ;;  %vm3697_vm12 = vcmask (!%p299_p9), 31744   ;;  %vm4754_vm13 = vcmask (!%p299_p9), 257024  }
  0x1a   : > { %s6884_s3 = sld [smem:[#allocation12_spill]] (!%p299_p9)  ;;  %s6885_s2 = sld [smem:[#allocation11_spill]] (!%p299_p9) }
  0x1b   : > { %s6894_s4 = sld [smem:[#allocation13_spill]] (!%p299_p9)  ;;  %s6895_s18 = smov (!%p299_p9), 0.0  }
  0x1d   : > { %s5966_s21 = scalar_select %p337_p10, %s5933_s13, 1 }
  0x1f   : > { %s5610_s22 = smul.u32 24, %s5966_s21 }
  0x20   : > { %v4863_v27 = vld [vmem:[%s6884_s3 + $0x4] sm:$0xf]  ;;  %v370_v40 = vld [vmem:[%s6884_s3] sm:$0xf]  ;;  %v4874_v54 = vld [vmem:[%s6884_s3 + $0x8] sm:$0xf] }
  0x21   : > { %s5972_s25 = scalar_lea.vmem %s6883_s0, %s5610_s22  ;;  %s6851_s22 = smov 109   ;;  %v4878_v59 = vld [vmem:[%s6884_s3 + $0xc] sm:$0xf] }
  0x22   : > { %v349_v1 = vld [vmem:[%s5972_s25] sm:$0xff]  ;;  %v350_v2 = vld [vmem:[%s5972_s25 + $0x8] sm:$0xff]  ;;  %v351_v3 = vld [vmem:[%s5972_s25 + $0x10] sm:$0xff] }
  0x23   : > { %v5057_v4 = vpack.c.bf16 %v350_v2, %v349_v1  ;;  %v5058_v5 = vpack.c.bf16 %v351_v3, %v351_v3  ;;  %v5996_v13 = vpack.c.bf16 %v349_v1, %v349_v1  ;;  %v5998_v14 = vpack.c.bf16 %v350_v2, %v350_v2 }
  0x25   : > { %366 = vst [vmem:[#allocation2 + $0x4] sm:$0xff] %v5057_v4  ;;  %367 = vst [vmem:[#allocation2 + $0xc] sm:$0xf] %v5058_v5  ;;  %v831_v62 = vsel %vm399_vm2, %v5996_v13, 0 }
  0x2c   : > { %v369_v7 = vld [vmem:[#allocation2 + $0x8] sm:$0xff]  ;;  %v368_v8 = vld [vmem:[#allocation2] sm:$0xff] }
  0x2d   : > { %v4866_v9 = vcombine.low %v369_v7, %v369_v7  ;;  %v4864_v10 = vcombine.low %v368_v8, %v368_v8  ;;  %v4867_v11 = vcombine.high %v369_v7, %v369_v7  ;;  %v4865_v12 = vcombine.high %v368_v8, %v368_v8  ;;  %v924_v15 = vld [vmem:[#allocation2 + $0xc] sm:$0xff] }
  0x2e   : > { %v4892_v16 = vcombine.low %v924_v15, %v924_v15  ;;  %v4893_v17 = vcombine.high %v924_v15, %v924_v15  ;;  %v5711_v58 = vld [vmem:[#allocation2 + $0xc] ss:$0 sps:$4 sm:$0xff]   ;;  %v4882_v7 = vld [vmem:[%s6884_s3 + $0x10] sm:$0xf] }
  0x2f   : > { %387 = vrot.lane.b32.xlu1 %v4866_v9, %s6865_s26  ;;  %383 = vrot.lane.b32.xlu0 %v4864_v10, %s6865_s26  ;;  %v837_v63 = vsel %vm399_vm2, %v5711_v58, 0 }
  0x33   : > { %389 = vrot.lane.b32.xlu1 %v4867_v11, %s6865_s26  ;;  %385 = vrot.lane.b32.xlu0 %v4865_v12, %s6865_s26 }
  0x37   : > { %490 = vrot.lane.b32.xlu0 %v4864_v10, %s6863_s27  ;;  %492 = vrot.lane.b32.xlu1 %v4865_v12, %s6863_s27 }
  0x3b   : > { %494 = vrot.lane.b32.xlu0 %v4866_v9, %s6863_s27  ;;  %496 = vrot.lane.b32.xlu1 %v4867_v11, %s6863_s27 }
  0x3f   : > { %597 = vrot.lane.b32.xlu0 %v4864_v10, %s6861_s28  ;;  %599 = vrot.lane.b32.xlu1 %v4865_v12, %s6861_s28 }
  0x43   : > { %601 = vrot.lane.b32.xlu0 %v4866_v9, %s6861_s28  ;;  %603 = vrot.lane.b32.xlu1 %v4867_v11, %s6861_s28 }
  0x47   : > { %707 = vrot.lane.b32.xlu0 %v4864_v10, %s6859_s29  ;;  %709 = vrot.lane.b32.xlu1 %v4865_v12, %s6859_s29 }
  0x4b   : > { %711 = vrot.lane.b32.xlu0 %v4866_v9, %s6859_s29  ;;  %713 = vrot.lane.b32.xlu1 %v4867_v11, %s6859_s29  ;;  %s6867_s29 = smov 0.0  }
  0x4f   : > { %937 = vrot.lane.b32.xlu0 %v5996_v13, %s6857_s14  ;;  %939 = vrot.lane.b32.xlu1 %v5998_v14, %s6857_s14 }
  0x53   : > { %941 = vrot.lane.b32.xlu0 %v4892_v16, %s6857_s14  ;;  %943 = vrot.lane.b32.xlu1 %v4893_v17, %s6857_s14 }
  0x57   : > { %1047 = vrot.lane.b32.xlu0 %v5996_v13, %s6855_s16  ;;  %1049 = vrot.lane.b32.xlu1 %v5998_v14, %s6855_s16 }
  0x5b   : > { %1051 = vrot.lane.b32.xlu0 %v4892_v16, %s6855_s16  ;;  %1053 = vrot.lane.b32.xlu1 %v4893_v17, %s6855_s16 }
  0x5f   : > { %1157 = vrot.lane.b32.xlu0 %v5996_v13, %s6853_s17  ;;  %1159 = vrot.lane.b32.xlu1 %v5998_v14, %s6853_s17 }
  0x63   : > { %1161 = vrot.lane.b32.xlu0 %v4892_v16, %s6853_s17  ;;  %1163 = vrot.lane.b32.xlu1 %v4893_v17, %s6853_s17 }
  0x67   : > { %1267 = vrot.lane.b32.xlu0 %v5996_v13, %s6851_s22  ;;  %1269 = vrot.lane.b32.xlu1 %v5998_v14, %s6851_s22 }
  0x6b   : > { %1271 = vrot.lane.b32.xlu0 %v4892_v16, %s6851_s22  ;;  %1273 = vrot.lane.b32.xlu1 %v4893_v17, %s6851_s22  ;;  %v4889_v17 = vld [vmem:[%s6884_s3 + $0x14] sm:$0xf] }
  0xa1   : > { %v388_v18 = vpop.permute.xlu1 %387  ;;  %v384_v19 = vpop.permute.xlu0 %383 }
  0xa5   : > { %v390_v20 = vpop.permute.xlu1 %389  ;;  %v386_v21 = vpop.permute.xlu0 %385 }
  0xa6   : > { %v393_v22 = vsel %vm391_vm1, %v386_v21, %v388_v18  ;;  %v392_v23 = vsel %vm391_vm1, %v384_v19, %v386_v21  ;;  %v394_v24 = vsel %vm391_vm1, %v388_v18, %v390_v20 }
  0xa7   : > { %4868 = vmatprep.subr.msk.bf16.mxu0 %vm399_vm2, %v393_v22  ;;  %v401_v25 = vsel %vm399_vm2, %v392_v23, 0  ;;  %v407_v26 = vsel %vm399_vm2, %v394_v24, 0 }
  0xa8   : > { %410 = vmatpush1.bf16.msra.mxu0 %v401_v25  ;;  %5138 = vmatpush3.bf16.msra.mxu1 %v407_v26 }
  0xa9   : > { %v491_v28 = vpop.permute.xlu0 %490  ;;  %v493_v29 = vpop.permute.xlu1 %492  ;;  %5143 = vmatprep.subr.bf16.mxu1 %v5842_v6 }
  0xaa   : > { %v499_v30 = vsel %vm498_vm3, %v491_v28, %v493_v29 }
  0xab   : > { %4869 = vmatmul.mubr.msk.bf16.vlgmr.msra.gmra.mrb[0].mxu0 %vm395_vm4, %v4863_v27  ;;  %5140 = vmatmul.mubr.msk.bf16.vlgmr.msra.gmra.mrb[0].mxu1 %vm395_vm4, %v4863_v27  ;;  %v506_v32 = vsel %vm399_vm2, %v499_v30, 0  ;;  %v4897_v27 = vld [vmem:[%s6884_s3 + $0x18] sm:$0xf] }
  0xac   : > { %546 = vmatprep.mubr.bf16.mxu0 %v5841_v0  ;;  %5145 = vmatprep.mubr.msk.bf16.mxu1 %vm5843_vm0, %v5842_v6 }
  0xad   : > { %v495_v31 = vpop.permute.xlu0 %494  ;;  %v497_v33 = vpop.permute.xlu1 %496 }
  0xae   : > { %v500_v34 = vsel %vm498_vm3, %v493_v29, %v495_v31  ;;  %v501_v35 = vsel %vm498_vm3, %v495_v31, %v497_v33 }
  0xaf   : > { %4871 = vmatprep.subr.msk.bf16.mxu0 %vm399_vm2, %v500_v34  ;;  %v512_v36 = vsel %vm399_vm2, %v501_v35, 0 }
  0xb0   : > { %515 = vmatpush1.bf16.msra.mxu0 %v506_v32  ;;  %5144 = vmatpush3.bf16.msra.mxu1 %v512_v36  ;;  %v4901_v36 = vld [vmem:[%s6884_s3 + $0x1c] sm:$0xf] }
  0xb1   : > { %v598_v37 = vpop.permute.xlu0 %597  ;;  %v600_v38 = vpop.permute.xlu1 %599  ;;  %5149 = vmatprep.subr.bf16.mxu1 %v5842_v6 }
  0xb2   : > { %v606_v39 = vsel %vm605_vm5, %v598_v37, %v600_v38 }
  0xb3   : > { %v613_v44 = vsel %vm399_vm2, %v606_v39, 0  ;;  %v4905_v39 = vld [vmem:[%s6884_s3 + $0x20] sm:$0xf] }
  0xb5   : > { %v602_v41 = vpop.permute.xlu0 %601  ;;  %v604_v42 = vpop.permute.xlu1 %603 }
  0xb6   : > { %v607_v43 = vsel %vm605_vm5, %v600_v38, %v602_v41  ;;  %v608_v45 = vsel %vm605_vm5, %v602_v41, %v604_v42 }
  0xb7   : > { %4872 = vmatmul.mubr.msk.bf16.vlgmr.msra.gmra.mrb[0].mxu0 %vm395_vm4, %v370_v40  ;;  %5146 = vmatmul.mubr.msk.bf16.vlgmr.msra.gmra.mrb[0].mxu1 %vm395_vm4, %v370_v40  ;;  %v619_v46 = vsel %vm399_vm2, %v608_v45, 0  ;;  %v1376_v40 = vlaneseq }
  0xb8   : > { %4875 = vmatprep.subr.msk.bf16.mxu0 %vm399_vm2, %v607_v43  ;;  %5150 = vmatpush3.bf16.msra.mxu1 %v619_v46  ;;  %v346_v43 = vld [vmem:[%s6885_s2] sm:$0x7] }
  0xb9   : > { %622 = vmatpush1.bf16.msra.mxu0 %v613_v44  ;;  %v708_v47 = vpop.permute.xlu0 %707  ;;  %653 = vmatprep.mubr.bf16.mxu0 %v5841_v0  ;;  %v710_v48 = vpop.permute.xlu1 %709  ;;  %v6158_v41 = vshrl.u32 %v1376_v40, 7 }
  0xba   : > { %5151 = vmatprep.mubr.msk.bf16.mxu1 %vm5843_vm0, %v5842_v6  ;;  %5155 = vmatprep.subr.bf16.mxu1 %v5842_v6  ;;  %v716_v51 = vsel %vm715_vm6, %v708_v47, %v710_v48 }
  0xbb   : > { %v723_v55 = vsel %vm399_vm2, %v716_v51, 0  ;;  %v1378_v42 = vsub.s32 0, %v6158_v41  ;;  %v1386_v44 = vsub.s32 2, %v6158_v41  ;;  %v1382_v45 = vsub.s32 1, %v6158_v41 }
  0xbd   : > { %v712_v49 = vpop.permute.xlu0 %711  ;;  %v714_v50 = vpop.permute.xlu1 %713  ;;  %v6168_v46 = vrot.slane %v346_v43, %v1378_v42  ;;  %v6170_v47 = vrot.slane %v346_v43, %v1386_v44 }
  0xbe   : > { %v717_v52 = vsel %vm715_vm6, %v710_v48, %v712_v49  ;;  %v718_v53 = vsel %vm715_vm6, %v712_v49, %v714_v50  ;;  %v6172_v48 = vrot.slane %v346_v43, %v1382_v45 }
  0xbf   : > { %4879 = vmatprep.subr.msk.bf16.mxu0 %vm399_vm2, %v717_v52  ;;  %v729_v56 = vsel %vm399_vm2, %v718_v53, 0 }
  0xc1   : > { %v938_v57 = vpop.permute.xlu0 %937  ;;  %v940_v60 = vpop.permute.xlu1 %939 }
  0xc2   : > { %v946_v4 = vsel %vm945_vm7, %v938_v57, %v940_v60 }
  0xc3   : > { %4876 = vmatmul.mubr.msk.bf16.vlgmr.msra.gmra.mrb[0].mxu0 %vm395_vm4, %v4874_v54  ;;  %5152 = vmatmul.mubr.msk.bf16.vlgmr.msra.gmra.mrb[0].mxu1 %vm395_vm4, %v4874_v54  ;;  %v953_v10 = vsel %vm399_vm2, %v946_v4, 0  ;;  %v6180_v4 = vld [vmem:[%s6848_s7] sm:$0xff] }
  0xc4   : > { %732 = vmatpush1.bf16.msra.mxu0 %v723_v55  ;;  %5156 = vmatpush3.bf16.msra.mxu1 %v729_v56 }
  0xc5   : > { %763 = vmatprep.mubr.bf16.mxu0 %v5841_v0  ;;  %5157 = vmatprep.mubr.msk.bf16.mxu1 %vm5843_vm0, %v5842_v6  ;;  %v942_v61 = vpop.permute.xlu0 %941  ;;  %v944_v3 = vpop.permute.xlu1 %943 }
  0xc6   : > { %4886 = vmatprep.subr.msk.bf16.mxu0 %vm399_vm2, %v5998_v14  ;;  %5161 = vmatprep.subr.bf16.mxu1 %v5842_v6  ;;  %v947_v1 = vsel %vm945_vm7, %v940_v60, %v942_v61  ;;  %v948_v5 = vsel %vm945_vm7, %v942_v61, %v944_v3 }
  0xc7   : > { %v959_v11 = vsel %vm399_vm2, %v948_v5, 0  ;;  %v5852_v5 = vmov 1  }
  0xc8   : > { %5696 = vset.pattern.permute.xlu1 %v5852_v5 }
  0xc9   : > { %v1048_v2 = vpop.permute.xlu0 %1047  ;;  %v1050_v8 = vpop.permute.xlu1 %1049 }
  0xca   : > { %v1056_v15 = vsel %vm1055_vm8, %v1048_v2, %v1050_v8 }
  0xcb   : > { %v1063_v20 = vsel %vm399_vm2, %v1056_v15, 0 }
  0xcd   : > { %v1052_v9 = vpop.permute.xlu0 %1051  ;;  %v1054_v14 = vpop.permute.xlu1 %1053 }
  0xce   : > { %v1057_v12 = vsel %vm1055_vm8, %v1050_v8, %v1052_v9  ;;  %v1058_v16 = vsel %vm1055_vm8, %v1052_v9, %v1054_v14 }
  0xcf   : > { %4880 = vmatmul.mubr.msk.bf16.vlgmr.msra.gmra.mrb[0].mxu0 %vm395_vm4, %v4878_v59  ;;  %5158 = vmatmul.mubr.msk.bf16.vlgmr.msra.gmra.mrb[0].mxu1 %vm395_vm4, %v4878_v59  ;;  %v1069_v21 = vsel %vm399_vm2, %v1058_v16, 0 }
  0xd0   : > { %840 = vmatpush1.bf16.msra.mxu0 %v831_v62  ;;  %5162 = vmatpush3.bf16.msra.mxu1 %v837_v63 }
  0xd1   : > { %871 = vmatprep.mubr.bf16.mxu0 %v5841_v0  ;;  %5163 = vmatprep.mubr.msk.bf16.mxu1 %vm5843_vm0, %v5842_v6  ;;  %v1158_v13 = vpop.permute.xlu0 %1157  ;;  %v1160_v18 = vpop.permute.xlu1 %1159 }
  0xd2   : > { %4894 = vmatprep.subr.msk.bf16.mxu0 %vm399_vm2, %v947_v1  ;;  %5167 = vmatprep.subr.bf16.mxu1 %v5842_v6  ;;  %v1166_v25 = vsel %vm1165_vm9, %v1158_v13, %v1160_v18 }
  0xd3   : > { %v1173_v30 = vsel %vm399_vm2, %v1166_v25, 0 }
  0xd5   : > { %v1162_v19 = vpop.permute.xlu0 %1161  ;;  %v1164_v24 = vpop.permute.xlu1 %1163 }
  0xd6   : > { %v1167_v22 = vsel %vm1165_vm9, %v1160_v18, %v1162_v19  ;;  %v1168_v26 = vsel %vm1165_vm9, %v1162_v19, %v1164_v24 }
  0xd7   : > { %v1179_v31 = vsel %vm399_vm2, %v1168_v26, 0 }
  0xd9   : > { %v1268_v23 = vpop.permute.xlu0 %1267  ;;  %v1270_v28 = vpop.permute.xlu1 %1269 }
  0xda   : > { %v1276_v34 = vsel %vm1275_vm10, %v1268_v23, %v1270_v28 }
  0xdb   : > { %4887 = vmatmul.mubr.msk.bf16.vlgmr.msra.gmra.mrb[0].mxu0 %vm395_vm4, %v4882_v7  ;;  %5164 = vmatmul.mubr.msk.bf16.vlgmr.msra.gmra.mrb[0].mxu1 %vm395_vm4, %v4882_v7  ;;  %v1283_v37 = vsel %vm399_vm2, %v1276_v34, 0 }
  0xdc   : > { %962 = vmatpush1.bf16.msra.mxu0 %v953_v10  ;;  %5168 = vmatpush3.bf16.msra.mxu1 %v959_v11 }
  0xdd   : > { %993 = vmatprep.mubr.bf16.mxu0 %v5841_v0  ;;  %5169 = vmatprep.mubr.msk.bf16.mxu1 %vm5843_vm0, %v5842_v6  ;;  %v1272_v29 = vpop.permute.xlu0 %1271  ;;  %v1274_v33 = vpop.permute.xlu1 %1273 }
  0xde   : > { %4898 = vmatprep.subr.msk.bf16.mxu0 %vm399_vm2, %v1057_v12  ;;  %5173 = vmatprep.subr.bf16.mxu1 %v5842_v6  ;;  %v1277_v32 = vsel %vm1275_vm10, %v1270_v28, %v1272_v29  ;;  %v1278_v35 = vsel %vm1275_vm10, %v1272_v29, %v1274_v33 }
  0xdf   : > { %v1289_v38 = vsel %vm399_vm2, %v1278_v35, 0 }
  0xe7   : > { %4895 = vmatmul.mubr.msk.bf16.vlgmr.msra.gmra.mrb[0].mxu0 %vm395_vm4, %v4889_v17  ;;  %5170 = vmatmul.mubr.msk.bf16.vlgmr.msra.gmra.mrb[0].mxu1 %vm395_vm4, %v4889_v17 }
  0xe8   : > { %1072 = vmatpush1.bf16.msra.mxu0 %v1063_v20  ;;  %5174 = vmatpush3.bf16.msra.mxu1 %v1069_v21 }
  0xe9   : > { %1103 = vmatprep.mubr.bf16.mxu0 %v5841_v0  ;;  %5175 = vmatprep.mubr.msk.bf16.mxu1 %vm5843_vm0, %v5842_v6 }
  0xea   : > { %4902 = vmatprep.subr.msk.bf16.mxu0 %vm399_vm2, %v1167_v22  ;;  %5179 = vmatprep.subr.bf16.mxu1 %v5842_v6 }
  0xf3   : > { %4899 = vmatmul.mubr.msk.bf16.vlgmr.msra.gmra.mrb[0].mxu0 %vm395_vm4, %v4897_v27  ;;  %5176 = vmatmul.mubr.msk.bf16.vlgmr.msra.gmra.mrb[0].mxu1 %vm395_vm4, %v4897_v27 }
  0xf4   : > { %1182 = vmatpush1.bf16.msra.mxu0 %v1173_v30  ;;  %5180 = vmatpush3.bf16.msra.mxu1 %v1179_v31 }
  0xf5   : > { %1213 = vmatprep.mubr.bf16.mxu0 %v5841_v0  ;;  %5181 = vmatprep.mubr.msk.bf16.mxu1 %vm5843_vm0, %v5842_v6 }
  0xf6   : > { %4906 = vmatprep.subr.msk.bf16.mxu0 %vm399_vm2, %v1277_v32  ;;  %5185 = vmatprep.subr.bf16.mxu1 %v5842_v6 }
  0xff   : > { %4903 = vmatmul.mubr.msk.bf16.vlgmr.msra.gmra.mrb[0].mxu0 %vm395_vm4, %v4901_v36  ;;  %5182 = vmatmul.mubr.msk.bf16.vlgmr.msra.gmra.mrb[0].mxu1 %vm395_vm4, %v4901_v36 }
 0x100   : > { %1292 = vmatpush1.bf16.msra.mxu0 %v1283_v37  ;;  %5186 = vmatpush3.bf16.msra.mxu1 %v1289_v38 }
 0x101   : > { %1323 = vmatprep.mubr.bf16.mxu0 %v5841_v0  ;;  %5187 = vmatprep.mubr.msk.bf16.mxu1 %vm5843_vm0, %v5842_v6 }
 0x102   : > { %5191 = vmatprep.subr.bf16.mxu1 %v5842_v6 }
 0x10b   : > { %4907 = vmatmul.mubr.msk.bf16.vlgmr.msra.gmra.mrb[0].mxu0 %vm395_vm4, %v4905_v39  ;;  %5188 = vmatmul.mubr.msk.bf16.vlgmr.msra.gmra.mrb[0].mxu1 %vm395_vm4, %v4905_v39 }
 0x10c   : > { %1554 = vmatprep.mubr.bf16.mxu0 %v5841_v0  ;;  %5193 = vmatprep.mubr.msk.bf16.mxu1 %vm5843_vm0, %v5842_v6 }
 0x1de   : > { %v1325_v49 = vpop.f32.mrb[0].mxu0  ;;  %v1366_v50 = vpop.f32.mrb[0].mxu1 }
 0x1df   : > { %v1391_v51 = vmul.f32 %v6168_v46, %v1325_v49  ;;  %v1327_v52 = vpop.f32.mrb[1].mxu0  ;;  %v5189_v53 = vpop.f32.mrb[1].mxu1  ;;  %v1393_v54 = vmul.f32 %v6170_v47, %v1366_v50 }
 0x1e0   : > { %v1392_v55 = vmul.f32 %v6172_v48, %v1327_v52  ;;  %v1329_v56 = vpop.f32.mrb[2].mxu0  ;;  %v1369_v57 = vpop.f32.mrb[2].mxu1 }
 0x1e1   : > { %v1405_v58 = vmul.f32 %v1391_v51, %v1391_v51  ;;  %v1330_v59 = vpop.f32.mrb[3].mxu0  ;;  %v5190_v60 = vpop.f32.mrb[3].mxu1  ;;  %v1407_v1 = vmul.f32 %v1393_v54, %v1393_v54 }
 0x1e2   : > { %v1406_v61 = vmul.f32 %v1392_v55, %v1392_v55  ;;  %v1394_v62 = vadd.f32 %v1392_v55, %v1391_v51 }
 0x1e4   : > { %v1395_v63 = vadd.f32 %v1394_v62, %v1393_v54  ;;  %v1408_v2 = vadd.f32 %v1406_v61, %v1405_v58 }
 0x1e6   : > { %1396 = vadd.xlane.f32.xlu0 %v1395_v63  ;;  %v1409_v3 = vadd.f32 %v1408_v2, %v1407_v1 }
 0x1e8   : > { %1410 = vadd.xlane.f32.xlu1 %v1409_v3 }
 0x1f9   : > { %1445 = vperm.xlu1 %5696, %v6180_v4  }
 0x1fc   : > { %1438 = vperm.xlu0 %5695, %v6180_v4  }
 0x273   : > { %v1397_v7 = vpop.xlane.xlu0 %1396 }
 0x274   : > { %v1398_v8 = vrot.slane %v1397_v7, 4 }
 0x275   : > { %v1411_v9 = vpop.xlane.xlu1 %1410 }
 0x276   : > { %v1399_v10 = vadd.f32 %v1398_v8, %v1397_v7  ;;  %v1412_v11 = vrot.slane %v1411_v9, 4 }
 0x278   : > { %v1400_v12 = vrot.slane %v1399_v10, 2  ;;  %v1413_v13 = vadd.f32 %v1412_v11, %v1411_v9 }
 0x279   : > { %v1446_v32 = vpop.permute.xlu1 %1445 }
 0x27a   : > { %v1401_v14 = vadd.f32 %v1400_v12, %v1399_v10  ;;  %v1414_v15 = vrot.slane %v1413_v13, 2 }
 0x27b   : > { %v1439_v28 = vpop.permute.xlu0 %1438 }
 0x27c   : > { %v1402_v16 = vrot.slane %v1401_v14, 1  ;;  %v1415_v17 = vadd.f32 %v1414_v15, %v1413_v13 }
 0x27e   : > { %v1403_v18 = vadd.f32 %v1402_v16, %v1401_v14  ;;  %v1416_v19 = vrot.slane %v1415_v17, 1 }
 0x280   : > { %5611 = vpush %v1403_v18  ;;  %v1417_v20 = vadd.f32 %v1416_v19, %v1415_v17 }
 0x282   : > { %5613 = vpush %v1417_v20  ;;  %v4911_v20 = vld [vmem:[%s6894_s4 + $0x4] sm:$0xf] }
 0x2b1   : > { %s5612_s23 = spop %5611 }
 0x2b2   : > { %s1419_s24 = smul.f32 0.00048828125, %s5612_s23  ;;  %s6891_s23 = smov 111  }
 0x2b3   : > { %s5614_s17 = spop %5613 }
 0x2b4   : > { %s1421_s22 = smul.f32 %s1419_s24, %s1419_s24  ;;  %v1424_v23 = vstv %s1419_s24  ;;  %s6892_s24 = smov 110  }
 0x2b5   : > { %s1420_s16 = smul.f32 0.00048828125, %s5614_s17  ;;  %v1425_v24 = vsub.f32 %v1391_v51, %v1424_v23  ;;  %v1426_v25 = vsub.f32 %v1392_v55, %v1424_v23  ;;  %v1427_v26 = vsub.f32 %v1393_v54, %v1424_v23  ;;  %s6893_s17 = smov 109  }
 0x2b7   : > { %s1422_s14 = ssub.f32 %s1420_s16, %s1421_s22  ;;  %s6890_s16 = smov 127  }
 0x2b9   : > { %s1423_s28 = smax.f32 %s6867_s29, %s1422_s14  ;;  %s6889_s14 = smov 1  }
 0x2ba   : > { %s1428_s27 = sadd.f32 1e-05, %s1423_s28  ;;  %s6888_s28 = smov 17  }
 0x2bc   : > { %v1429_v21 = vstv %s1428_s27  ;;  %s6887_s27 = smov 19  }
 0x2bd   : > { %5737 = vrsqrt.f32 %v1429_v21 }
 0x2c7   : > { %v5738_v22 = vpop.eup %5737 }
 0x2c8   : > { %5615 = vpush %v5738_v22 }
 0x2f9   : > { %s5616_s26 = spop %5615 }
 0x2fa   : > { %v1432_v27 = vstv %s5616_s26  ;;  %s6886_s26 = smov 18  }
 0x2fb   : > { %v1433_v29 = vmul.f32 %v1432_v27, %v1425_v24  ;;  %v1434_v30 = vmul.f32 %v1432_v27, %v1426_v25  ;;  %v1435_v31 = vmul.f32 %v1432_v27, %v1427_v26 }
 0x2fd   : > { %v1441_v33 = vmul.f32 %v1439_v28, %v1433_v29  ;;  %v1442_v34 = vmul.f32 %v1439_v28, %v1434_v30  ;;  %v1443_v35 = vmul.f32 %v1439_v28, %v1435_v31  ;;  %v1486_v31 = vld [vmem:[%s6894_s4] sm:$0xf] }
 0x2ff   : > { %v1448_v36 = vadd.f32 %v1446_v32, %v1441_v33  ;;  %v1449_v37 = vadd.f32 %v1446_v32, %v1442_v34  ;;  %v1450_v38 = vadd.f32 %v1446_v32, %v1443_v35 }
 0x301   : > { %v1451_v39 = vmul.f32 %v1448_v36, %v6168_v46  ;;  %v1452_v40 = vmul.f32 %v1449_v37, %v6172_v48  ;;  %v1453_v43 = vmul.f32 %v1450_v38, %v6170_v47 }
 0x303   : > { %v1457_v44 = vmul.f32 0.70710677, %v1451_v39  ;;  %v1458_v45 = vmul.f32 0.70710677, %v1452_v40  ;;  %v1459_v49 = vmul.f32 0.70710677, %v1453_v43 }
 0x304   : > { %v1454_v52 = vmul.f32 0.5, %v1451_v39  ;;  %v1455_v55 = vmul.f32 0.5, %v1452_v40  ;;  %v1456_v57 = vmul.f32 0.5, %v1453_v43 }
 0x305   : > { %5739 = verf.f32 %v1457_v44 }
 0x306   : > { %5741 = verf.f32 %v1458_v45 }
 0x307   : > { %5743 = verf.f32 %v1459_v49  ;;  %v4922_v49 = vld [vmem:[%s6894_s4 + $0x8] sm:$0xf] }
 0x30f   : > { %v5740_v50 = vpop.eup %5739 }
 0x310   : > { %v5742_v51 = vpop.eup %5741  ;;  %v1463_v53 = vadd.f32 1.0, %v5740_v50 }
 0x311   : > { %v5744_v54 = vpop.eup %5743  ;;  %v1464_v56 = vadd.f32 1.0, %v5742_v51 }
 0x312   : > { %v1465_v58 = vadd.f32 1.0, %v5744_v54  ;;  %v1466_v59 = vmul.f32 %v1463_v53, %v1454_v52 }
 0x313   : > { %v1467_v60 = vmul.f32 %v1464_v56, %v1455_v55 }
 0x314   : > { %v1468_v61 = vmul.f32 %v1465_v58, %v1456_v57  ;;  %v6198_v9 = vpack.c.bf16 %v1466_v59, %v1466_v59 }
 0x315   : > { %v5059_v62 = vpack.c.bf16 %v1467_v60, %v1466_v59  ;;  %v6215_v12 = vpack.c.bf16 %v1467_v60, %v1467_v60  ;;  %v4926_v59 = vld [vmem:[%s6894_s4 + $0xc] sm:$0xf] }
 0x316   : > { %v5060_v63 = vpack.c.bf16 %v1468_v61, %v1468_v61 }
 0x317   : > { %1482 = vst [vmem:[#allocation2 + $0x4] sm:$0xff] %v5059_v62  ;;  %v1941_v62 = vsel %vm399_vm2, %v6198_v9, 0 }
 0x318   : > { %1483 = vst [vmem:[#allocation2 + $0xc] sm:$0xf] %v5060_v63 }
 0x31e   : > { %v1484_v1 = vld [vmem:[#allocation2] sm:$0xff] }
 0x31f   : > { %v1485_v2 = vld [vmem:[#allocation2 + $0x8] sm:$0xff]  ;;  %v4912_v3 = vcombine.low %v1484_v1, %v1484_v1  ;;  %v4913_v7 = vcombine.high %v1484_v1, %v1484_v1 }
 0x320   : > { %v4914_v5 = vcombine.low %v1485_v2, %v1485_v2  ;;  %v4915_v8 = vcombine.high %v1485_v2, %v1485_v2  ;;  %v2034_v10 = vld [vmem:[#allocation2 + $0xc] sm:$0xff] }
 0x321   : > { %1499 = vrot.lane.b32.xlu1 %v4912_v3, %s6886_s26  ;;  %v4940_v11 = vcombine.low %v2034_v10, %v2034_v10  ;;  %v4941_v13 = vcombine.high %v2034_v10, %v2034_v10  ;;  %v5718_v63 = vld [vmem:[#allocation2 + $0xc] ss:$0 sps:$4 sm:$0xff]  }
 0x322   : > { %1607 = vrot.lane.b32.xlu0 %v4914_v5, %s6887_s27 }
 0x325   : > { %1501 = vrot.lane.b32.xlu1 %v4913_v7, %s6886_s26 }
 0x326   : > { %1709 = vrot.lane.b32.xlu0 %v4912_v3, %s6888_s28 }
 0x329   : > { %1503 = vrot.lane.b32.xlu1 %v4914_v5, %s6886_s26 }
 0x32a   : > { %1713 = vrot.lane.b32.xlu0 %v4914_v5, %s6888_s28 }
 0x32d   : > { %1505 = vrot.lane.b32.xlu1 %v4915_v8, %s6886_s26 }
 0x32e   : > { %1818 = vrot.lane.b32.xlu0 %v4912_v3, %s6889_s14 }
 0x331   : > { %1603 = vrot.lane.b32.xlu1 %v4912_v3, %s6887_s27  ;;  %v1947_v3 = vsel %vm399_vm2, %v5718_v63, 0 }
 0x332   : > { %1822 = vrot.lane.b32.xlu0 %v4914_v5, %s6889_s14 }
 0x335   : > { %1605 = vrot.lane.b32.xlu1 %v4913_v7, %s6887_s27 }
 0x336   : > { %2047 = vrot.lane.b32.xlu0 %v6198_v9, %s6890_s16 }
 0x339   : > { %1609 = vrot.lane.b32.xlu1 %v4915_v8, %s6887_s27 }
 0x33a   : > { %2051 = vrot.lane.b32.xlu0 %v4940_v11, %s6890_s16 }
 0x33d   : > { %1711 = vrot.lane.b32.xlu1 %v4913_v7, %s6888_s28 }
 0x33e   : > { %2156 = vrot.lane.b32.xlu0 %v6198_v9, %s6891_s23 }
 0x341   : > { %1715 = vrot.lane.b32.xlu1 %v4915_v8, %s6888_s28 }
 0x342   : > { %2160 = vrot.lane.b32.xlu0 %v4940_v11, %s6891_s23 }
 0x345   : > { %1820 = vrot.lane.b32.xlu1 %v4913_v7, %s6889_s14 }
 0x346   : > { %2265 = vrot.lane.b32.xlu0 %v6198_v9, %s6892_s24 }
 0x349   : > { %1824 = vrot.lane.b32.xlu1 %v4915_v8, %s6889_s14  ;;  %v4930_v8 = vld [vmem:[%s6894_s4 + $0x10] sm:$0xf] }
 0x34a   : > { %2269 = vrot.lane.b32.xlu0 %v4940_v11, %s6892_s24 }
 0x34d   : > { %2049 = vrot.lane.b32.xlu1 %v6215_v12, %s6890_s16 }
 0x34e   : > { %2374 = vrot.lane.b32.xlu0 %v6198_v9, %s6893_s17 }
 0x351   : > { %2053 = vrot.lane.b32.xlu1 %v4941_v13, %s6890_s16 }
 0x352   : > { %2378 = vrot.lane.b32.xlu0 %v4940_v11, %s6893_s17 }
 0x355   : > { %2158 = vrot.lane.b32.xlu1 %v6215_v12, %s6891_s23 }
 0x359   : > { %2162 = vrot.lane.b32.xlu1 %v4941_v13, %s6891_s23 }
 0x35d   : > { %2267 = vrot.lane.b32.xlu1 %v6215_v12, %s6892_s24 }
 0x361   : > { %2271 = vrot.lane.b32.xlu1 %v4941_v13, %s6892_s24 }
 0x365   : > { %2376 = vrot.lane.b32.xlu1 %v6215_v12, %s6893_s17 }
 0x369   : > { %2380 = vrot.lane.b32.xlu1 %v4941_v13, %s6893_s17 }
 0x393   : > { %v1500_v14 = vpop.permute.xlu1 %1499 }
 0x394   : > { %v1608_v21 = vpop.permute.xlu0 %1607 }
 0x397   : > { %v1502_v15 = vpop.permute.xlu1 %1501 }
 0x398   : > { %v1507_v16 = vsel %vm391_vm1, %v1500_v14, %v1502_v15  ;;  %v1710_v26 = vpop.permute.xlu0 %1709 }
 0x399   : > { %v1514_v19 = vsel %vm399_vm2, %v1507_v16, 0 }
 0x39b   : > { %v1504_v17 = vpop.permute.xlu1 %1503 }
 0x39c   : > { %v1508_v18 = vsel %vm391_vm1, %v1502_v15, %v1504_v17  ;;  %v1714_v32 = vpop.permute.xlu0 %1713 }
 0x39d   : > { %4916 = vmatprep.subr.msk.bf16.mxu0 %vm399_vm2, %v1508_v18  ;;  %v4937_v18 = vld [vmem:[%s6894_s4 + $0x14] sm:$0xf] }
 0x39e   : > { %1523 = vmatpush1.bf16.msra.mxu0 %v1514_v19 }
 0x39f   : > { %v1506_v22 = vpop.permute.xlu1 %1505 }
 0x3a0   : > { %v1509_v23 = vsel %vm391_vm1, %v1504_v17, %v1506_v22  ;;  %v1819_v39 = vpop.permute.xlu0 %1818 }
 0x3a1   : > { %v1520_v24 = vsel %vm399_vm2, %v1509_v23, 0  ;;  %4917 = vmatmul.mubr.msk.bf16.vlgmr.msra.gmra.mrb[4].mxu0 %vm395_vm4, %v4911_v20 }
 0x3a2   : > { %5192 = vmatpush3.bf16.msra.mxu1 %v1520_v24  ;;  %1658 = vmatprep.mubr.bf16.mxu0 %v5841_v0 }
 0x3a3   : > { %v1604_v25 = vpop.permute.xlu1 %1603  ;;  %5197 = vmatprep.subr.bf16.mxu1 %v5842_v6 }
 0x3a4   : > { %v1823_v50 = vpop.permute.xlu0 %1822 }
 0x3a5   : > { %5194 = vmatmul.mubr.msk.bf16.vlgmr.msra.gmra.mrb[4].mxu1 %vm395_vm4, %v4911_v20 }
 0x3a6   : > { %5199 = vmatprep.mubr.msk.bf16.mxu1 %vm5843_vm0, %v5842_v6 }
 0x3a7   : > { %v1606_v27 = vpop.permute.xlu1 %1605 }
 0x3a8   : > { %v1611_v28 = vsel %vm498_vm3, %v1604_v25, %v1606_v27  ;;  %v1612_v29 = vsel %vm498_vm3, %v1606_v27, %v1608_v21  ;;  %v2048_v58 = vpop.permute.xlu0 %2047 }
 0x3a9   : > { %4919 = vmatprep.subr.msk.bf16.mxu0 %vm399_vm2, %v1612_v29  ;;  %v1618_v30 = vsel %vm399_vm2, %v1611_v28, 0  ;;  %v4945_v28 = vld [vmem:[%s6894_s4 + $0x18] sm:$0xf] }
 0x3aa   : > { %1627 = vmatpush1.bf16.msra.mxu0 %v1618_v30 }
 0x3ab   : > { %v1610_v33 = vpop.permute.xlu1 %1609 }
 0x3ac   : > { %v1613_v34 = vsel %vm498_vm3, %v1608_v21, %v1610_v33  ;;  %v2052_v61 = vpop.permute.xlu0 %2051 }
 0x3ad   : > { %v1624_v35 = vsel %vm399_vm2, %v1613_v34, 0  ;;  %4920 = vmatmul.mubr.msk.bf16.vlgmr.msra.gmra.mrb[4].mxu0 %vm395_vm4, %v1486_v31 }
 0x3ae   : > { %5198 = vmatpush3.bf16.msra.mxu1 %v1624_v35  ;;  %1764 = vmatprep.mubr.bf16.mxu0 %v5841_v0 }
 0x3af   : > { %v1712_v36 = vpop.permute.xlu1 %1711  ;;  %5203 = vmatprep.subr.bf16.mxu1 %v5842_v6 }
 0x3b0   : > { %v1717_v37 = vsel %vm605_vm5, %v1710_v26, %v1712_v36  ;;  %v1718_v38 = vsel %vm605_vm5, %v1712_v36, %v1714_v32  ;;  %v2157_v5 = vpop.permute.xlu0 %2156  ;;  %v4949_v36 = vld [vmem:[%s6894_s4 + $0x1c] sm:$0xf] }
 0x3b1   : > { %5200 = vmatmul.mubr.msk.bf16.vlgmr.msra.gmra.mrb[4].mxu1 %vm395_vm4, %v1486_v31  ;;  %4923 = vmatprep.subr.msk.bf16.mxu0 %vm399_vm2, %v1718_v38  ;;  %v1724_v40 = vsel %vm399_vm2, %v1717_v37, 0 }
 0x3b2   : > { %1733 = vmatpush1.bf16.msra.mxu0 %v1724_v40  ;;  %5205 = vmatprep.mubr.msk.bf16.mxu1 %vm5843_vm0, %v5842_v6 }
 0x3b3   : > { %v1716_v43 = vpop.permute.xlu1 %1715 }
 0x3b4   : > { %v1719_v44 = vsel %vm605_vm5, %v1714_v32, %v1716_v43  ;;  %v2161_v10 = vpop.permute.xlu0 %2160  ;;  %v4953_v43 = vld [vmem:[%s6894_s4 + $0x20] sm:$0xf] }
 0x3b5   : > { %v1730_v45 = vsel %vm399_vm2, %v1719_v44, 0 }
 0x3b6   : > { %5204 = vmatpush3.bf16.msra.mxu1 %v1730_v45 }
 0x3b7   : > { %v1821_v51 = vpop.permute.xlu1 %1820  ;;  %5209 = vmatprep.subr.bf16.mxu1 %v5842_v6 }
 0x3b8   : > { %v1826_v52 = vsel %vm715_vm6, %v1819_v39, %v1821_v51  ;;  %v1827_v53 = vsel %vm715_vm6, %v1821_v51, %v1823_v50  ;;  %v2266_v16 = vpop.permute.xlu0 %2265 }
 0x3b9   : > { %4924 = vmatmul.mubr.msk.bf16.vlgmr.msra.gmra.mrb[4].mxu0 %vm395_vm4, %v4922_v49  ;;  %4927 = vmatprep.subr.msk.bf16.mxu0 %vm399_vm2, %v1827_v53  ;;  %v1833_v54 = vsel %vm399_vm2, %v1826_v52, 0 }
 0x3ba   : > { %1842 = vmatpush1.bf16.msra.mxu0 %v1833_v54  ;;  %1873 = vmatprep.mubr.bf16.mxu0 %v5841_v0 }
 0x3bb   : > { %4934 = vmatprep.subr.msk.bf16.mxu0 %vm399_vm2, %v6215_v12  ;;  %v1825_v55 = vpop.permute.xlu1 %1824 }
 0x3bc   : > { %v1828_v56 = vsel %vm715_vm6, %v1823_v50, %v1825_v55  ;;  %v2270_v20 = vpop.permute.xlu0 %2269 }
 0x3bd   : > { %v1839_v57 = vsel %vm399_vm2, %v1828_v56, 0  ;;  %5206 = vmatmul.mubr.msk.bf16.vlgmr.msra.gmra.mrb[4].mxu1 %vm395_vm4, %v4922_v49 }
 0x3be   : > { %5210 = vmatpush3.bf16.msra.mxu1 %v1839_v57  ;;  %5211 = vmatprep.mubr.msk.bf16.mxu1 %vm5843_vm0, %v5842_v6 }
 0x3bf   : > { %5215 = vmatprep.subr.bf16.mxu1 %v5842_v6  ;;  %v2050_v60 = vpop.permute.xlu1 %2049 }
 0x3c0   : > { %v2056_v1 = vsel %vm945_vm7, %v2050_v60, %v2052_v61  ;;  %v2055_v7 = vsel %vm945_vm7, %v2048_v58, %v2050_v60  ;;  %v2375_v26 = vpop.permute.xlu0 %2374 }
 0x3c1   : > { %v2062_v11 = vsel %vm399_vm2, %v2055_v7, 0 }
 0x3c3   : > { %v2054_v2 = vpop.permute.xlu1 %2053 }
 0x3c4   : > { %v2057_v12 = vsel %vm945_vm7, %v2052_v61, %v2054_v2  ;;  %v2379_v30 = vpop.permute.xlu0 %2378  ;;  %v5854_v2 = vmov 2  }
 0x3c5   : > { %4928 = vmatmul.mubr.msk.bf16.vlgmr.msra.gmra.mrb[4].mxu0 %vm395_vm4, %v4926_v59  ;;  %v2068_v14 = vsel %vm399_vm2, %v2057_v12, 0  ;;  %5697 = vset.pattern.permute.xlu0 %v5854_v2 }
 0x3c6   : > { %1950 = vmatpush1.bf16.msra.mxu0 %v1941_v62  ;;  %1981 = vmatprep.mubr.bf16.mxu0 %v5841_v0 }
 0x3c7   : > { %4942 = vmatprep.subr.msk.bf16.mxu0 %vm399_vm2, %v2056_v1  ;;  %v2159_v9 = vpop.permute.xlu1 %2158 }
 0x3c8   : > { %v2165_v13 = vsel %vm1055_vm8, %v2159_v9, %v2161_v10  ;;  %v2164_v17 = vsel %vm1055_vm8, %v2157_v5, %v2159_v9 }
 0x3c9   : > { %5212 = vmatmul.mubr.msk.bf16.vlgmr.msra.gmra.mrb[4].mxu1 %vm395_vm4, %v4926_v59  ;;  %v2171_v21 = vsel %vm399_vm2, %v2164_v17, 0 }
 0x3ca   : > { %5216 = vmatpush3.bf16.msra.mxu1 %v1947_v3  ;;  %5217 = vmatprep.mubr.msk.bf16.mxu1 %vm5843_vm0, %v5842_v6  ;;  %v5855_v3 = vmov 3  }
 0x3cb   : > { %5221 = vmatprep.subr.bf16.mxu1 %v5842_v6  ;;  %v2163_v15 = vpop.permute.xlu1 %2162  ;;  %5698 = vset.pattern.permute.xlu1 %v5855_v3 }
 0x3cc   : > { %v2166_v22 = vsel %vm1055_vm8, %v2161_v10, %v2163_v15 }
 0x3cd   : > { %v2177_v24 = vsel %vm399_vm2, %v2166_v22, 0 }
 0x3cf   : > { %v2268_v19 = vpop.permute.xlu1 %2267 }
 0x3d0   : > { %v2274_v23 = vsel %vm1165_vm9, %v2268_v19, %v2270_v20  ;;  %v2273_v27 = vsel %vm1165_vm9, %v2266_v16, %v2268_v19 }
 0x3d1   : > { %4935 = vmatmul.mubr.msk.bf16.vlgmr.msra.gmra.mrb[4].mxu0 %vm395_vm4, %v4930_v8  ;;  %v2280_v31 = vsel %vm399_vm2, %v2273_v27, 0 }
 0x3d2   : > { %2071 = vmatpush1.bf16.msra.mxu0 %v2062_v11  ;;  %2102 = vmatprep.mubr.bf16.mxu0 %v5841_v0 }
 0x3d3   : > { %4946 = vmatprep.subr.msk.bf16.mxu0 %vm399_vm2, %v2165_v13  ;;  %v2272_v25 = vpop.permute.xlu1 %2271 }
 0x3d4   : > { %v2275_v32 = vsel %vm1165_vm9, %v2270_v20, %v2272_v25 }
 0x3d5   : > { %5218 = vmatmul.mubr.msk.bf16.vlgmr.msra.gmra.mrb[4].mxu1 %vm395_vm4, %v4930_v8  ;;  %v2286_v34 = vsel %vm399_vm2, %v2275_v32, 0 }
 0x3d6   : > { %5222 = vmatpush3.bf16.msra.mxu1 %v2068_v14  ;;  %5223 = vmatprep.mubr.msk.bf16.mxu1 %vm5843_vm0, %v5842_v6 }
 0x3d7   : > { %5227 = vmatprep.subr.bf16.mxu1 %v5842_v6  ;;  %v2377_v29 = vpop.permute.xlu1 %2376 }
 0x3d8   : > { %v2383_v33 = vsel %vm1275_vm10, %v2377_v29, %v2379_v30  ;;  %v2382_v35 = vsel %vm1275_vm10, %v2375_v26, %v2377_v29 }
 0x3d9   : > { %v2389_v38 = vsel %vm399_vm2, %v2382_v35, 0 }
 0x3db   : > { %v2381_v37 = vpop.permute.xlu1 %2380 }
 0x3dc   : > { %v2384_v39 = vsel %vm1275_vm10, %v2379_v30, %v2381_v37 }
 0x3dd   : > { %4943 = vmatmul.mubr.msk.bf16.vlgmr.msra.gmra.mrb[4].mxu0 %vm395_vm4, %v4937_v18  ;;  %v2395_v40 = vsel %vm399_vm2, %v2384_v39, 0 }
 0x3de   : > { %2180 = vmatpush1.bf16.msra.mxu0 %v2171_v21  ;;  %2211 = vmatprep.mubr.bf16.mxu0 %v5841_v0 }
 0x3df   : > { %4950 = vmatprep.subr.msk.bf16.mxu0 %vm399_vm2, %v2274_v23 }
 0x3e1   : > { %5224 = vmatmul.mubr.msk.bf16.vlgmr.msra.gmra.mrb[4].mxu1 %vm395_vm4, %v4937_v18 }
 0x3e2   : > { %5228 = vmatpush3.bf16.msra.mxu1 %v2177_v24  ;;  %5229 = vmatprep.mubr.msk.bf16.mxu1 %vm5843_vm0, %v5842_v6 }
 0x3e3   : > { %5233 = vmatprep.subr.bf16.mxu1 %v5842_v6 }
 0x3e9   : > { %4947 = vmatmul.mubr.msk.bf16.vlgmr.msra.gmra.mrb[4].mxu0 %vm395_vm4, %v4945_v28 }
 0x3ea   : > { %2289 = vmatpush1.bf16.msra.mxu0 %v2280_v31  ;;  %2320 = vmatprep.mubr.bf16.mxu0 %v5841_v0 }
 0x3eb   : > { %4954 = vmatprep.subr.msk.bf16.mxu0 %vm399_vm2, %v2383_v33 }
 0x3ed   : > { %5230 = vmatmul.mubr.msk.bf16.vlgmr.msra.gmra.mrb[4].mxu1 %vm395_vm4, %v4945_v28 }
 0x3ee   : > { %5234 = vmatpush3.bf16.msra.mxu1 %v2286_v34  ;;  %5235 = vmatprep.mubr.msk.bf16.mxu1 %vm5843_vm0, %v5842_v6 }
 0x3ef   : > { %5239 = vmatprep.subr.bf16.mxu1 %v5842_v6 }
 0x3f5   : > { %4951 = vmatmul.mubr.msk.bf16.vlgmr.msra.gmra.mrb[4].mxu0 %vm395_vm4, %v4949_v36 }
 0x3f6   : > { %2398 = vmatpush1.bf16.msra.mxu0 %v2389_v38  ;;  %2429 = vmatprep.mubr.bf16.mxu0 %v5841_v0 }
 0x3f9   : > { %5236 = vmatmul.mubr.msk.bf16.vlgmr.msra.gmra.mrb[4].mxu1 %vm395_vm4, %v4949_v36 }
 0x3fa   : > { %5240 = vmatpush3.bf16.msra.mxu1 %v2395_v40  ;;  %5241 = vmatprep.mubr.msk.bf16.mxu1 %vm5843_vm0, %v5842_v6  ;;  %v5767_v40 = vld [vmem:[%s5972_s25] sm:$0xff] }
 0x3fb   : > { %5245 = vmatprep.subr.bf16.mxu1 %v5842_v6 }
 0x401   : > { %4955 = vmatmul.mubr.msk.bf16.vlgmr.msra.gmra.mrb[4].mxu0 %vm395_vm4, %v4953_v43 }
 0x402   : > { %2646 = vmatprep.mubr.bf16.mxu0 %v5841_v0 }
 0x405   : > { %5242 = vmatmul.mubr.msk.bf16.vlgmr.msra.gmra.mrb[4].mxu1 %vm395_vm4, %v4953_v43 }
 0x406   : > { %5247 = vmatprep.mubr.msk.bf16.mxu1 %vm5843_vm0, %v5842_v6 }
 0x4d4   : > { %v2431_v44 = vpop.f32.mrb[4].mxu0 }
 0x4d5   : > { %v2481_v45 = vmul.f32 %v2431_v44, %v6168_v46  ;;  %v2433_v49 = vpop.f32.mrb[5].mxu0  ;;  %v5768_v44 = vld [vmem:[%s5972_s25 + $0x8] sm:$0xff] }
 0x4d6   : > { %v2482_v50 = vmul.f32 %v2433_v49, %v6172_v48  ;;  %v2435_v51 = vpop.f32.mrb[6].mxu0  ;;  %v5769_v49 = vld [vmem:[%s5972_s25 + $0x10] sm:$0xff] }
 0x4d7   : > { %v2495_v52 = vmul.f32 %v2481_v45, %v2481_v45  ;;  %v2436_v53 = vpop.f32.mrb[7].mxu0 }
 0x4d8   : > { %v2496_v54 = vmul.f32 %v2482_v50, %v2482_v50  ;;  %v2472_v55 = vpop.f32.mrb[4].mxu1  ;;  %v2484_v56 = vadd.f32 %v2482_v50, %v2481_v45 }
 0x4d9   : > { %v2483_v57 = vmul.f32 %v2472_v55, %v6170_v47  ;;  %v5243_v58 = vpop.f32.mrb[5].mxu1 }
 0x4da   : > { %v2475_v59 = vpop.f32.mrb[6].mxu1  ;;  %v2498_v60 = vadd.f32 %v2496_v54, %v2495_v52 }
 0x4db   : > { %v5244_v61 = vpop.f32.mrb[7].mxu1  ;;  %v2485_v62 = vadd.f32 %v2484_v56, %v2483_v57  ;;  %v2497_v63 = vmul.f32 %v2483_v57, %v2483_v57 }
 0x4dd   : > { %2486 = vadd.xlane.f32.xlu0 %v2485_v62  ;;  %v2499_v1 = vadd.f32 %v2498_v60, %v2497_v63 }
 0x4df   : > { %2500 = vadd.xlane.f32.xlu1 %v2499_v1 }
 0x4f0   : > { %2534 = vperm.xlu1 %5698, %v6180_v4  }
 0x4f3   : > { %2527 = vperm.xlu0 %5697, %v6180_v4  }
 0x56a   : > { %v2487_v5 = vpop.xlane.xlu0 %2486 }
 0x56b   : > { %v2488_v7 = vrot.slane %v2487_v5, 4 }
 0x56c   : > { %v2501_v8 = vpop.xlane.xlu1 %2500 }
 0x56d   : > { %v2489_v9 = vadd.f32 %v2488_v7, %v2487_v5  ;;  %v2502_v10 = vrot.slane %v2501_v8, 4 }
 0x56f   : > { %v2490_v11 = vrot.slane %v2489_v9, 2  ;;  %v2503_v12 = vadd.f32 %v2502_v10, %v2501_v8 }
 0x570   : > { %v2535_v30 = vpop.permute.xlu1 %2534 }
 0x571   : > { %v2504_v13 = vrot.slane %v2503_v12, 2  ;;  %v2491_v14 = vadd.f32 %v2490_v11, %v2489_v9 }
 0x572   : > { %v2528_v26 = vpop.permute.xlu0 %2527 }
 0x573   : > { %v2492_v15 = vrot.slane %v2491_v14, 1  ;;  %v2505_v16 = vadd.f32 %v2504_v13, %v2503_v12 }
 0x575   : > { %v2493_v17 = vadd.f32 %v2492_v15, %v2491_v14  ;;  %v2506_v18 = vrot.slane %v2505_v16, 1 }
 0x577   : > { %5617 = vpush %v2493_v17  ;;  %v2507_v19 = vadd.f32 %v2506_v18, %v2505_v16 }
 0x579   : > { %5619 = vpush %v2507_v19 }
 0x5a8   : > { %s5618_s29 = spop %5617 }
 0x5a9   : > { %s2509_s22 = smul.f32 0.00048828125, %s5618_s29 }
 0x5aa   : > { %s5620_s0 = spop %5619 }
 0x5ab   : > { %s2511_s2 = smul.f32 %s2509_s22, %s2509_s22  ;;  %v2514_v21 = vstv %s2509_s22 }
 0x5ac   : > { %s2510_s3 = smul.f32 0.00048828125, %s5620_s0  ;;  %v2515_v22 = vsub.f32 %v2481_v45, %v2514_v21  ;;  %v2516_v23 = vsub.f32 %v2482_v50, %v2514_v21  ;;  %v2517_v24 = vsub.f32 %v2483_v57, %v2514_v21 }
 0x5ae   : > { %s2512_s4 = ssub.f32 %s2510_s3, %s2511_s2 }
 0x5b0   : > { %s2513_s11 = smax.f32 %s6895_s18, %s2512_s4 }
 0x5b1   : > { %s2518_s15 = sadd.f32 1e-05, %s2513_s11 }
 0x5b3   : > { %v2519_v4 = vstv %s2518_s15 }
 0x5b4   : > { %5745 = vrsqrt.f32 %v2519_v4 }
 0x5be   : > { %v5746_v20 = vpop.eup %5745 }
 0x5bf   : > { %5621 = vpush %v5746_v20 }
 0x5f0   : > { %s5622_s20 = spop %5621 }
 0x5f1   : > { %v2522_v25 = vstv %s5622_s20 }
 0x5f2   : > { %v2523_v27 = vmul.f32 %v2522_v25, %v2515_v22  ;;  %v2524_v28 = vmul.f32 %v2522_v25, %v2516_v23  ;;  %v2525_v29 = vmul.f32 %v2522_v25, %v2517_v24  ;;  %v4959_v24 = vld [vmem:[%s6846_s5 + $0x2] sm:$0x3] }
 0x5f4   : > { %v2530_v31 = vmul.f32 %v2528_v26, %v2523_v27  ;;  %v2531_v32 = vmul.f32 %v2528_v26, %v2524_v28  ;;  %v2532_v33 = vmul.f32 %v2528_v26, %v2525_v29 }
 0x5f6   : > { %v2537_v34 = vadd.f32 %v2535_v30, %v2530_v31  ;;  %v2538_v35 = vadd.f32 %v2535_v30, %v2531_v32  ;;  %v2539_v36 = vadd.f32 %v2535_v30, %v2532_v33 }
 0x5f8   : > { %v2540_v37 = vmul.f32 %v2537_v34, %v6168_v46  ;;  %v2541_v38 = vmul.f32 %v2538_v35, %v6172_v48  ;;  %v2542_v39 = vmul.f32 %v2539_v36, %v6170_v47 }
 0x5fa   : > { %v2543_v43 = vadd.f32 %v5767_v40, %v2540_v37  ;;  %v2544_v45 = vadd.f32 %v5768_v44, %v2541_v38  ;;  %v2545_v50 = vadd.f32 %v5769_v49, %v2542_v39  ;;  %v2578_v37 = vld [vmem:[%s6846_s5] sm:$0x3] }
 0x5fc   : > { %v2549_v51 = vmul.f32 0.70710677, %v2543_v43  ;;  %v2550_v52 = vmul.f32 0.70710677, %v2544_v45  ;;  %v2551_v53 = vmul.f32 0.70710677, %v2545_v50 }
 0x5fd   : > { %v2546_v56 = vmul.f32 0.5, %v2543_v43  ;;  %v2547_v59 = vmul.f32 0.5, %v2544_v45  ;;  %v2548_v61 = vmul.f32 0.5, %v2545_v50 }
 0x5fe   : > { %5747 = verf.f32 %v2549_v51 }
 0x5ff   : > { %5749 = verf.f32 %v2550_v52 }
 0x600   : > { %5751 = verf.f32 %v2551_v53 }
 0x608   : > { %v5748_v54 = vpop.eup %5747 }
 0x609   : > { %v5750_v55 = vpop.eup %5749  ;;  %v2555_v57 = vadd.f32 1.0, %v5748_v54  ;;  %v4970_v54 = vld [vmem:[%s6846_s5 + $0x4] sm:$0x3] }
 0x60a   : > { %v5752_v58 = vpop.eup %5751  ;;  %v2556_v60 = vadd.f32 1.0, %v5750_v55 }
 0x60b   : > { %v2557_v62 = vadd.f32 1.0, %v5752_v58  ;;  %v2558_v63 = vmul.f32 %v2555_v57, %v2546_v56 }
 0x60c   : > { %v2559_v1 = vmul.f32 %v2556_v60, %v2547_v59 }
 0x60d   : > { %v2560_v2 = vmul.f32 %v2557_v62, %v2548_v61  ;;  %v6402_v16 = vpack.c.bf16 %v2558_v63, %v2558_v63  ;;  %v4974_v62 = vld [vmem:[%s6846_s5 + $0x6] sm:$0x3] }
 0x60e   : > { %v5061_v3 = vpack.c.bf16 %v2559_v1, %v2558_v63  ;;  %v6390_v13 = vpack.c.bf16 %v2559_v1, %v2559_v1 }
 0x60f   : > { %v5062_v5 = vpack.c.bf16 %v2560_v2, %v2560_v2  ;;  %v3033_v2 = vsel %vm399_vm2, %v6402_v16, 0 }
 0x610   : > { %2574 = vst [vmem:[#allocation2 + $0x4] sm:$0xff] %v5061_v3 }
 0x611   : > { %2575 = vst [vmem:[#allocation2 + $0xc] sm:$0xf] %v5062_v5 }
 0x617   : > { %v2576_v7 = vld [vmem:[#allocation2] sm:$0xff] }
 0x618   : > { %v4961_v8 = vcombine.high %v2576_v7, %v2576_v7  ;;  %v4960_v9 = vcombine.low %v2576_v7, %v2576_v7  ;;  %v2577_v10 = vld [vmem:[#allocation2 + $0x8] sm:$0xff] }
 0x619   : > { %v4963_v11 = vcombine.high %v2577_v10, %v2577_v10  ;;  %v4962_v12 = vcombine.low %v2577_v10, %v2577_v10  ;;  %v3126_v14 = vld [vmem:[#allocation2 + $0xc] sm:$0xff] }
 0x61a   : > { %2697 = vrot.lane.b32.xlu0 %v4961_v8, %s6887_s27  ;;  %2591 = vrot.lane.b32.xlu1 %v4960_v9, %s6886_s26  ;;  %v4989_v15 = vcombine.high %v3126_v14, %v3126_v14  ;;  %v4988_v17 = vcombine.low %v3126_v14, %v3126_v14  ;;  %v5725_v3 = vld [vmem:[#allocation2 + $0xc] ss:$0 sps:$4 sm:$0xff]  }
 0x61e   : > { %2701 = vrot.lane.b32.xlu0 %v4963_v11, %s6887_s27  ;;  %2593 = vrot.lane.b32.xlu1 %v4961_v8, %s6886_s26 }
 0x622   : > { %2803 = vrot.lane.b32.xlu0 %v4961_v8, %s6888_s28  ;;  %2595 = vrot.lane.b32.xlu1 %v4962_v12, %s6886_s26 }
 0x626   : > { %2807 = vrot.lane.b32.xlu0 %v4963_v11, %s6888_s28  ;;  %2597 = vrot.lane.b32.xlu1 %v4963_v11, %s6886_s26 }
 0x62a   : > { %2912 = vrot.lane.b32.xlu0 %v4961_v8, %s6889_s14  ;;  %2695 = vrot.lane.b32.xlu1 %v4960_v9, %s6887_s27  ;;  %v3039_v8 = vsel %vm399_vm2, %v5725_v3, 0 }
 0x62e   : > { %2916 = vrot.lane.b32.xlu0 %v4963_v11, %s6889_s14  ;;  %2699 = vrot.lane.b32.xlu1 %v4962_v12, %s6887_s27  ;;  %v4978_v11 = vld [vmem:[%s6846_s5 + $0x8] sm:$0x3] }
 0x632   : > { %3141 = vrot.lane.b32.xlu0 %v6390_v13, %s6890_s16  ;;  %2801 = vrot.lane.b32.xlu1 %v4960_v9, %s6888_s28 }
 0x636   : > { %3145 = vrot.lane.b32.xlu0 %v4989_v15, %s6890_s16  ;;  %2805 = vrot.lane.b32.xlu1 %v4962_v12, %s6888_s28 }
 0x63a   : > { %3250 = vrot.lane.b32.xlu0 %v6390_v13, %s6891_s23  ;;  %2910 = vrot.lane.b32.xlu1 %v4960_v9, %s6889_s14 }
 0x63e   : > { %3254 = vrot.lane.b32.xlu0 %v4989_v15, %s6891_s23  ;;  %2914 = vrot.lane.b32.xlu1 %v4962_v12, %s6889_s14 }
 0x642   : > { %3359 = vrot.lane.b32.xlu0 %v6390_v13, %s6892_s24  ;;  %3139 = vrot.lane.b32.xlu1 %v6402_v16, %s6890_s16 }
 0x646   : > { %3363 = vrot.lane.b32.xlu0 %v4989_v15, %s6892_s24  ;;  %3143 = vrot.lane.b32.xlu1 %v4988_v17, %s6890_s16 }
 0x64a   : > { %3468 = vrot.lane.b32.xlu0 %v6390_v13, %s6893_s17  ;;  %3248 = vrot.lane.b32.xlu1 %v6402_v16, %s6891_s23 }
 0x64e   : > { %3472 = vrot.lane.b32.xlu0 %v4989_v15, %s6893_s17  ;;  %3252 = vrot.lane.b32.xlu1 %v4988_v17, %s6891_s23 }
 0x652   : > { %3357 = vrot.lane.b32.xlu1 %v6402_v16, %s6892_s24 }
 0x656   : > { %3361 = vrot.lane.b32.xlu1 %v4988_v17, %s6892_s24 }
 0x65a   : > { %3466 = vrot.lane.b32.xlu1 %v6402_v16, %s6893_s17 }
 0x65e   : > { %3470 = vrot.lane.b32.xlu1 %v4988_v17, %s6893_s17 }
 0x68c   : > { %v2592_v18 = vpop.permute.xlu1 %2591  ;;  %v2698_v20 = vpop.permute.xlu0 %2697 }
 0x690   : > { %v2594_v19 = vpop.permute.xlu1 %2593  ;;  %v2702_v27 = vpop.permute.xlu0 %2701 }
 0x691   : > { %v2599_v4 = vsel %vm391_vm1, %v2592_v18, %v2594_v19 }
 0x692   : > { %v2606_v23 = vsel %vm399_vm2, %v2599_v4, 0 }
 0x694   : > { %v2596_v21 = vpop.permute.xlu1 %2595  ;;  %v2804_v31 = vpop.permute.xlu0 %2803 }
 0x695   : > { %v2600_v22 = vsel %vm391_vm1, %v2594_v19, %v2596_v21 }
 0x696   : > { %4964 = vmatprep.subr.msk.bf16.mxu0 %vm399_vm2, %v2600_v22 }
 0x697   : > { %2615 = vmatpush1.bf16.msra.mxu0 %v2606_v23 }
 0x698   : > { %v2598_v25 = vpop.permute.xlu1 %2597  ;;  %v2808_v39 = vpop.permute.xlu0 %2807 }
 0x699   : > { %v2601_v26 = vsel %vm391_vm1, %v2596_v21, %v2598_v25 }
 0x69a   : > { %v2612_v28 = vsel %vm399_vm2, %v2601_v26, 0  ;;  %4965 = vmatmul.mubr.msk.bf16.vlgmr.msra.gmra.mrb[8].mxu0 %vm395_vm4, %v4959_v24 }
 0x69b   : > { %5246 = vmatpush3.bf16.msra.mxu1 %v2612_v28  ;;  %2750 = vmatprep.mubr.bf16.mxu0 %v5841_v0 }
 0x69c   : > { %v2696_v29 = vpop.permute.xlu1 %2695  ;;  %5251 = vmatprep.subr.bf16.mxu1 %v5842_v6  ;;  %v2913_v51 = vpop.permute.xlu0 %2912 }
 0x69d   : > { %v2703_v30 = vsel %vm498_vm3, %v2696_v29, %v2698_v20 }
 0x69e   : > { %5248 = vmatmul.mubr.msk.bf16.vlgmr.msra.gmra.mrb[8].mxu1 %vm395_vm4, %v4959_v24  ;;  %v2710_v35 = vsel %vm399_vm2, %v2703_v30, 0  ;;  %v4993_v30 = vld [vmem:[%s6846_s5 + $0xc] sm:$0x3] }
 0x69f   : > { %5253 = vmatprep.mubr.msk.bf16.mxu1 %vm5843_vm0, %v5842_v6 }
 0x6a0   : > { %v2700_v32 = vpop.permute.xlu1 %2699  ;;  %v2917_v57 = vpop.permute.xlu0 %2916 }
 0x6a1   : > { %v2704_v33 = vsel %vm498_vm3, %v2698_v20, %v2700_v32  ;;  %v2705_v34 = vsel %vm498_vm3, %v2700_v32, %v2702_v27  ;;  %v4985_v20 = vld [vmem:[%s6846_s5 + $0xa] sm:$0x3] }
 0x6a2   : > { %v2716_v36 = vsel %vm399_vm2, %v2705_v34, 0  ;;  %4967 = vmatprep.subr.msk.bf16.mxu0 %vm399_vm2, %v2704_v33 }
 0x6a3   : > { %2719 = vmatpush1.bf16.msra.mxu0 %v2710_v35  ;;  %5252 = vmatpush3.bf16.msra.mxu1 %v2716_v36 }
 0x6a4   : > { %v2802_v38 = vpop.permute.xlu1 %2801  ;;  %5257 = vmatprep.subr.bf16.mxu1 %v5842_v6  ;;  %v3142_v1 = vpop.permute.xlu0 %3141 }
 0x6a5   : > { %v2809_v40 = vsel %vm605_vm5, %v2802_v38, %v2804_v31  ;;  %v4997_v38 = vld [vmem:[%s6846_s5 + $0xe] sm:$0x3] }
 0x6a6   : > { %4968 = vmatmul.mubr.msk.bf16.vlgmr.msra.gmra.mrb[8].mxu0 %vm395_vm4, %v2578_v37  ;;  %v2816_v49 = vsel %vm399_vm2, %v2809_v40, 0 }
 0x6a7   : > { %2856 = vmatprep.mubr.bf16.mxu0 %v5841_v0 }
 0x6a8   : > { %v2806_v43 = vpop.permute.xlu1 %2805  ;;  %v3146_v9 = vpop.permute.xlu0 %3145 }
 0x6a9   : > { %v2810_v44 = vsel %vm605_vm5, %v2804_v31, %v2806_v43  ;;  %v2811_v45 = vsel %vm605_vm5, %v2806_v43, %v2808_v39 }
 0x6aa   : > { %v2822_v50 = vsel %vm399_vm2, %v2811_v45, 0  ;;  %5254 = vmatmul.mubr.msk.bf16.vlgmr.msra.gmra.mrb[8].mxu1 %vm395_vm4, %v2578_v37  ;;  %4971 = vmatprep.subr.msk.bf16.mxu0 %vm399_vm2, %v2810_v44  ;;  %v5001_v45 = vld [vmem:[%s6846_s5 + $0x10] sm:$0x3] }
 0x6ab   : > { %2825 = vmatpush1.bf16.msra.mxu0 %v2816_v49  ;;  %5258 = vmatpush3.bf16.msra.mxu1 %v2822_v50 }
 0x6ac   : > { %v2911_v52 = vpop.permute.xlu1 %2910  ;;  %5259 = vmatprep.mubr.msk.bf16.mxu1 %vm5843_vm0, %v5842_v6  ;;  %5263 = vmatprep.subr.bf16.mxu1 %v5842_v6 }
 0x6ad   : > { %v2918_v53 = vsel %vm715_vm6, %v2911_v52, %v2913_v51 }
 0x6ae   : > { %v2925_v58 = vsel %vm399_vm2, %v2918_v53, 0 }
 0x6b0   : > { %v2915_v55 = vpop.permute.xlu1 %2914 }
 0x6b1   : > { %v2919_v56 = vsel %vm715_vm6, %v2913_v51, %v2915_v55  ;;  %v2920_v59 = vsel %vm715_vm6, %v2915_v55, %v2917_v57 }
 0x6b2   : > { %4972 = vmatmul.mubr.msk.bf16.vlgmr.msra.gmra.mrb[8].mxu0 %vm395_vm4, %v4970_v54  ;;  %4975 = vmatprep.subr.msk.bf16.mxu0 %vm399_vm2, %v2919_v56  ;;  %v2931_v60 = vsel %vm399_vm2, %v2920_v59, 0 }
 0x6b3   : > { %2934 = vmatpush1.bf16.msra.mxu0 %v2925_v58  ;;  %2965 = vmatprep.mubr.bf16.mxu0 %v5841_v0 }
 0x6b4   : > { %4982 = vmatprep.subr.msk.bf16.mxu0 %vm399_vm2, %v6390_v13  ;;  %v3140_v61 = vpop.permute.xlu1 %3139  ;;  %v3251_v13 = vpop.permute.xlu0 %3250 }
 0x6b5   : > { %v3147_v10 = vsel %vm945_vm7, %v3140_v61, %v3142_v1 }
 0x6b6   : > { %5260 = vmatmul.mubr.msk.bf16.vlgmr.msra.gmra.mrb[8].mxu1 %vm395_vm4, %v4970_v54  ;;  %v3154_v14 = vsel %vm399_vm2, %v3147_v10, 0 }
 0x6b7   : > { %5264 = vmatpush3.bf16.msra.mxu1 %v2931_v60  ;;  %5265 = vmatprep.mubr.msk.bf16.mxu1 %vm5843_vm0, %v5842_v6 }
 0x6b8   : > { %5269 = vmatprep.subr.bf16.mxu1 %v5842_v6  ;;  %v3144_v63 = vpop.permute.xlu1 %3143  ;;  %v3255_v19 = vpop.permute.xlu0 %3254 }
 0x6b9   : > { %v3148_v5 = vsel %vm945_vm7, %v3142_v1, %v3144_v63  ;;  %v3149_v15 = vsel %vm945_vm7, %v3144_v63, %v3146_v9 }
 0x6ba   : > { %v3160_v17 = vsel %vm399_vm2, %v3149_v15, 0 }
 0x6bc   : > { %v3249_v7 = vpop.permute.xlu1 %3248  ;;  %v3360_v22 = vpop.permute.xlu0 %3359 }
 0x6bd   : > { %v3256_v4 = vsel %vm1055_vm8, %v3249_v7, %v3251_v13 }
 0x6be   : > { %4976 = vmatmul.mubr.msk.bf16.vlgmr.msra.gmra.mrb[8].mxu0 %vm395_vm4, %v4974_v62  ;;  %v3263_v23 = vsel %vm399_vm2, %v3256_v4, 0 }
 0x6bf   : > { %3042 = vmatpush1.bf16.msra.mxu0 %v3033_v2  ;;  %3073 = vmatprep.mubr.bf16.mxu0 %v5841_v0 }
 0x6c0   : > { %4990 = vmatprep.subr.msk.bf16.mxu0 %vm399_vm2, %v3148_v5  ;;  %v3253_v12 = vpop.permute.xlu1 %3252  ;;  %v3364_v28 = vpop.permute.xlu0 %3363 }
 0x6c1   : > { %v3257_v16 = vsel %vm1055_vm8, %v3251_v13, %v3253_v12  ;;  %v3258_v24 = vsel %vm1055_vm8, %v3253_v12, %v3255_v19  ;;  %v5856_v12 = vmov 4   ;;  %v5857_v13 = vmov 5  }
 0x6c2   : > { %5266 = vmatmul.mubr.msk.bf16.vlgmr.msra.gmra.mrb[8].mxu1 %vm395_vm4, %v4974_v62  ;;  %v3269_v26 = vsel %vm399_vm2, %v3258_v24, 0  ;;  %5699 = vset.pattern.permute.xlu0 %v5856_v12 }
 0x6c3   : > { %5270 = vmatpush3.bf16.msra.mxu1 %v3039_v8  ;;  %5271 = vmatprep.mubr.msk.bf16.mxu1 %vm5843_vm0, %v5842_v6 }
 0x6c4   : > { %5275 = vmatprep.subr.bf16.mxu1 %v5842_v6  ;;  %v3358_v18 = vpop.permute.xlu1 %3357  ;;  %v3469_v32 = vpop.permute.xlu0 %3468  ;;  %5700 = vset.pattern.permute.xlu1 %v5857_v13 }
 0x6c5   : > { %v3365_v29 = vsel %vm1165_vm9, %v3358_v18, %v3360_v22 }
 0x6c6   : > { %v3372_v33 = vsel %vm399_vm2, %v3365_v29, 0 }
 0x6c8   : > { %v3362_v21 = vpop.permute.xlu1 %3361  ;;  %v3473_v39 = vpop.permute.xlu0 %3472 }
 0x6c9   : > { %v3366_v25 = vsel %vm1165_vm9, %v3360_v22, %v3362_v21  ;;  %v3367_v34 = vsel %vm1165_vm9, %v3362_v21, %v3364_v28 }
 0x6ca   : > { %4983 = vmatmul.mubr.msk.bf16.vlgmr.msra.gmra.mrb[8].mxu0 %vm395_vm4, %v4978_v11  ;;  %v3378_v36 = vsel %vm399_vm2, %v3367_v34, 0 }
 0x6cb   : > { %3163 = vmatpush1.bf16.msra.mxu0 %v3154_v14  ;;  %3194 = vmatprep.mubr.bf16.mxu0 %v5841_v0  ;;  %v6578_v14 = vld [vmem:[%s6848_s7] sm:$0xff] }
 0x6cc   : > { %4994 = vmatprep.subr.msk.bf16.mxu0 %vm399_vm2, %v3257_v16  ;;  %v3467_v27 = vpop.permute.xlu1 %3466 }
 0x6cd   : > { %v3474_v37 = vsel %vm1275_vm10, %v3467_v27, %v3469_v32 }
 0x6ce   : > { %5272 = vmatmul.mubr.msk.bf16.vlgmr.msra.gmra.mrb[8].mxu1 %vm395_vm4, %v4978_v11  ;;  %v3481_v40 = vsel %vm399_vm2, %v3474_v37, 0 }
 0x6cf   : > { %5276 = vmatpush3.bf16.msra.mxu1 %v3160_v17  ;;  %5277 = vmatprep.mubr.msk.bf16.mxu1 %vm5843_vm0, %v5842_v6 }
 0x6d0   : > { %5281 = vmatprep.subr.bf16.mxu1 %v5842_v6  ;;  %v3471_v31 = vpop.permute.xlu1 %3470 }
 0x6d1   : > { %v3475_v35 = vsel %vm1275_vm10, %v3469_v32, %v3471_v31  ;;  %v3476_v43 = vsel %vm1275_vm10, %v3471_v31, %v3473_v39 }
 0x6d2   : > { %v3487_v44 = vsel %vm399_vm2, %v3476_v43, 0 }
 0x6d6   : > { %4991 = vmatmul.mubr.msk.bf16.vlgmr.msra.gmra.mrb[8].mxu0 %vm395_vm4, %v4985_v20 }
 0x6d7   : > { %3272 = vmatpush1.bf16.msra.mxu0 %v3263_v23  ;;  %3303 = vmatprep.mubr.bf16.mxu0 %v5841_v0 }
 0x6d8   : > { %4998 = vmatprep.subr.msk.bf16.mxu0 %vm399_vm2, %v3366_v25 }
 0x6da   : > { %5278 = vmatmul.mubr.msk.bf16.vlgmr.msra.gmra.mrb[8].mxu1 %vm395_vm4, %v4985_v20 }
 0x6db   : > { %5282 = vmatpush3.bf16.msra.mxu1 %v3269_v26  ;;  %5283 = vmatprep.mubr.msk.bf16.mxu1 %vm5843_vm0, %v5842_v6 }
 0x6dc   : > { %5287 = vmatprep.subr.bf16.mxu1 %v5842_v6 }
 0x6e2   : > { %4995 = vmatmul.mubr.msk.bf16.vlgmr.msra.gmra.mrb[8].mxu0 %vm395_vm4, %v4993_v30 }
 0x6e3   : > { %3381 = vmatpush1.bf16.msra.mxu0 %v3372_v33  ;;  %3412 = vmatprep.mubr.bf16.mxu0 %v5841_v0 }
 0x6e4   : > { %5002 = vmatprep.subr.msk.bf16.mxu0 %vm399_vm2, %v3475_v35 }
 0x6e6   : > { %5284 = vmatmul.mubr.msk.bf16.vlgmr.msra.gmra.mrb[8].mxu1 %vm395_vm4, %v4993_v30 }
 0x6e7   : > { %5288 = vmatpush3.bf16.msra.mxu1 %v3378_v36  ;;  %5289 = vmatprep.mubr.msk.bf16.mxu1 %vm5843_vm0, %v5842_v6 }
 0x6e8   : > { %5293 = vmatprep.subr.bf16.mxu1 %v5842_v6 }
 0x6ee   : > { %4999 = vmatmul.mubr.msk.bf16.vlgmr.msra.gmra.mrb[8].mxu0 %vm395_vm4, %v4997_v38 }
 0x6ef   : > { %3490 = vmatpush1.bf16.msra.mxu0 %v3481_v40  ;;  %3521 = vmatprep.mubr.bf16.mxu0 %v5841_v0 }
 0x6f2   : > { %5290 = vmatmul.mubr.msk.bf16.vlgmr.msra.gmra.mrb[8].mxu1 %vm395_vm4, %v4997_v38 }
 0x6f3   : > { %5294 = vmatpush3.bf16.msra.mxu1 %v3487_v44  ;;  %5295 = vmatprep.mubr.msk.bf16.mxu1 %vm5843_vm0, %v5842_v6 }
 0x6f4   : > { %5299 = vmatprep.subr.bf16.mxu1 %v5842_v6 }
 0x6fa   : > { %5003 = vmatmul.mubr.msk.bf16.vlgmr.msra.gmra.mrb[8].mxu0 %vm395_vm4, %v5001_v45 }
 0x6fb   : > { %3743 = vmatprep.mubr.bf16.mxu0 %v5841_v0 }
 0x6fe   : > { %5296 = vmatmul.mubr.msk.bf16.vlgmr.msra.gmra.mrb[8].mxu1 %vm395_vm4, %v5001_v45 }
 0x6ff   : > { %5301 = vmatprep.mubr.msk.bf16.mxu1 %vm5843_vm0, %v5842_v6 }
 0x7cd   : > { %v3523_v49 = vpop.f32.mrb[8].mxu0 }
 0x7ce   : > { %v6557_v50 = vmul.f32 %v3523_v49, %v6168_v46  ;;  %v3525_v51 = vpop.f32.mrb[9].mxu0 }
 0x7cf   : > { %v6560_v52 = vmul.f32 %v3525_v51, %v6172_v48  ;;  %v3527_v53 = vpop.f32.mrb[10].mxu0 }
 0x7d0   : > { %v3576_v54 = vsel %vm399_vm2, %v6557_v50, 0.0  ;;  %v3590_v55 = vmul.f32 %v6557_v50, %v6557_v50  ;;  %v3528_v56 = vpop.f32.mrb[11].mxu0 }
 0x7d1   : > { %v3577_v57 = vsel %vm399_vm2, %v6560_v52, 0.0  ;;  %v3591_v58 = vmul.f32 %v6560_v52, %v6560_v52  ;;  %v3564_v59 = vpop.f32.mrb[8].mxu1 }
 0x7d2   : > { %v3575_v60 = vmul.f32 %v3564_v59, %v6170_v47  ;;  %v5297_v61 = vpop.f32.mrb[9].mxu1  ;;  %v3578_v62 = vadd.f32 %v3577_v57, %v3576_v54  ;;  %v3593_v63 = vsel %vm399_vm2, %v3590_v55, 0.0 }
 0x7d3   : > { %v3567_v1 = vpop.f32.mrb[10].mxu1  ;;  %v3594_v2 = vsel %vm399_vm2, %v3591_v58, 0.0 }
 0x7d4   : > { %v5298_v3 = vpop.f32.mrb[11].mxu1  ;;  %v3579_v5 = vsel %vm399_vm2, %v3575_v60, 0.0  ;;  %v3592_v7 = vmul.f32 %v3575_v60, %v3575_v60  ;;  %v3595_v8 = vadd.f32 %v3594_v2, %v3593_v63 }
 0x7d5   : > { %v3580_v9 = vadd.f32 %v3579_v5, %v3578_v62 }
 0x7d6   : > { %v3596_v10 = vsel %vm399_vm2, %v3592_v7, 0.0 }
 0x7d7   : > { %3581 = vadd.xlane.f32.xlu1 %v3580_v9  ;;  %v3597_v11 = vadd.f32 %v3596_v10, %v3595_v8 }
 0x7d9   : > { %3598 = vadd.xlane.f32.xlu0 %v3597_v11 }
 0x7e8   : > { %3632 = vperm.xlu1 %5700, %v6578_v14  }
 0x7ef   : > { %3625 = vperm.xlu0 %5699, %v6578_v14  }
 0x864   : > { %v3582_v15 = vpop.xlane.xlu1 %3581 }
 0x865   : > { %v3583_v16 = vrot.slane %v3582_v15, 4 }
 0x866   : > { %v3599_v17 = vpop.xlane.xlu0 %3598 }
 0x867   : > { %v3584_v18 = vadd.f32 %v3583_v16, %v3582_v15  ;;  %v3600_v19 = vrot.slane %v3599_v17, 4 }
 0x868   : > { %v3633_v39 = vpop.permute.xlu1 %3632 }
 0x869   : > { %v3585_v4 = vrot.slane %v3584_v18, 2  ;;  %v3601_v20 = vadd.f32 %v3600_v19, %v3599_v17 }
 0x86b   : > { %v3602_v21 = vrot.slane %v3601_v20, 2  ;;  %v3586_v22 = vadd.f32 %v3585_v4, %v3584_v18 }
 0x86d   : > { %v3587_v23 = vrot.slane %v3586_v22, 1  ;;  %v3603_v24 = vadd.f32 %v3602_v21, %v3601_v20 }
 0x86e   : > { %v3626_v35 = vpop.permute.xlu0 %3625 }
 0x86f   : > { %v3588_v25 = vadd.f32 %v3587_v23, %v3586_v22  ;;  %v3604_v26 = vrot.slane %v3603_v24, 1 }
 0x871   : > { %5623 = vpush %v3588_v25  ;;  %v3605_v27 = vadd.f32 %v3604_v26, %v3603_v24 }
 0x873   : > { %5625 = vpush %v3605_v27 }
 0x8a2   : > { %s5624_s0 = spop %5623 }
 0x8a3   : > { %s3607_s2 = smul.f32 0.0009765625, %s5624_s0 }
 0x8a4   : > { %s5626_s3 = spop %5625 }
 0x8a5   : > { %s3609_s4 = smul.f32 %s3607_s2, %s3607_s2  ;;  %v3612_v30 = vstv %s3607_s2 }
 0x8a6   : > { %s3608_s11 = smul.f32 0.0009765625, %s5626_s3  ;;  %v3613_v31 = vsub.f32 %v6557_v50, %v3612_v30  ;;  %v3614_v32 = vsub.f32 %v6560_v52, %v3612_v30  ;;  %v3615_v33 = vsub.f32 %v3575_v60, %v3612_v30 }
 0x8a8   : > { %s3610_s15 = ssub.f32 %s3608_s11, %s3609_s4  ;;  %s334_s4 = sand.u32 1, %s5831_s10  }
 0x8aa   : > { %s3611_s20 = smax.f32 %s6895_s18, %s3610_s15  ;;  %s5635_s15 = smul.u32 192, %s5933_s13 }
 0x8ab   : > { %s3616_s25 = sadd.f32 1e-05, %s3611_s20  ;;  %s4774_s13 = scalar_lea.sflag [#allocation4], %s334_s4 }
 0x8ad   : > { %v3617_v28 = vstv %s3616_s25 }
 0x8ae   : > { %5753 = vrsqrt.f32 %v3617_v28  ;;  %v5007_v28 = vld [vmem:[%s6847_s6 + $0x2] sm:$0x3] }
 0x8b8   : > { %v5754_v29 = vpop.eup %5753 }
 0x8b9   : > { %5627 = vpush %v5754_v29 }
 0x8ea   : > { %s5628_s29 = spop %5627 }
 0x8eb   : > { %v3620_v34 = vstv %s5628_s29 }
 0x8ec   : > { %v3621_v36 = vmul.f32 %v3620_v34, %v3613_v31  ;;  %v3622_v37 = vmul.f32 %v3620_v34, %v3614_v32  ;;  %v3623_v38 = vmul.f32 %v3620_v34, %v3615_v33 }
 0x8ee   : > { %v3628_v40 = vmul.f32 %v3626_v35, %v3621_v36  ;;  %v3629_v43 = vmul.f32 %v3626_v35, %v3622_v37  ;;  %v3630_v44 = vmul.f32 %v3626_v35, %v3623_v38 }
 0x8f0   : > { %v3635_v45 = vadd.f32 %v3633_v39, %v3628_v40  ;;  %v3636_v49 = vadd.f32 %v3633_v39, %v3629_v43  ;;  %v3637_v51 = vadd.f32 %v3633_v39, %v3630_v44  ;;  %v3673_v44 = vld [vmem:[%s6847_s6] sm:$0x3] }
 0x8f2   : > { %v3638_v53 = vmul.f32 %v3635_v45, %v6168_v46  ;;  %v3639_v50 = vmul.f32 %v3636_v49, %v6172_v48  ;;  %v3640_v52 = vmul.f32 %v3637_v51, %v6170_v47 }
 0x8f4   : > { %v3644_v54 = vmul.f32 0.70710677, %v3638_v53  ;;  %v3645_v55 = vmul.f32 0.70710677, %v3639_v50  ;;  %v3646_v56 = vmul.f32 0.70710677, %v3640_v52 }
 0x8f5   : > { %v3641_v59 = vmul.f32 0.5, %v3638_v53  ;;  %v3642_v62 = vmul.f32 0.5, %v3639_v50  ;;  %v3643_v1 = vmul.f32 0.5, %v3640_v52 }
 0x8f6   : > { %5755 = verf.f32 %v3644_v54 }
 0x8f7   : > { %5757 = verf.f32 %v3645_v55 }
 0x8f8   : > { %5759 = verf.f32 %v3646_v56 }
 0x900   : > { %v5756_v57 = vpop.eup %5755 }
 0x901   : > { %v5758_v58 = vpop.eup %5757  ;;  %v3650_v60 = vadd.f32 1.0, %v5756_v57 }
 0x902   : > { %v5760_v61 = vpop.eup %5759  ;;  %v3651_v63 = vadd.f32 1.0, %v5758_v58  ;;  %v5018_v58 = vld [vmem:[%s6847_s6 + $0x4] sm:$0x3] }
 0x903   : > { %v3652_v2 = vadd.f32 1.0, %v5760_v61  ;;  %v3653_v3 = vmul.f32 %v3650_v60, %v3641_v59 }
 0x904   : > { %v3654_v5 = vmul.f32 %v3651_v63, %v3642_v62 }
 0x905   : > { %v3655_v7 = vmul.f32 %v3652_v2, %v3643_v1 }
 0x906   : > { %v5063_v8 = vpack.c.bf16 %v3654_v5, %v3653_v3 }
 0x907   : > { %v5064_v9 = vpack.c.bf16 %v3655_v7, %v3655_v7 }
 0x908   : > { %3669 = vst [vmem:[#allocation2 + $0x4] sm:$0x33] %v5063_v8 }
 0x909   : > { %3670 = vst [vmem:[#allocation2 + $0xc] sm:$0x3] %v5064_v9 }
 0x90f   : > { %v3671_v10 = vld [vmem:[#allocation2] sm:$0x33] }
 0x910   : > { %v3672_v11 = vld [vmem:[#allocation2 + $0x8] sm:$0x33]  ;;  %v5008_v12 = vcombine.low %v3671_v10, %v3671_v10  ;;  %v5009_v15 = vcombine.high %v3671_v10, %v3671_v10  ;;  %v5022_v10 = vld [vmem:[%s6847_s6 + $0x6] sm:$0x3] }
 0x911   : > { %v5011_v13 = vcombine.high %v3672_v11, %v3672_v11  ;;  %v5010_v16 = vcombine.low %v3672_v11, %v3672_v11  ;;  %v4222_v17 = vld [vmem:[#allocation2 + $0x4] sm:$0x33]  ;;  %v4223_v19 = vld [vmem:[#allocation2 + $0xc] sm:$0x33] }
 0x912   : > { %3686 = vrot.lane.b32.xlu1 %v5008_v12, %s6886_s26  ;;  %v5035_v18 = vcombine.high %v4222_v17, %v4222_v17  ;;  %v5037_v4 = vcombine.high %v4223_v19, %v4223_v19  ;;  %v5034_v20 = vcombine.low %v4222_v17, %v4222_v17  ;;  %v5036_v21 = vcombine.low %v4223_v19, %v4223_v19  ;;  %v4114_v62 = vld [vmem:[#allocation2 + $0x4] sm:$0x33]  ;;  %v5736_v9 = vld [vmem:[#allocation2 + $0xc] ss:$0 sps:$4 sm:$0x33]  }
 0x913   : > { %3798 = vrot.lane.b32.xlu0 %v5011_v13, %s6887_s27  ;;  %v5028_v5 = vcombine.high %v4114_v62, %v4114_v62  ;;  %v5027_v8 = vcombine.low %v4114_v62, %v4114_v62 }
 0x916   : > { %3688 = vrot.lane.b32.xlu1 %v5009_v15, %s6886_s26 }
 0x917   : > { %3900 = vrot.lane.b32.xlu0 %v5009_v15, %s6888_s28 }
 0x91a   : > { %3690 = vrot.lane.b32.xlu1 %v5010_v16, %s6886_s26 }
 0x91b   : > { %3904 = vrot.lane.b32.xlu0 %v5011_v13, %s6888_s28 }
 0x91e   : > { %3692 = vrot.lane.b32.xlu1 %v5011_v13, %s6886_s26 }
 0x91f   : > { %4009 = vrot.lane.b32.xlu0 %v5009_v15, %s6889_s14 }
 0x922   : > { %3792 = vrot.lane.b32.xlu1 %v5008_v12, %s6887_s27 }
 0x923   : > { %4013 = vrot.lane.b32.xlu0 %v5011_v13, %s6889_s14  ;;  %v4130_v13 = vsel %vm3701_vm11, %v5027_v8, 0 }
 0x926   : > { %3794 = vrot.lane.b32.xlu1 %v5009_v15, %s6887_s27  ;;  %v4136_v15 = vsel %vm3701_vm11, %v5736_v9, 0 }
 0x927   : > { %4238 = vrot.lane.b32.xlu0 %v5035_v18, %s6890_s16 }
 0x92a   : > { %3796 = vrot.lane.b32.xlu1 %v5010_v16, %s6887_s27  ;;  %s6797_s27 = scalar_lea.hbm %s6850_s9, %s5635_s15 }
 0x92b   : > { %4242 = vrot.lane.b32.xlu0 %v5037_v4, %s6890_s16 }
 0x92e   : > { %3898 = vrot.lane.b32.xlu1 %v5008_v12, %s6888_s28 }
 0x92f   : > { %4347 = vrot.lane.b32.xlu0 %v5035_v18, %s6891_s23 }
 0x932   : > { %3902 = vrot.lane.b32.xlu1 %v5010_v16, %s6888_s28  ;;  %s344_s28 = scalar_lea.vmem %s6842_s1, %s5966_s21  ;;  %s5861_s21 = smov [#allocation3]  }
 0x933   : > { %4351 = vrot.lane.b32.xlu0 %v5037_v4, %s6891_s23 }
 0x936   : > { %4007 = vrot.lane.b32.xlu1 %v5008_v12, %s6889_s14 }
 0x937   : > { %4456 = vrot.lane.b32.xlu0 %v5035_v18, %s6892_s24 }
 0x93a   : > { %4011 = vrot.lane.b32.xlu1 %v5010_v16, %s6889_s14  ;;  %s5781_s14 = sshll.u32 %s5861_s21, 4  ;;  %s5782_s14 = int_to_ptr.vmem [resolvable:$false] %s5781_s14 }
 0x93b   : > { %4460 = vrot.lane.b32.xlu0 %v5037_v4, %s6892_s24 }
 0x93e   : > { %4236 = vrot.lane.b32.xlu1 %v5034_v20, %s6890_s16 }
 0x93f   : > { %4565 = vrot.lane.b32.xlu0 %v5035_v18, %s6893_s17 }
 0x942   : > { %4240 = vrot.lane.b32.xlu1 %v5036_v21, %s6890_s16 }
 0x943   : > { %4569 = vrot.lane.b32.xlu0 %v5037_v4, %s6893_s17 }
 0x946   : > { %4345 = vrot.lane.b32.xlu1 %v5034_v20, %s6891_s23 }
 0x94a   : > { %4349 = vrot.lane.b32.xlu1 %v5036_v21, %s6891_s23 }
 0x94e   : > { %4454 = vrot.lane.b32.xlu1 %v5034_v20, %s6892_s24 }
 0x952   : > { %4458 = vrot.lane.b32.xlu1 %v5036_v21, %s6892_s24 }
 0x956   : > { %4563 = vrot.lane.b32.xlu1 %v5034_v20, %s6893_s17  ;;  %v5026_v20 = vld [vmem:[%s6847_s6 + $0x8] sm:$0x3] }
 0x95a   : > { %4567 = vrot.lane.b32.xlu1 %v5036_v21, %s6893_s17 }
 0x984   : > { %v3687_v22 = vpop.permute.xlu1 %3686 }
 0x985   : > { %v3799_v32 = vpop.permute.xlu0 %3798 }
 0x988   : > { %v3689_v23 = vpop.permute.xlu1 %3688 }
 0x989   : > { %v3694_v24 = vsel %vm391_vm1, %v3687_v22, %v3689_v23  ;;  %v3901_v35 = vpop.permute.xlu0 %3900 }
 0x98a   : > { %v3703_v27 = vsel %vm3701_vm11, %v3694_v24, 0 }
 0x98c   : > { %v3691_v25 = vpop.permute.xlu1 %3690 }
 0x98d   : > { %v3695_v26 = vsel %vm391_vm1, %v3689_v23, %v3691_v25  ;;  %v3905_v45 = vpop.permute.xlu0 %3904 }
 0x98e   : > { %5012 = vmatprep.subr.msk.bf16.mxu0 %vm3701_vm11, %v3695_v26 }
 0x98f   : > { %3712 = vmatpush1.bf16.msra.mxu0 %v3703_v27 }
 0x990   : > { %v3693_v29 = vpop.permute.xlu1 %3692 }
 0x991   : > { %v3696_v30 = vsel %vm391_vm1, %v3691_v25, %v3693_v29  ;;  %v4010_v54 = vpop.permute.xlu0 %4009 }
 0x992   : > { %v3709_v31 = vsel %vm3701_vm11, %v3696_v30, 0  ;;  %5013 = vmatmul.mubr.msk.bf16.vlgmr.msra.gmra.mrb[12].mxu0 %vm3697_vm12, %v5007_v28  ;;  %v5033_v30 = vld [vmem:[%s6847_s6 + $0xa] sm:$0x3] }
 0x993   : > { %5300 = vmatpush3.bf16.msra.mxu1 %v3709_v31  ;;  %3847 = vmatprep.mubr.bf16.mxu0 %v5841_v0 }
 0x994   : > { %v3793_v33 = vpop.permute.xlu1 %3792  ;;  %5305 = vmatprep.subr.bf16.mxu1 %v5842_v6 }
 0x995   : > { %v4014_v59 = vpop.permute.xlu0 %4013 }
 0x996   : > { %5302 = vmatmul.mubr.msk.bf16.vlgmr.msra.gmra.mrb[12].mxu1 %vm3697_vm12, %v5007_v28 }
 0x997   : > { %5307 = vmatprep.mubr.msk.bf16.mxu1 %vm5843_vm0, %v5842_v6 }
 0x998   : > { %v3795_v34 = vpop.permute.xlu1 %3794 }
 0x999   : > { %v3800_v36 = vsel %vm498_vm3, %v3793_v33, %v3795_v34  ;;  %v4239_v12 = vpop.permute.xlu0 %4238 }
 0x99a   : > { %v3807_v40 = vsel %vm3701_vm11, %v3800_v36, 0 }
 0x99c   : > { %v3797_v37 = vpop.permute.xlu1 %3796 }
 0x99d   : > { %v3801_v38 = vsel %vm498_vm3, %v3795_v34, %v3797_v37  ;;  %v3802_v39 = vsel %vm498_vm3, %v3797_v37, %v3799_v32  ;;  %v4243_v18 = vpop.permute.xlu0 %4242 }
 0x99e   : > { %v3813_v43 = vsel %vm3701_vm11, %v3802_v39, 0  ;;  %5015 = vmatprep.subr.msk.bf16.mxu0 %vm3701_vm11, %v3801_v38 }
 0x99f   : > { %3816 = vmatpush1.bf16.msra.mxu0 %v3807_v40  ;;  %5306 = vmatpush3.bf16.msra.mxu1 %v3813_v43  ;;  %v5041_v40 = vld [vmem:[%s6847_s6 + $0xc] sm:$0x3] }
 0x9a0   : > { %v3899_v49 = vpop.permute.xlu1 %3898  ;;  %5311 = vmatprep.subr.bf16.mxu1 %v5842_v6 }
 0x9a1   : > { %v3906_v51 = vsel %vm605_vm5, %v3899_v49, %v3901_v35  ;;  %v4348_v22 = vpop.permute.xlu0 %4347 }
 0x9a2   : > { %5016 = vmatmul.mubr.msk.bf16.vlgmr.msra.gmra.mrb[12].mxu0 %vm3697_vm12, %v3673_v44  ;;  %5308 = vmatmul.mubr.msk.bf16.vlgmr.msra.gmra.mrb[12].mxu1 %vm3697_vm12, %v3673_v44  ;;  %v3913_v55 = vsel %vm3701_vm11, %v3906_v51, 0 }
 0x9a3   : > { %3953 = vmatprep.mubr.bf16.mxu0 %v5841_v0  ;;  %5313 = vmatprep.mubr.msk.bf16.mxu1 %vm5843_vm0, %v5842_v6 }
 0x9a4   : > { %v3903_v53 = vpop.permute.xlu1 %3902 }
 0x9a5   : > { %v3907_v50 = vsel %vm605_vm5, %v3901_v35, %v3903_v53  ;;  %v3908_v52 = vsel %vm605_vm5, %v3903_v53, %v3905_v45  ;;  %v4352_v27 = vpop.permute.xlu0 %4351 }
 0x9a6   : > { %v3919_v56 = vsel %vm3701_vm11, %v3908_v52, 0  ;;  %5019 = vmatprep.subr.msk.bf16.mxu0 %vm3701_vm11, %v3907_v50 }
 0x9a7   : > { %3922 = vmatpush1.bf16.msra.mxu0 %v3913_v55  ;;  %5312 = vmatpush3.bf16.msra.mxu1 %v3919_v56 }
 0x9a8   : > { %v4008_v57 = vpop.permute.xlu1 %4007  ;;  %5317 = vmatprep.subr.bf16.mxu1 %v5842_v6 }
 0x9a9   : > { %v4015_v60 = vsel %vm715_vm6, %v4008_v57, %v4010_v54  ;;  %v4457_v32 = vpop.permute.xlu0 %4456  ;;  %v5049_v57 = vld [vmem:[%s6847_s6 + $0x10] sm:$0x3] }
 0x9aa   : > { %v4022_v3 = vsel %vm3701_vm11, %v4015_v60, 0 }
 0x9ac   : > { %v4012_v61 = vpop.permute.xlu1 %4011 }
 0x9ad   : > { %v4016_v63 = vsel %vm715_vm6, %v4010_v54, %v4012_v61  ;;  %v4017_v1 = vsel %vm715_vm6, %v4012_v61, %v4014_v59  ;;  %v4461_v37 = vpop.permute.xlu0 %4460  ;;  %v5045_v54 = vld [vmem:[%s6847_s6 + $0xe] sm:$0x3] }
 0x9ae   : > { %v4028_v2 = vsel %vm3701_vm11, %v4017_v1, 0  ;;  %5020 = vmatmul.mubr.msk.bf16.vlgmr.msra.gmra.mrb[12].mxu0 %vm3697_vm12, %v5018_v58  ;;  %5314 = vmatmul.mubr.msk.bf16.vlgmr.msra.gmra.mrb[12].mxu1 %vm3697_vm12, %v5018_v58  ;;  %v4738_v58 = vld [vmem:[%s344_s28] sm:$0x1] }
 0x9af   : > { %5023 = vmatprep.subr.msk.bf16.mxu0 %vm3701_vm11, %v4016_v63  ;;  %5318 = vmatpush3.bf16.msra.mxu1 %v4028_v2  ;;  %v5053_v59 = vmul.f32 -1.442695, %v4738_v58 }
 0x9b0   : > { %4031 = vmatpush1.bf16.msra.mxu0 %v4022_v3  ;;  %4062 = vmatprep.mubr.bf16.mxu0 %v5841_v0  ;;  %v4237_v7 = vpop.permute.xlu1 %4236 }
 0x9b1   : > { %5030 = vmatprep.subr.msk.bf16.mxu0 %vm3701_vm11, %v5028_v5  ;;  %5319 = vmatprep.mubr.msk.bf16.mxu1 %vm5843_vm0, %v5842_v6  ;;  %v4244_v19 = vsel %vm945_vm7, %v4237_v7, %v4239_v12  ;;  %v4566_v44 = vpop.permute.xlu0 %4565  ;;  %5761 = vpow2.f32 %v5053_v59 }
 0x9b2   : > { %5323 = vmatprep.subr.bf16.mxu1 %v5842_v6  ;;  %v4251_v23 = vsel %vm3701_vm11, %v4244_v19, 0 }
 0x9b4   : > { %v4241_v11 = vpop.permute.xlu1 %4240 }
 0x9b5   : > { %v4245_v16 = vsel %vm945_vm7, %v4239_v12, %v4241_v11  ;;  %v4246_v4 = vsel %vm945_vm7, %v4241_v11, %v4243_v18  ;;  %v4570_v53 = vpop.permute.xlu0 %4569 }
 0x9b6   : > { %v4257_v24 = vsel %vm3701_vm11, %v4246_v4, 0 }
 0x9b8   : > { %v4346_v17 = vpop.permute.xlu1 %4345 }
 0x9b9   : > { %v4353_v28 = vsel %vm1055_vm8, %v4346_v17, %v4348_v22 }
 0x9ba   : > { %5024 = vmatmul.mubr.msk.bf16.vlgmr.msra.gmra.mrb[12].mxu0 %vm3697_vm12, %v5022_v10  ;;  %5320 = vmatmul.mubr.msk.bf16.vlgmr.msra.gmra.mrb[12].mxu1 %vm3697_vm12, %v5022_v10  ;;  %v4360_v33 = vsel %vm3701_vm11, %v4353_v28, 0  ;;  %v5859_v28 = vmov 7  }
 0x9bb   : > { %4139 = vmatpush1.bf16.msra.mxu0 %v4130_v13  ;;  %5324 = vmatpush3.bf16.msra.mxu1 %v4136_v15  ;;  %v5762_v60 = vpop.eup %5761 }
 0x9bc   : > { %5038 = vmatprep.subr.msk.bf16.mxu0 %vm3701_vm11, %v4245_v16  ;;  %4170 = vmatprep.mubr.bf16.mxu0 %v5841_v0  ;;  %v4350_v21 = vpop.permute.xlu1 %4349 }
 0x9bd   : > { %5325 = vmatprep.mubr.msk.bf16.mxu1 %vm5843_vm0, %v5842_v6  ;;  %5329 = vmatprep.subr.bf16.mxu1 %v5842_v6  ;;  %v4354_v25 = vsel %vm1055_vm8, %v4348_v22, %v4350_v21  ;;  %v4355_v29 = vsel %vm1055_vm8, %v4350_v21, %v4352_v27  ;;  %v5858_v27 = vmov 6  }
 0x9be   : > { %v4366_v34 = vsel %vm3701_vm11, %v4355_v29, 0  ;;  %5701 = vset.pattern.permute.xlu1 %v5858_v27  ;;  %5702 = vset.pattern.permute.xlu0 %v5859_v28  ;;  %v5860_v29 = vmov 32  }
 0x9c0   : > { %v4455_v26 = vpop.permute.xlu1 %4454 }
 0x9c1   : > { %v4462_v38 = vsel %vm1165_vm9, %v4455_v26, %v4457_v32 }
 0x9c2   : > { %v4469_v45 = vsel %vm3701_vm11, %v4462_v38, 0 }
 0x9c4   : > { %v4459_v31 = vpop.permute.xlu1 %4458 }
 0x9c5   : > { %v4463_v35 = vsel %vm1165_vm9, %v4457_v32, %v4459_v31  ;;  %v4464_v39 = vsel %vm1165_vm9, %v4459_v31, %v4461_v37 }
 0x9c6   : > { %5031 = vmatmul.mubr.msk.bf16.vlgmr.msra.gmra.mrb[12].mxu0 %vm3697_vm12, %v5026_v20  ;;  %5326 = vmatmul.mubr.msk.bf16.vlgmr.msra.gmra.mrb[12].mxu1 %vm3697_vm12, %v5026_v20  ;;  %v4475_v49 = vsel %vm3701_vm11, %v4464_v39, 0  ;;  %v4746_v20 = vld [vmem:[%s6849_s8] sm:$0xf] }
 0x9c7   : > { %4260 = vmatpush1.bf16.msra.mxu0 %v4251_v23  ;;  %5330 = vmatpush3.bf16.msra.mxu1 %v4257_v24 }
 0x9c8   : > { %5042 = vmatprep.subr.msk.bf16.mxu0 %vm3701_vm11, %v4354_v25  ;;  %4291 = vmatprep.mubr.bf16.mxu0 %v5841_v0  ;;  %v4564_v36 = vpop.permute.xlu1 %4563 }
 0x9c9   : > { %5331 = vmatprep.mubr.msk.bf16.mxu1 %vm5843_vm0, %v5842_v6  ;;  %5335 = vmatprep.subr.bf16.mxu1 %v5842_v6  ;;  %v4571_v50 = vsel %vm1275_vm10, %v4564_v36, %v4566_v44 }
 0x9ca   : > { %v4578_v55 = vsel %vm3701_vm11, %v4571_v50, 0 }
 0x9cc   : > { %v4568_v43 = vpop.permute.xlu1 %4567 }
 0x9cd   : > { %v4572_v51 = vsel %vm1275_vm10, %v4566_v44, %v4568_v43  ;;  %v4573_v52 = vsel %vm1275_vm10, %v4568_v43, %v4570_v53 }
 0x9ce   : > { %v4584_v56 = vsel %vm3701_vm11, %v4573_v52, 0 }
 0x9d2   : > { %5039 = vmatmul.mubr.msk.bf16.vlgmr.msra.gmra.mrb[12].mxu0 %vm3697_vm12, %v5033_v30  ;;  %5332 = vmatmul.mubr.msk.bf16.vlgmr.msra.gmra.mrb[12].mxu1 %vm3697_vm12, %v5033_v30 }
 0x9d3   : > { %4369 = vmatpush1.bf16.msra.mxu0 %v4360_v33  ;;  %5336 = vmatpush3.bf16.msra.mxu1 %v4366_v34 }
 0x9d4   : > { %5046 = vmatprep.subr.msk.bf16.mxu0 %vm3701_vm11, %v4463_v35  ;;  %4400 = vmatprep.mubr.bf16.mxu0 %v5841_v0 }
 0x9d5   : > { %5337 = vmatprep.mubr.msk.bf16.mxu1 %vm5843_vm0, %v5842_v6  ;;  %5341 = vmatprep.subr.bf16.mxu1 %v5842_v6 }
 0x9de   : > { %5043 = vmatmul.mubr.msk.bf16.vlgmr.msra.gmra.mrb[12].mxu0 %vm3697_vm12, %v5041_v40  ;;  %5338 = vmatmul.mubr.msk.bf16.vlgmr.msra.gmra.mrb[12].mxu1 %vm3697_vm12, %v5041_v40 }
 0x9df   : > { %4478 = vmatpush1.bf16.msra.mxu0 %v4469_v45  ;;  %5342 = vmatpush3.bf16.msra.mxu1 %v4475_v49 }
 0x9e0   : > { %5050 = vmatprep.subr.msk.bf16.mxu0 %vm3701_vm11, %v4572_v51  ;;  %4509 = vmatprep.mubr.bf16.mxu0 %v5841_v0 }
 0x9e1   : > { %5343 = vmatprep.mubr.msk.bf16.mxu1 %vm5843_vm0, %v5842_v6  ;;  %5347 = vmatprep.subr.bf16.mxu1 %v5842_v6 }
 0x9ea   : > { %5047 = vmatmul.mubr.msk.bf16.vlgmr.msra.gmra.mrb[12].mxu0 %vm3697_vm12, %v5045_v54  ;;  %5344 = vmatmul.mubr.msk.bf16.vlgmr.msra.gmra.mrb[12].mxu1 %vm3697_vm12, %v5045_v54 }
 0x9eb   : > { %4587 = vmatpush1.bf16.msra.mxu0 %v4578_v55  ;;  %5348 = vmatpush3.bf16.msra.mxu1 %v4584_v56 }
 0x9ec   : > { %4618 = vmatprep.mubr.bf16.mxu0 %v5841_v0  ;;  %5349 = vmatprep.mubr.msk.bf16.mxu1 %vm5843_vm0, %v5842_v6  ;;  %v4742_v0 = vadd.f32 1.0, %v5762_v60 }
 0x9ee   : > { %5763 = vrcp.f32 %v4742_v0 }
 0x9f6   : > { %5051 = vmatmul.mubr.msk.bf16.vlgmr.msra.gmra.mrb[12].mxu0 %vm3697_vm12, %v5049_v57  ;;  %5350 = vmatmul.mubr.msk.bf16.vlgmr.msra.gmra.mrb[12].mxu1 %vm3697_vm12, %v5049_v57 }
 0x9f8   : > { %v5764_v61 = vpop.eup %5763 }
 0x9f9   : > { %v4745_v63 = vmul.f32 %v5764_v61, %v4738_v58 }
 0x9fb   : > { %v4751_v18 = vrot.slane %v4745_v63, %v1378_v42 }
 0x9fd   : > { %v4753_v26 = vmul.f32 %v4751_v18, %v4746_v20 }
 0x9ff   : > { %v4755_v42 = vsel %vm4754_vm13, %v4753_v26, 0.0 }
 0xac9   : > { %v4620_v6 = vpop.f32.mrb[12].mxu0  ;;  %v4661_v62 = vpop.f32.mrb[12].mxu1 }
 0xaca   : > { %v6753_v1 = vmul.f32 %v4620_v6, %v6168_v46  ;;  %v6756_v2 = vmul.f32 %v4661_v62, %v6170_v47  ;;  %v4622_v3 = vpop.f32.mrb[13].mxu0  ;;  %v5351_v5 = vpop.f32.mrb[13].mxu1 }
 0xacb   : > { %v6759_v7 = vmul.f32 %v4622_v3, %v6172_v48  ;;  %v4624_v8 = vpop.f32.mrb[14].mxu0  ;;  %v4664_v9 = vpop.f32.mrb[14].mxu1 }
 0xacc   : > { %v4673_v10 = vsel %vm399_vm2, %v6753_v1, 0.0  ;;  %v4687_v11 = vmul.f32 %v6753_v1, %v6753_v1  ;;  %v4625_v12 = vpop.f32.mrb[15].mxu0  ;;  %v5352_v13 = vpop.f32.mrb[15].mxu1  ;;  %v4689_v15 = vmul.f32 %v6756_v2, %v6756_v2  ;;  %v4676_v21 = vsel %vm399_vm2, %v6756_v2, 0.0 }
 0xacd   : > { %v4674_v16 = vsel %vm399_vm2, %v6759_v7, 0.0  ;;  %v4688_v17 = vmul.f32 %v6759_v7, %v6759_v7 }
 0xace   : > { %v4675_v19 = vadd.f32 %v4674_v16, %v4673_v10  ;;  %v4690_v4 = vsel %vm399_vm2, %v4687_v11, 0.0  ;;  %v4693_v25 = vsel %vm399_vm2, %v4689_v15, 0.0 }
 0xacf   : > { %v4691_v22 = vsel %vm399_vm2, %v4688_v17, 0.0 }
 0xad0   : > { %v4677_v23 = vadd.f32 %v4676_v21, %v4675_v19  ;;  %v4692_v24 = vadd.f32 %v4691_v22, %v4690_v4 }
 0xad2   : > { %4678 = vadd.xlane.f32.xlu1 %v4677_v23  ;;  %v4694_v41 = vadd.f32 %v4693_v25, %v4692_v24 }
 0xad4   : > { %4695 = vadd.xlane.f32.xlu0 %v4694_v41 }
 0xad8   : > { %4756 = vadd.xlane.f32.xlu0 %v4755_v42 }
 0xae3   : > { %4722 = vperm.xlu1 %5701, %v6578_v14  }
 0xae7   : > { %5703 = vset.pattern.permute.xlu1 %v5860_v29 }
 0xaee   : > { %4729 = vperm.xlu0 %5702, %v6578_v14  }
 0xaf2   : > { %5704 = vset.pattern.permute.xlu0 %v5860_v29 }
 0xb5f   : > { %v4679_v30 = vpop.xlane.xlu1 %4678 }
 0xb60   : > { %v4680_v31 = vrot.slane %v4679_v30, 4 }
 0xb61   : > { %v4696_v32 = vpop.xlane.xlu0 %4695 }
 0xb62   : > { %v4681_v33 = vadd.f32 %v4680_v31, %v4679_v30  ;;  %v4697_v34 = vrot.slane %v4696_v32, 4 }
 0xb63   : > { %v4723_v57 = vpop.permute.xlu1 %4722 }
 0xb64   : > { %v4682_v35 = vrot.slane %v4681_v33, 2  ;;  %v4698_v36 = vadd.f32 %v4697_v34, %v4696_v32 }
 0xb65   : > { %v4757_v37 = vpop.xlane.xlu0 %4756 }
 0xb66   : > { %v4699_v38 = vrot.slane %v4698_v36, 2  ;;  %v4758_v39 = vadd.f32 %v4757_v37, %v4746_v20  ;;  %v4683_v40 = vadd.f32 %v4682_v35, %v4681_v33 }
 0xb68   : > { %v4684_v43 = vrot.slane %v4683_v40, 1  ;;  %4761 = vperm.xlu1 %5703, %v4758_v39   ;;  %v4700_v44 = vadd.f32 %v4699_v38, %v4698_v36 }
 0xb6a   : > { %v4685_v45 = vadd.f32 %v4684_v43, %v4683_v40  ;;  %v4701_v49 = vrot.slane %v4700_v44, 1 }
 0xb6c   : > { %5629 = vpush %v4685_v45  ;;  %v4702_v14 = vadd.f32 %v4701_v49, %v4700_v44 }
 0xb6d   : > { %v4730_v0 = vpop.permute.xlu0 %4729 }
 0xb6e   : > { %5631 = vpush %v4702_v14 }
 0xb9d   : > { %s5630_s16 = spop %5629 }
 0xb9e   : > { %s4704_s23 = smul.f32 0.0009765625, %s5630_s16  ;;  %s5783_s16 = scalar_lea.vmem %s5782_s14, 384 }
 0xb9f   : > { %s5632_s24 = spop %5631 }
 0xba0   : > { %s4706_s17 = smul.f32 %s4704_s23, %s4704_s23  ;;  %v4709_v50 = vstv %s4704_s23 }
 0xba1   : > { %s4705_s22 = smul.f32 0.0009765625, %s5632_s24  ;;  %v4710_v52 = vsub.f32 %v6753_v1, %v4709_v50  ;;  %v4711_v54 = vsub.f32 %v6759_v7, %v4709_v50  ;;  %v4712_v55 = vsub.f32 %v6756_v2, %v4709_v50 }
 0xba3   : > { %s4707_s0 = ssub.f32 %s4705_s22, %s4706_s17 }
 0xba5   : > { %s4708_s2 = smax.f32 %s6895_s18, %s4707_s0  ;;  %s5609_s18 = smul.u32 12, %s334_s4 }
 0xba6   : > { %s4713_s3 = sadd.f32 1e-05, %s4708_s2 }
 0xba7   : > { %s336_s20 = scalar_lea.vmem [#allocation3], %s5609_s18 }
 0xba8   : > { %v4714_v51 = vstv %s4713_s3  ;;  %s4788_s25 = sshll.u32 %s336_s20, 4  ;;  %s6799_s25 = int_to_ptr.vmem [resolvable:$true] %s4788_s25 }
 0xba9   : > { %5765 = vrsqrt.f32 %v4714_v51  ;;  %s5777_s28 = scalar_lea.vmem %s6799_s25, 192  ;;  %p5784_p0 = scmp.lt.s32.totalorder %s6799_s25, %s5782_s14 }
 0xbaa   : > { %p5778_p11 = scmp.ne.s32.totalorder %s6799_s25, %s5777_s28  ;;  %p5785_p1 = scmp.lt.s32.totalorder %s5783_s16, %s5777_s28 }
 0xbac   : > { %p5779_p12 = pnand %p5778_p11, %p5950_p5  ;;  %p5786_p2 = por %p5785_p1, %p5784_p0 }
 0xbae   : > { %p5780_p13 = pneg %p5779_p12 }
 0xbb0   : > { %p5787_p3 = pnand %p5786_p2, %p5780_p13 }
 0xbb3   : > { %v5766_v53 = vpop.eup %5765 }
 0xbb4   : > { %5633 = vpush %v5766_v53 }
 0xbe5   : > { %s5634_s11 = spop %5633 }
 0xbe6   : > { %v4717_v56 = vstv %s5634_s11 }
 0xbe7   : > { %v4718_v58 = vmul.f32 %v4717_v56, %v4710_v52  ;;  %v4719_v59 = vmul.f32 %v4717_v56, %v4711_v54  ;;  %v4720_v60 = vmul.f32 %v4717_v56, %v4712_v55  ;;  %v4762_v5 = vpop.permute.xlu1 %4761 }
 0xbe9   : > { %v4725_v61 = vmul.f32 %v4723_v57, %v4718_v58  ;;  %v4726_v6 = vmul.f32 %v4723_v57, %v4719_v59  ;;  %v4727_v62 = vmul.f32 %v4723_v57, %v4720_v60 }
 0xbeb   : > { %v4732_v63 = vadd.f32 %v4730_v0, %v4725_v61  ;;  %v4733_v3 = vadd.f32 %v4730_v0, %v4726_v6  ;;  %v4734_v1 = vadd.f32 %v4730_v0, %v4727_v62 }
 0xbed   : > { %v4735_v2 = vmul.f32 %v4732_v63, %v6168_v46  ;;  %v4736_v7 = vmul.f32 %v4733_v3, %v6172_v48  ;;  %v4737_v8 = vmul.f32 %v4734_v1, %v6170_v47 }
 0xbef   : > { %v4764_v9 = vadd.f32 %v4762_v5, %v4735_v2  ;;  %v4765_v10 = vadd.f32 %v4762_v5, %v4736_v7  ;;  %v4766_v11 = vadd.f32 %v4762_v5, %v4737_v8 }
 0xbf1   : > { %v4769_v12 = vcombine.low %v4764_v9, %v4765_v10  ;;  %4772 = vst [vmem:[%s336_s20 + $0x8] sm:$0xf] %v4766_v11 }
 0xbf3   : > { %4771 = vst [vmem:[%s336_s20] sm:$0xff] %v4769_v12 }
 0xbf4   : > { %5790 = shalt.err (!%p5787_p3)
}
 0xbf5   : > { %s5791_s23 = scalar_lea.hbm %s6797_s27, 192  ;;  %s5795_s22 = scalar_lea.hbm %s6850_s9, 384 }
 0xbf6   : > { %p5792_p4 = scmp.ne.s32.totalorder %s6797_s27, %s5791_s23  ;;  %p5796_p9 = scmp.lt.u32.totalorder %s6797_s27, %s6850_s9 }
 0xbf7   : > { %p5797_p10 = scmp.lt.u32.totalorder %s5795_s22, %s5791_s23  ;;  %p5799_p12 = scmp.lt.u32.totalorder %s5791_s23, %s6797_s27 }
 0xbf8   : > { %p5793_p7 = pnand %p5792_p4, %p5950_p5 }
 0xbf9   : > { %p5798_p11 = por %p5797_p10, %p5796_p9 }
 0xbfa   : > { %p5794_p8 = pneg %p5793_p7 }
 0xbfb   : > { %p5800_p13 = por %p5799_p12, %p5798_p11 }
 0xbfd   : > { %p5801_p0 = pnand %p5800_p13, %p5794_p8 }
 0xbff   : > { %5804 = shalt.err (!%p5801_p0)
}
 0xc00   : > { %5636 = dma.vmem_to_hbm [thread:$0]  (%p5950_p5), %s6799_s25, 192, %s6797_s27, %s4774_s13  }
 0xc01 PF: > { %p5642_p1 = scmp.ge.s32.totalorder %s5839_s12, 2  ;;  %s4800_s4 = sand.u32 1, %s5827_s30  }
 0xc02   : > { %s4801_s11 = scalar_lea.sflag [#allocation4], %s4800_s4 }
 0xc03   : > { %p5639_p2 = pnand %p5642_p1, %p5954_p6 }
 0xc05   : > { %5822 = dma.done.wait (!%p5639_p2), %s4801_s11, 192  }
 0xc06   : > { %5824 = vsyncadd (!%p5639_p2), %s4801_s11, 4294967104  ;;  %s6897_s12 = sld [smem:[#allocation7_spill]]  ;;  %s6898_s18 = sld [smem:[#allocation6_spill]] }
 0xc07   : > { %s6899_s11 = sld [smem:[#allocation8_spill]]  ;;  %s6900_s30 = smov %s5831_s10 }
 0xc0c   : > { %p19_p3 = scmp.ge.s32.totalorder %s6897_s12, 4   ;;  %s6901_s10 = smov %s6898_s18 }
 0xc0e   :  { %21 = sbr.rel (!%p19_p3) target bundleno = 8 (0x8), region = 126 }
 0xc15   :  { %4806 = vsyncpa [#allocation4], 1 }
 0xc16   :  { %4808 = vsyncpa [#allocation4 + $0x1], 1 }

</bundles_post_ra>
